<compile_context>
chip_gen: v7x
topology: tpu7x:2x2x1
jax: 0.10.0
libtpu: 0.0.40
codegen_flags: <defaults>
</compile_context>

<pallas_src>
import jax
import jax.numpy as jnp
from jax.experimental import pallas as pl
from jax.experimental.pallas import tpu as pltpu

# ----- scaled-down dims consistent with CNN_LSTM.forward -----
B = 5            # batch_size hardcoded in the module (reshape(5, -1), hidden state)
T = 8            # seq_len (orig 100)
IMG = 16         # spatial size (orig 224-ish)
KH = KW = 7      # replaced first conv: Conv2d(1, 96, (7, 7), stride=(2, 2))
STRIDE = 2
C1 = 32          # conv out channels (orig 96)
FEAT = 32        # backbone output feature dim == LSTM input_size (orig 1000)
HID = 32         # LSTM hidden_size (orig 1000)
HO = (IMG - KH) // STRIDE + 1
WO = (IMG - KW) // STRIDE + 1
P = HO * WO      # output spatial positions per frame
K = KH * KW      # patch length (Cin = 1)
N = T * B        # number of frames, time-major (t, b) order

# TODO(synk): SqueezeNet Fire modules / maxpools / pretrained weights are not reproduced;
# the backbone is simplified to [conv7x7 stride2 + ReLU] -> global avg pool -> [linear + ReLU]
# producing a FEAT-dim vector per frame (same role as the 1000-dim SqueezeNet logits).


# ---------------- fused Pallas kernel ----------------

def fused_kernel(p_ref, wconv_ref, bconv_ref, wc_ref, bc_ref,
                 wih_ref, whh_ref, bl_ref, wfc_ref, bfc_ref, o_ref, gih_ref):
    # ---- backbone: conv-as-matmul over ALL frames at once (fills MXU sublanes) ----
    h = jnp.dot(p_ref[...], wconv_ref[...], preferred_element_type=jnp.float32) + bconv_ref[...]
    h = jnp.maximum(h, 0.0)                                            # (N*P, C1)

    # global average pool per frame done on the MXU via an (N, N*P) averaging matrix
    # (instead of a cross-sublane XLU reduce); the averaging matrix is built from iota in-vreg.
    row = jax.lax.broadcasted_iota(jnp.int32, (N, N * P), 0)
    col = jax.lax.broadcasted_iota(jnp.int32, (N, N * P), 1)
    in_frame = (col >= row * P) & (col < (row + 1) * P)
    pool = jnp.where(in_frame, jnp.float32(1.0 / P), jnp.float32(0.0))
    pooled = jnp.dot(pool, h, preferred_element_type=jnp.float32)      # (N, C1)

    feats = jnp.dot(pooled, wc_ref[...], preferred_element_type=jnp.float32) + bc_ref[...]
    feats = jnp.maximum(feats, 0.0)                                    # (N, FEAT), (t, b) row order

    # ---- LSTM: input projection + bias hoisted out of the recurrence as ONE matmul ----
    gih_ref[...] = (jnp.dot(feats, wih_ref[...], preferred_element_type=jnp.float32)
                    + bl_ref[...])                                     # (N, 4*HID)
    whh = whh_ref[...]

    h_t = jnp.zeros((B, HID), jnp.float32)
    c_t = jnp.zeros((B, HID), jnp.float32)
    hs = []
    for t in range(T):   # statically unrolled; carries are single-vreg sized, kept in registers
        gates = gih_ref[t * B:(t + 1) * B, :] + jnp.dot(
            h_t, whh, preferred_element_type=jnp.float32)              # (B, 4*HID)
        i = jax.nn.sigmoid(gates[:, 0 * HID:1 * HID])
        f = jax.nn.sigmoid(gates[:, 1 * HID:2 * HID])
        g = jnp.tanh(gates[:, 2 * HID:3 * HID])
        o = jax.nn.sigmoid(gates[:, 3 * HID:4 * HID])
        c_t = f * c_t + i * g
        h_t = o * jnp.tanh(c_t)
        hs.append(h_t)

    # ---- FC fused in: (B, T*HID) = (5, 256) is lane-dense; matches out.reshape(5, -1) ----
    flat = jnp.concatenate(hs, axis=1)
    o_ref[...] = (jnp.dot(flat, wfc_ref[...], preferred_element_type=jnp.float32)
                  + bfc_ref[...])                                      # (B, 1)


# ---------------- wrappers ----------------

def im2col(frames):
    """frames: (N, H, W) single-channel -> (N, P, K) patches, stride-2 VALID 7x7."""
    cols = []
    for dh in range(KH):
        for dw in range(KW):
            cols.append(frames[:, dh:dh + STRIDE * HO:STRIDE, dw:dw + STRIDE * WO:STRIDE])
    patches = jnp.stack(cols, axis=-1)                                 # (N, HO, WO, K)
    return patches.reshape(frames.shape[0], P, K)


def cnn_lstm_forward(x, params):
    # x: (B, T, IMG, IMG) float32; equivalent of `for inp in inputs: backbone(inp.unsqueeze(1))`
    # Frames go time-major so the kernel slices contiguous per-timestep row blocks — no
    # reshape/transpose plumbing between (former) kernels.
    frames = jnp.transpose(x, (1, 0, 2, 3)).reshape(N, IMG, IMG)
    patches = im2col(frames).reshape(N * P, K)                         # (1000, 49) glue gather in JAX
    vmem = pl.BlockSpec(memory_space=pltpu.MemorySpace.VMEM)
    y = pl.pallas_call(
        fused_kernel,
        out_shape=jax.ShapeDtypeStruct((B, 1), jnp.float32),
        in_specs=[vmem] * 10,
        out_specs=vmem,
        scratch_shapes=[pltpu.VMEM((N, 4 * HID), jnp.float32)],        # hoisted gate projections
    )(patches, params["wconv"], params["bconv"], params["wc"], params["bc"],
      params["wih"], params["whh"], params["blstm"], params["wfc"], params["bfc"])
    return y


def reference_forward(x, params):
    """Pure-JAX reference mirroring the kernel math (for a sanity check)."""
    frames = jnp.transpose(x, (1, 0, 2, 3)).reshape(N, IMG, IMG)
    patches = im2col(frames).reshape(N * P, K)
    h = jnp.maximum(patches @ params["wconv"] + params["bconv"], 0.0)
    pooled = h.reshape(N, P, C1).mean(axis=1)                          # (N, C1)
    feats = jnp.maximum(pooled @ params["wc"] + params["bc"], 0.0)     # (N, FEAT)
    feats = feats.reshape(T, B, FEAT)
    h_t = jnp.zeros((B, HID), jnp.float32)
    c_t = jnp.zeros((B, HID), jnp.float32)
    outs = []
    for t in range(T):
        gates = feats[t] @ params["wih"] + h_t @ params["whh"] + params["blstm"]
        i = jax.nn.sigmoid(gates[:, :HID])
        f = jax.nn.sigmoid(gates[:, HID:2 * HID])
        g = jnp.tanh(gates[:, 2 * HID:3 * HID])
        o = jax.nn.sigmoid(gates[:, 3 * HID:])
        c_t = f * c_t + i * g
        h_t = o * jnp.tanh(c_t)
        outs.append(h_t)
    flat = jnp.concatenate(outs, axis=1)                               # (B, T*HID)
    return flat @ params["wfc"] + params["bfc"]


def init_params(key):
    ks = jax.random.split(key, 8)
    s = 0.05
    return {
        "wconv": s * jax.random.normal(ks[0], (K, C1), jnp.float32),
        "bconv": s * jax.random.normal(ks[1], (1, C1), jnp.float32),
        "wc":    s * jax.random.normal(ks[2], (C1, FEAT), jnp.float32),
        "bc":    s * jax.random.normal(ks[3], (1, FEAT), jnp.float32),
        # LSTM: gate order (i, f, g, o) as in PyTorch; b = b_ih + b_hh folded together
        "wih":   s * jax.random.normal(ks[4], (FEAT, 4 * HID), jnp.float32),
        "whh":   s * jax.random.normal(ks[5], (HID, 4 * HID), jnp.float32),
        "blstm": s * jax.random.normal(ks[6], (1, 4 * HID), jnp.float32),
        "wfc":   s * jax.random.normal(ks[7], (T * HID, 1), jnp.float32),
        "bfc":   jnp.zeros((1, 1), jnp.float32),
    }


if __name__ == "__main__":
    key = jax.random.PRNGKey(0)
    kx, kp = jax.random.split(key)
    x = jax.random.normal(kx, (B, T, IMG, IMG), jnp.float32)
    params = init_params(kp)

    y = jax.jit(cnn_lstm_forward)(x, params)
    jax.block_until_ready(y)
    assert y.shape == (B, 1) and y.dtype == jnp.float32

    y_ref = reference_forward(x, params)
    assert jnp.allclose(y, y_ref, atol=1e-2, rtol=1e-2), float(jnp.max(jnp.abs(y - y_ref)))
    print("KERNEL_OK")
</pallas_src>

<mosaic_0001>
module attributes {stable_mosaic.version = 11 : i64} {
  func.func @fused_kernel(%arg0: memref<1000x49xf32, #tpu.memory_space<vmem>>, %arg1: memref<49x32xf32, #tpu.memory_space<vmem>>, %arg2: memref<1x32xf32, #tpu.memory_space<vmem>>, %arg3: memref<32x32xf32, #tpu.memory_space<vmem>>, %arg4: memref<1x32xf32, #tpu.memory_space<vmem>>, %arg5: memref<32x128xf32, #tpu.memory_space<vmem>>, %arg6: memref<32x128xf32, #tpu.memory_space<vmem>>, %arg7: memref<1x128xf32, #tpu.memory_space<vmem>>, %arg8: memref<256x1xf32, #tpu.memory_space<vmem>>, %arg9: memref<1x1xf32, #tpu.memory_space<vmem>>, %arg10: memref<5x1xf32, #tpu.memory_space<vmem>>, %arg11: memref<40x128xf32, #tpu.memory_space<vmem>>) attributes {dimension_semantics = [], scalar_prefetch = 0 : i64, scratch_operands = 1 : i64, tpu.core_type = #tpu.core_type<tc>} {
    %c0 = arith.constant 0 : index
    %c0_0 = arith.constant 0 : index
    %0 = vector.load %arg0[%c0, %c0_0] : memref<1000x49xf32, #tpu.memory_space<vmem>>, vector<1000x49xf32>
    %c0_1 = arith.constant 0 : index
    %c0_2 = arith.constant 0 : index
    %1 = vector.load %arg1[%c0_1, %c0_2] : memref<49x32xf32, #tpu.memory_space<vmem>>, vector<49x32xf32>
    %cst = arith.constant dense<0.000000e+00> : vector<1000x32xf32>
    %2 = tpu.matmul %0, %1, %cst {dimension_numbers = #tpu.dot_dimension_numbers<[1], [0], [0], [1], [0, 0, 1, 1], [], []>} : vector<1000x49xf32>, vector<49x32xf32>, vector<1000x32xf32> -> vector<1000x32xf32>
    %c0_3 = arith.constant 0 : index
    %c0_4 = arith.constant 0 : index
    %3 = vector.load %arg2[%c0_3, %c0_4] : memref<1x32xf32, #tpu.memory_space<vmem>>, vector<1x32xf32>
    %4 = vector.broadcast %3 : vector<1x32xf32> to vector<1000x32xf32>
    %5 = arith.addf %2, %4 : vector<1000x32xf32>
    %cst_5 = arith.constant 0.000000e+00 : f32
    %6 = vector.broadcast %cst_5 : f32 to vector<1000x32xf32>
    %7 = arith.maximumf %5, %6 : vector<1000x32xf32>
    %8 = tpu.iota {dimensions = array<i32: 0>} : vector<40x1000xi32>
    %9 = tpu.iota {dimensions = array<i32: 1>} : vector<40x1000xi32>
    %c25_i32 = arith.constant 25 : i32
    %10 = vector.broadcast %c25_i32 : i32 to vector<40x1000xi32>
    %11 = arith.muli %8, %10 : vector<40x1000xi32>
    %12 = arith.cmpi sge, %9, %11 : vector<40x1000xi32>
    %c1_i32 = arith.constant 1 : i32
    %13 = vector.broadcast %c1_i32 : i32 to vector<40x1000xi32>
    %14 = arith.addi %8, %13 : vector<40x1000xi32>
    %c25_i32_6 = arith.constant 25 : i32
    %15 = vector.broadcast %c25_i32_6 : i32 to vector<40x1000xi32>
    %16 = arith.muli %14, %15 : vector<40x1000xi32>
    %17 = arith.cmpi slt, %9, %16 : vector<40x1000xi32>
    %18 = arith.andi %12, %17 : vector<40x1000xi1>
    %cst_7 = arith.constant 4.000000e-02 : f32
    %cst_8 = arith.constant 0.000000e+00 : f32
    %19 = vector.broadcast %cst_7 : f32 to vector<40x1000xf32>
    %20 = vector.broadcast %cst_8 : f32 to vector<40x1000xf32>
    %21 = arith.select %18, %19, %20 : vector<40x1000xi1>, vector<40x1000xf32>
    %cst_9 = arith.constant dense<0.000000e+00> : vector<40x32xf32>
    %22 = tpu.matmul %21, %7, %cst_9 {dimension_numbers = #tpu.dot_dimension_numbers<[1], [0], [0], [1], [0, 0, 1, 1], [], []>} : vector<40x1000xf32>, vector<1000x32xf32>, vector<40x32xf32> -> vector<40x32xf32>
    %c0_10 = arith.constant 0 : index
    %c0_11 = arith.constant 0 : index
    %23 = vector.load %arg3[%c0_10, %c0_11] : memref<32x32xf32, #tpu.memory_space<vmem>>, vector<32x32xf32>
    %cst_12 = arith.constant dense<0.000000e+00> : vector<40x32xf32>
    %24 = tpu.matmul %22, %23, %cst_12 {dimension_numbers = #tpu.dot_dimension_numbers<[1], [0], [0], [1], [0, 0, 1, 1], [], []>} : vector<40x32xf32>, vector<32x32xf32>, vector<40x32xf32> -> vector<40x32xf32>
    %c0_13 = arith.constant 0 : index
    %c0_14 = arith.constant 0 : index
    %25 = vector.load %arg4[%c0_13, %c0_14] : memref<1x32xf32, #tpu.memory_space<vmem>>, vector<1x32xf32>
    %26 = vector.broadcast %25 : vector<1x32xf32> to vector<40x32xf32>
    %27 = arith.addf %24, %26 : vector<40x32xf32>
    %cst_15 = arith.constant 0.000000e+00 : f32
    %28 = vector.broadcast %cst_15 : f32 to vector<40x32xf32>
    %29 = arith.maximumf %27, %28 : vector<40x32xf32>
    %c0_16 = arith.constant 0 : index
    %c0_17 = arith.constant 0 : index
    %30 = vector.load %arg5[%c0_16, %c0_17] : memref<32x128xf32, #tpu.memory_space<vmem>>, vector<32x128xf32>
    %cst_18 = arith.constant dense<0.000000e+00> : vector<40x128xf32>
    %31 = tpu.matmul %29, %30, %cst_18 {dimension_numbers = #tpu.dot_dimension_numbers<[1], [0], [0], [1], [0, 0, 1, 1], [], []>} : vector<40x32xf32>, vector<32x128xf32>, vector<40x128xf32> -> vector<40x128xf32>
    %c0_19 = arith.constant 0 : index
    %c0_20 = arith.constant 0 : index
    %32 = vector.load %arg7[%c0_19, %c0_20] : memref<1x128xf32, #tpu.memory_space<vmem>>, vector<1x128xf32>
    %33 = vector.broadcast %32 : vector<1x128xf32> to vector<40x128xf32>
    %34 = arith.addf %31, %33 : vector<40x128xf32>
    %c0_21 = arith.constant 0 : index
    %c0_22 = arith.constant 0 : index
    %35 = vector.load %arg11[%c0_21, %c0_22] : memref<40x128xf32, #tpu.memory_space<vmem>>, vector<40x128xf32>
    tpu.vector_store %arg11[%c0_21, %c0_22], %34 {strides = array<i32>} : memref<40x128xf32, #tpu.memory_space<vmem>>, vector<40x128xf32>,
    %c0_23 = arith.constant 0 : index
    %c0_24 = arith.constant 0 : index
    %36 = vector.load %arg6[%c0_23, %c0_24] : memref<32x128xf32, #tpu.memory_space<vmem>>, vector<32x128xf32>
    %cst_25 = arith.constant 0.000000e+00 : f32
    %37 = vector.broadcast %cst_25 : f32 to vector<5x32xf32>
    %cst_26 = arith.constant 0.000000e+00 : f32
    %38 = vector.broadcast %cst_26 : f32 to vector<5x32xf32>
    %c0_27 = arith.constant 0 : index
    %c0_28 = arith.constant 0 : index
    %39 = vector.load %arg11[%c0_27, %c0_28] : memref<40x128xf32, #tpu.memory_space<vmem>>, vector<5x128xf32>
    %cst_29 = arith.constant dense<0.000000e+00> : vector<5x128xf32>
    %40 = tpu.matmul %37, %36, %cst_29 {dimension_numbers = #tpu.dot_dimension_numbers<[1], [0], [0], [1], [0, 0, 1, 1], [], []>} : vector<5x32xf32>, vector<32x128xf32>, vector<5x128xf32> -> vector<5x128xf32>
    %41 = arith.addf %39, %40 : vector<5x128xf32>
    %42 = vector.extract_strided_slice %41 {offsets = [0, 0], sizes = [5, 32], strides = [1, 1]} : vector<5x128xf32> to vector<5x32xf32>
    %43 = arith.negf %42 : vector<5x32xf32>
    %44 = math.exp %43 : vector<5x32xf32>
    %cst_30 = arith.constant 1.000000e+00 : f32
    %45 = vector.broadcast %cst_30 : f32 to vector<5x32xf32>
    %46 = arith.addf %45, %44 : vector<5x32xf32>
    %47 = arith.divf %45, %46 : vector<5x32xf32>
    %48 = vector.extract_strided_slice %41 {offsets = [0, 32], sizes = [5, 32], strides = [1, 1]} : vector<5x128xf32> to vector<5x32xf32>
    %49 = arith.negf %48 : vector<5x32xf32>
    %50 = math.exp %49 : vector<5x32xf32>
    %cst_31 = arith.constant 1.000000e+00 : f32
    %51 = vector.broadcast %cst_31 : f32 to vector<5x32xf32>
    %52 = arith.addf %51, %50 : vector<5x32xf32>
    %53 = arith.divf %51, %52 : vector<5x32xf32>
    %54 = vector.extract_strided_slice %41 {offsets = [0, 64], sizes = [5, 32], strides = [1, 1]} : vector<5x128xf32> to vector<5x32xf32>
    %55 = math.tanh %54 : vector<5x32xf32>
    %56 = vector.extract_strided_slice %41 {offsets = [0, 96], sizes = [5, 32], strides = [1, 1]} : vector<5x128xf32> to vector<5x32xf32>
    %57 = arith.negf %56 : vector<5x32xf32>
    %58 = math.exp %57 : vector<5x32xf32>
    %cst_32 = arith.constant 1.000000e+00 : f32
    %59 = vector.broadcast %cst_32 : f32 to vector<5x32xf32>
    %60 = arith.addf %59, %58 : vector<5x32xf32>
    %61 = arith.divf %59, %60 : vector<5x32xf32>
    %62 = arith.mulf %53, %38 : vector<5x32xf32>
    %63 = arith.mulf %47, %55 : vector<5x32xf32>
    %64 = arith.addf %62, %63 : vector<5x32xf32>
    %65 = math.tanh %64 : vector<5x32xf32>
    %66 = arith.mulf %61, %65 : vector<5x32xf32>
    %c5 = arith.constant 5 : index
    %c0_33 = arith.constant 0 : index
    %67 = vector.load %arg11[%c5, %c0_33] : memref<40x128xf32, #tpu.memory_space<vmem>>, vector<5x128xf32>
    %cst_34 = arith.constant dense<0.000000e+00> : vector<5x128xf32>
    %68 = tpu.matmul %66, %36, %cst_34 {dimension_numbers = #tpu.dot_dimension_numbers<[1], [0], [0], [1], [0, 0, 1, 1], [], []>} : vector<5x32xf32>, vector<32x128xf32>, vector<5x128xf32> -> vector<5x128xf32>
    %69 = arith.addf %67, %68 : vector<5x128xf32>
    %70 = vector.extract_strided_slice %69 {offsets = [0, 0], sizes = [5, 32], strides = [1, 1]} : vector<5x128xf32> to vector<5x32xf32>
    %71 = arith.negf %70 : vector<5x32xf32>
    %72 = math.exp %71 : vector<5x32xf32>
    %cst_35 = arith.constant 1.000000e+00 : f32
    %73 = vector.broadcast %cst_35 : f32 to vector<5x32xf32>
    %74 = arith.addf %73, %72 : vector<5x32xf32>
    %75 = arith.divf %73, %74 : vector<5x32xf32>
    %76 = vector.extract_strided_slice %69 {offsets = [0, 32], sizes = [5, 32], strides = [1, 1]} : vector<5x128xf32> to vector<5x32xf32>
    %77 = arith.negf %76 : vector<5x32xf32>
    %78 = math.exp %77 : vector<5x32xf32>
    %cst_36 = arith.constant 1.000000e+00 : f32
    %79 = vector.broadcast %cst_36 : f32 to vector<5x32xf32>
    %80 = arith.addf %79, %78 : vector<5x32xf32>
    %81 = arith.divf %79, %80 : vector<5x32xf32>
    %82 = vector.extract_strided_slice %69 {offsets = [0, 64], sizes = [5, 32], strides = [1, 1]} : vector<5x128xf32> to vector<5x32xf32>
    %83 = math.tanh %82 : vector<5x32xf32>
    %84 = vector.extract_strided_slice %69 {offsets = [0, 96], sizes = [5, 32], strides = [1, 1]} : vector<5x128xf32> to vector<5x32xf32>
    %85 = arith.negf %84 : vector<5x32xf32>
    %86 = math.exp %85 : vector<5x32xf32>
    %cst_37 = arith.constant 1.000000e+00 : f32
    %87 = vector.broadcast %cst_37 : f32 to vector<5x32xf32>
    %88 = arith.addf %87, %86 : vector<5x32xf32>
    %89 = arith.divf %87, %88 : vector<5x32xf32>
    %90 = arith.mulf %81, %64 : vector<5x32xf32>
    %91 = arith.mulf %75, %83 : vector<5x32xf32>
    %92 = arith.addf %90, %91 : vector<5x32xf32>
    %93 = math.tanh %92 : vector<5x32xf32>
    %94 = arith.mulf %89, %93 : vector<5x32xf32>
    %c10 = arith.constant 10 : index
    %c0_38 = arith.constant 0 : index
    %95 = vector.load %arg11[%c10, %c0_38] : memref<40x128xf32, #tpu.memory_space<vmem>>, vector<5x128xf32>
    %cst_39 = arith.constant dense<0.000000e+00> : vector<5x128xf32>
    %96 = tpu.matmul %94, %36, %cst_39 {dimension_numbers = #tpu.dot_dimension_numbers<[1], [0], [0], [1], [0, 0, 1, 1], [], []>} : vector<5x32xf32>, vector<32x128xf32>, vector<5x128xf32> -> vector<5x128xf32>
    %97 = arith.addf %95, %96 : vector<5x128xf32>
    %98 = vector.extract_strided_slice %97 {offsets = [0, 0], sizes = [5, 32], strides = [1, 1]} : vector<5x128xf32> to vector<5x32xf32>
    %99 = arith.negf %98 : vector<5x32xf32>
    %100 = math.exp %99 : vector<5x32xf32>
    %cst_40 = arith.constant 1.000000e+00 : f32
    %101 = vector.broadcast %cst_40 : f32 to vector<5x32xf32>
    %102 = arith.addf %101, %100 : vector<5x32xf32>
    %103 = arith.divf %101, %102 : vector<5x32xf32>
    %104 = vector.extract_strided_slice %97 {offsets = [0, 32], sizes = [5, 32], strides = [1, 1]} : vector<5x128xf32> to vector<5x32xf32>
    %105 = arith.negf %104 : vector<5x32xf32>
    %106 = math.exp %105 : vector<5x32xf32>
    %cst_41 = arith.constant 1.000000e+00 : f32
    %107 = vector.broadcast %cst_41 : f32 to vector<5x32xf32>
    %108 = arith.addf %107, %106 : vector<5x32xf32>
    %109 = arith.divf %107, %108 : vector<5x32xf32>
    %110 = vector.extract_strided_slice %97 {offsets = [0, 64], sizes = [5, 32], strides = [1, 1]} : vector<5x128xf32> to vector<5x32xf32>
    %111 = math.tanh %110 : vector<5x32xf32>
    %112 = vector.extract_strided_slice %97 {offsets = [0, 96], sizes = [5, 32], strides = [1, 1]} : vector<5x128xf32> to vector<5x32xf32>
    %113 = arith.negf %112 : vector<5x32xf32>
    %114 = math.exp %113 : vector<5x32xf32>
    %cst_42 = arith.constant 1.000000e+00 : f32
    %115 = vector.broadcast %cst_42 : f32 to vector<5x32xf32>
    %116 = arith.addf %115, %114 : vector<5x32xf32>
    %117 = arith.divf %115, %116 : vector<5x32xf32>
    %118 = arith.mulf %109, %92 : vector<5x32xf32>
    %119 = arith.mulf %103, %111 : vector<5x32xf32>
    %120 = arith.addf %118, %119 : vector<5x32xf32>
    %121 = math.tanh %120 : vector<5x32xf32>
    %122 = arith.mulf %117, %121 : vector<5x32xf32>
    %c15 = arith.constant 15 : index
    %c0_43 = arith.constant 0 : index
    %123 = vector.load %arg11[%c15, %c0_43] : memref<40x128xf32, #tpu.memory_space<vmem>>, vector<5x128xf32>
    %cst_44 = arith.constant dense<0.000000e+00> : vector<5x128xf32>
    %124 = tpu.matmul %122, %36, %cst_44 {dimension_numbers = #tpu.dot_dimension_numbers<[1], [0], [0], [1], [0, 0, 1, 1], [], []>} : vector<5x32xf32>, vector<32x128xf32>, vector<5x128xf32> -> vector<5x128xf32>
    %125 = arith.addf %123, %124 : vector<5x128xf32>
    %126 = vector.extract_strided_slice %125 {offsets = [0, 0], sizes = [5, 32], strides = [1, 1]} : vector<5x128xf32> to vector<5x32xf32>
    %127 = arith.negf %126 : vector<5x32xf32>
    %128 = math.exp %127 : vector<5x32xf32>
    %cst_45 = arith.constant 1.000000e+00 : f32
    %129 = vector.broadcast %cst_45 : f32 to vector<5x32xf32>
    %130 = arith.addf %129, %128 : vector<5x32xf32>
    %131 = arith.divf %129, %130 : vector<5x32xf32>
    %132 = vector.extract_strided_slice %125 {offsets = [0, 32], sizes = [5, 32], strides = [1, 1]} : vector<5x128xf32> to vector<5x32xf32>
    %133 = arith.negf %132 : vector<5x32xf32>
    %134 = math.exp %133 : vector<5x32xf32>
    %cst_46 = arith.constant 1.000000e+00 : f32
    %135 = vector.broadcast %cst_46 : f32 to vector<5x32xf32>
    %136 = arith.addf %135, %134 : vector<5x32xf32>
    %137 = arith.divf %135, %136 : vector<5x32xf32>
    %138 = vector.extract_strided_slice %125 {offsets = [0, 64], sizes = [5, 32], strides = [1, 1]} : vector<5x128xf32> to vector<5x32xf32>
    %139 = math.tanh %138 : vector<5x32xf32>
    %140 = vector.extract_strided_slice %125 {offsets = [0, 96], sizes = [5, 32], strides = [1, 1]} : vector<5x128xf32> to vector<5x32xf32>
    %141 = arith.negf %140 : vector<5x32xf32>
    %142 = math.exp %141 : vector<5x32xf32>
    %cst_47 = arith.constant 1.000000e+00 : f32
    %143 = vector.broadcast %cst_47 : f32 to vector<5x32xf32>
    %144 = arith.addf %143, %142 : vector<5x32xf32>
    %145 = arith.divf %143, %144 : vector<5x32xf32>
    %146 = arith.mulf %137, %120 : vector<5x32xf32>
    %147 = arith.mulf %131, %139 : vector<5x32xf32>
    %148 = arith.addf %146, %147 : vector<5x32xf32>
    %149 = math.tanh %148 : vector<5x32xf32>
    %150 = arith.mulf %145, %149 : vector<5x32xf32>
    %c20 = arith.constant 20 : index
    %c0_48 = arith.constant 0 : index
    %151 = vector.load %arg11[%c20, %c0_48] : memref<40x128xf32, #tpu.memory_space<vmem>>, vector<5x128xf32>
    %cst_49 = arith.constant dense<0.000000e+00> : vector<5x128xf32>
    %152 = tpu.matmul %150, %36, %cst_49 {dimension_numbers = #tpu.dot_dimension_numbers<[1], [0], [0], [1], [0, 0, 1, 1], [], []>} : vector<5x32xf32>, vector<32x128xf32>, vector<5x128xf32> -> vector<5x128xf32>
    %153 = arith.addf %151, %152 : vector<5x128xf32>
    %154 = vector.extract_strided_slice %153 {offsets = [0, 0], sizes = [5, 32], strides = [1, 1]} : vector<5x128xf32> to vector<5x32xf32>
    %155 = arith.negf %154 : vector<5x32xf32>
    %156 = math.exp %155 : vector<5x32xf32>
    %cst_50 = arith.constant 1.000000e+00 : f32
    %157 = vector.broadcast %cst_50 : f32 to vector<5x32xf32>
    %158 = arith.addf %157, %156 : vector<5x32xf32>
    %159 = arith.divf %157, %158 : vector<5x32xf32>
    %160 = vector.extract_strided_slice %153 {offsets = [0, 32], sizes = [5, 32], strides = [1, 1]} : vector<5x128xf32> to vector<5x32xf32>
    %161 = arith.negf %160 : vector<5x32xf32>
    %162 = math.exp %161 : vector<5x32xf32>
    %cst_51 = arith.constant 1.000000e+00 : f32
    %163 = vector.broadcast %cst_51 : f32 to vector<5x32xf32>
    %164 = arith.addf %163, %162 : vector<5x32xf32>
    %165 = arith.divf %163, %164 : vector<5x32xf32>
    %166 = vector.extract_strided_slice %153 {offsets = [0, 64], sizes = [5, 32], strides = [1, 1]} : vector<5x128xf32> to vector<5x32xf32>
    %167 = math.tanh %166 : vector<5x32xf32>
    %168 = vector.extract_strided_slice %153 {offsets = [0, 96], sizes = [5, 32], strides = [1, 1]} : vector<5x128xf32> to vector<5x32xf32>
    %169 = arith.negf %168 : vector<5x32xf32>
    %170 = math.exp %169 : vector<5x32xf32>
    %cst_52 = arith.constant 1.000000e+00 : f32
    %171 = vector.broadcast %cst_52 : f32 to vector<5x32xf32>
    %172 = arith.addf %171, %170 : vector<5x32xf32>
    %173 = arith.divf %171, %172 : vector<5x32xf32>
    %174 = arith.mulf %165, %148 : vector<5x32xf32>
    %175 = arith.mulf %159, %167 : vector<5x32xf32>
    %176 = arith.addf %174, %175 : vector<5x32xf32>
    %177 = math.tanh %176 : vector<5x32xf32>
    %178 = arith.mulf %173, %177 : vector<5x32xf32>
    %c25 = arith.constant 25 : index
    %c0_53 = arith.constant 0 : index
    %179 = vector.load %arg11[%c25, %c0_53] : memref<40x128xf32, #tpu.memory_space<vmem>>, vector<5x128xf32>
    %cst_54 = arith.constant dense<0.000000e+00> : vector<5x128xf32>
    %180 = tpu.matmul %178, %36, %cst_54 {dimension_numbers = #tpu.dot_dimension_numbers<[1], [0], [0], [1], [0, 0, 1, 1], [], []>} : vector<5x32xf32>, vector<32x128xf32>, vector<5x128xf32> -> vector<5x128xf32>
    %181 = arith.addf %179, %180 : vector<5x128xf32>
    %182 = vector.extract_strided_slice %181 {offsets = [0, 0], sizes = [5, 32], strides = [1, 1]} : vector<5x128xf32> to vector<5x32xf32>
    %183 = arith.negf %182 : vector<5x32xf32>
    %184 = math.exp %183 : vector<5x32xf32>
    %cst_55 = arith.constant 1.000000e+00 : f32
    %185 = vector.broadcast %cst_55 : f32 to vector<5x32xf32>
    %186 = arith.addf %185, %184 : vector<5x32xf32>
    %187 = arith.divf %185, %186 : vector<5x32xf32>
    %188 = vector.extract_strided_slice %181 {offsets = [0, 32], sizes = [5, 32], strides = [1, 1]} : vector<5x128xf32> to vector<5x32xf32>
    %189 = arith.negf %188 : vector<5x32xf32>
    %190 = math.exp %189 : vector<5x32xf32>
    %cst_56 = arith.constant 1.000000e+00 : f32
    %191 = vector.broadcast %cst_56 : f32 to vector<5x32xf32>
    %192 = arith.addf %191, %190 : vector<5x32xf32>
    %193 = arith.divf %191, %192 : vector<5x32xf32>
    %194 = vector.extract_strided_slice %181 {offsets = [0, 64], sizes = [5, 32], strides = [1, 1]} : vector<5x128xf32> to vector<5x32xf32>
    %195 = math.tanh %194 : vector<5x32xf32>
    %196 = vector.extract_strided_slice %181 {offsets = [0, 96], sizes = [5, 32], strides = [1, 1]} : vector<5x128xf32> to vector<5x32xf32>
    %197 = arith.negf %196 : vector<5x32xf32>
    %198 = math.exp %197 : vector<5x32xf32>
    %cst_57 = arith.constant 1.000000e+00 : f32
    %199 = vector.broadcast %cst_57 : f32 to vector<5x32xf32>
    %200 = arith.addf %199, %198 : vector<5x32xf32>
    %201 = arith.divf %199, %200 : vector<5x32xf32>
    %202 = arith.mulf %193, %176 : vector<5x32xf32>
    %203 = arith.mulf %187, %195 : vector<5x32xf32>
    %204 = arith.addf %202, %203 : vector<5x32xf32>
    %205 = math.tanh %204 : vector<5x32xf32>
    %206 = arith.mulf %201, %205 : vector<5x32xf32>
    %c30 = arith.constant 30 : index
    %c0_58 = arith.constant 0 : index
    %207 = vector.load %arg11[%c30, %c0_58] : memref<40x128xf32, #tpu.memory_space<vmem>>, vector<5x128xf32>
    %cst_59 = arith.constant dense<0.000000e+00> : vector<5x128xf32>
    %208 = tpu.matmul %206, %36, %cst_59 {dimension_numbers = #tpu.dot_dimension_numbers<[1], [0], [0], [1], [0, 0, 1, 1], [], []>} : vector<5x32xf32>, vector<32x128xf32>, vector<5x128xf32> -> vector<5x128xf32>
    %209 = arith.addf %207, %208 : vector<5x128xf32>
    %210 = vector.extract_strided_slice %209 {offsets = [0, 0], sizes = [5, 32], strides = [1, 1]} : vector<5x128xf32> to vector<5x32xf32>
    %211 = arith.negf %210 : vector<5x32xf32>
    %212 = math.exp %211 : vector<5x32xf32>
    %cst_60 = arith.constant 1.000000e+00 : f32
    %213 = vector.broadcast %cst_60 : f32 to vector<5x32xf32>
    %214 = arith.addf %213, %212 : vector<5x32xf32>
    %215 = arith.divf %213, %214 : vector<5x32xf32>
    %216 = vector.extract_strided_slice %209 {offsets = [0, 32], sizes = [5, 32], strides = [1, 1]} : vector<5x128xf32> to vector<5x32xf32>
    %217 = arith.negf %216 : vector<5x32xf32>
    %218 = math.exp %217 : vector<5x32xf32>
    %cst_61 = arith.constant 1.000000e+00 : f32
    %219 = vector.broadcast %cst_61 : f32 to vector<5x32xf32>
    %220 = arith.addf %219, %218 : vector<5x32xf32>
    %221 = arith.divf %219, %220 : vector<5x32xf32>
    %222 = vector.extract_strided_slice %209 {offsets = [0, 64], sizes = [5, 32], strides = [1, 1]} : vector<5x128xf32> to vector<5x32xf32>
    %223 = math.tanh %222 : vector<5x32xf32>
    %224 = vector.extract_strided_slice %209 {offsets = [0, 96], sizes = [5, 32], strides = [1, 1]} : vector<5x128xf32> to vector<5x32xf32>
    %225 = arith.negf %224 : vector<5x32xf32>
    %226 = math.exp %225 : vector<5x32xf32>
    %cst_62 = arith.constant 1.000000e+00 : f32
    %227 = vector.broadcast %cst_62 : f32 to vector<5x32xf32>
    %228 = arith.addf %227, %226 : vector<5x32xf32>
    %229 = arith.divf %227, %228 : vector<5x32xf32>
    %230 = arith.mulf %221, %204 : vector<5x32xf32>
    %231 = arith.mulf %215, %223 : vector<5x32xf32>
    %232 = arith.addf %230, %231 : vector<5x32xf32>
    %233 = math.tanh %232 : vector<5x32xf32>
    %234 = arith.mulf %229, %233 : vector<5x32xf32>
    %c35 = arith.constant 35 : index
    %c0_63 = arith.constant 0 : index
    %235 = vector.load %arg11[%c35, %c0_63] : memref<40x128xf32, #tpu.memory_space<vmem>>, vector<5x128xf32>
    %cst_64 = arith.constant dense<0.000000e+00> : vector<5x128xf32>
    %236 = tpu.matmul %234, %36, %cst_64 {dimension_numbers = #tpu.dot_dimension_numbers<[1], [0], [0], [1], [0, 0, 1, 1], [], []>} : vector<5x32xf32>, vector<32x128xf32>, vector<5x128xf32> -> vector<5x128xf32>
    %237 = arith.addf %235, %236 : vector<5x128xf32>
    %238 = vector.extract_strided_slice %237 {offsets = [0, 0], sizes = [5, 32], strides = [1, 1]} : vector<5x128xf32> to vector<5x32xf32>
    %239 = arith.negf %238 : vector<5x32xf32>
    %240 = math.exp %239 : vector<5x32xf32>
    %cst_65 = arith.constant 1.000000e+00 : f32
    %241 = vector.broadcast %cst_65 : f32 to vector<5x32xf32>
    %242 = arith.addf %241, %240 : vector<5x32xf32>
    %243 = arith.divf %241, %242 : vector<5x32xf32>
    %244 = vector.extract_strided_slice %237 {offsets = [0, 32], sizes = [5, 32], strides = [1, 1]} : vector<5x128xf32> to vector<5x32xf32>
    %245 = arith.negf %244 : vector<5x32xf32>
    %246 = math.exp %245 : vector<5x32xf32>
    %cst_66 = arith.constant 1.000000e+00 : f32
    %247 = vector.broadcast %cst_66 : f32 to vector<5x32xf32>
    %248 = arith.addf %247, %246 : vector<5x32xf32>
    %249 = arith.divf %247, %248 : vector<5x32xf32>
    %250 = vector.extract_strided_slice %237 {offsets = [0, 64], sizes = [5, 32], strides = [1, 1]} : vector<5x128xf32> to vector<5x32xf32>
    %251 = math.tanh %250 : vector<5x32xf32>
    %252 = vector.extract_strided_slice %237 {offsets = [0, 96], sizes = [5, 32], strides = [1, 1]} : vector<5x128xf32> to vector<5x32xf32>
    %253 = arith.negf %252 : vector<5x32xf32>
    %254 = math.exp %253 : vector<5x32xf32>
    %cst_67 = arith.constant 1.000000e+00 : f32
    %255 = vector.broadcast %cst_67 : f32 to vector<5x32xf32>
    %256 = arith.addf %255, %254 : vector<5x32xf32>
    %257 = arith.divf %255, %256 : vector<5x32xf32>
    %258 = arith.mulf %249, %232 : vector<5x32xf32>
    %259 = arith.mulf %243, %251 : vector<5x32xf32>
    %260 = arith.addf %258, %259 : vector<5x32xf32>
    %261 = math.tanh %260 : vector<5x32xf32>
    %262 = arith.mulf %257, %261 : vector<5x32xf32>
    %263 = tpu.concatenate %66, %94, %122, %150, %178, %206, %234, %262 in 1 : vector<5x32xf32>, vector<5x32xf32>, vector<5x32xf32>, vector<5x32xf32>, vector<5x32xf32>, vector<5x32xf32>, vector<5x32xf32>, vector<5x32xf32> -> vector<5x256xf32>
    %c0_68 = arith.constant 0 : index
    %c0_69 = arith.constant 0 : index
    %264 = vector.load %arg8[%c0_68, %c0_69] : memref<256x1xf32, #tpu.memory_space<vmem>>, vector<256x1xf32>
    %cst_70 = arith.constant dense<0.000000e+00> : vector<5x1xf32>
    %265 = tpu.matmul %263, %264, %cst_70 {dimension_numbers = #tpu.dot_dimension_numbers<[1], [0], [0], [1], [0, 0, 1, 1], [], []>} : vector<5x256xf32>, vector<256x1xf32>, vector<5x1xf32> -> vector<5x1xf32>
    %c0_71 = arith.constant 0 : index
    %c0_72 = arith.constant 0 : index
    %266 = vector.load %arg9[%c0_71, %c0_72] : memref<1x1xf32, #tpu.memory_space<vmem>>, vector<1x1xf32>
    %267 = vector.broadcast %266 : vector<1x1xf32> to vector<5x1xf32>
    %268 = arith.addf %265, %267 : vector<5x1xf32>
    %c0_73 = arith.constant 0 : index
    %c0_74 = arith.constant 0 : index
    %269 = vector.load %arg10[%c0_73, %c0_74] : memref<5x1xf32, #tpu.memory_space<vmem>>, vector<5x1xf32>
    tpu.vector_store %arg10[%c0_73, %c0_74], %268 {strides = array<i32>} : memref<5x1xf32, #tpu.memory_space<vmem>>, vector<5x1xf32>,
    return
  }
}

</mosaic_0001>

<bundles_post_ra>
// kernel: cnn_lstm_forward.1
= control target key start
LH: loop header
LB: loop body
LE: loop exit
PB: predicated region body
PF: predicated region fallthrough
CT: control target
= control target key end

     0   :  { %v4540_v0 = vmov 0.0|0.0   ;;  %vm4541_vm0 = vmmov 0   ;;  %v4542_v4 = vmov 0.0   ;;  %vm552_vm1 = vcmask 1040384   ;;  %s4545_s28 = smov 32   ;;  %s4546_s17 = smov 96   ;;  %s6224_s1 = inlined_call_operand.vmem [shape: f32[49,32], index: 1, kind: input, shape index: {}]   ;;  %s6225_s0 = inlined_call_operand.vmem [shape: f32[1000,49], index: 0, kind: input, shape index: {}]   ;;  %s6226_s2 = inlined_call_operand.vmem [shape: f32[1,32], index: 2, kind: input, shape index: {}]   ;;  %s6227_s3 = inlined_call_operand.vmem [shape: f32[32,32], index: 3, kind: input, shape index: {}]   ;;  %s6228_s5 = inlined_call_operand.vmem [shape: f32[32,128], index: 5, kind: input, shape index: {}]   ;;  %s6229_s4 = inlined_call_operand.vmem [shape: f32[1,32], index: 4, kind: input, shape index: {}]   ;;  %s6230_s6 = inlined_call_operand.vmem [shape: f32[32,128], index: 6, kind: input, shape index: {}]   ;;  %s6231_s7 = inlined_call_operand.vmem [shape: f32[1,128], index: 7, kind: input, shape index: {}]   ;;  %s6232_s8 = inlined_call_operand.vmem [shape: f32[256,1], index: 8, kind: input, shape index: {}]   ;;  %s6233_s9 = inlined_call_operand.<no memory space> [shape: f32[1,1], index: 9, kind: input, shape index: {}]   ;;  %s6234_s10 = inlined_call_operand.vmem [shape: f32[5,1], index: 10, kind: output, shape index: {}]  }
   0x1   :  { %4211 = vmatprep.subr.bf16.mxu0 %v4540_v0  ;;  %v162_v1 = vld [vmem:[%s6224_s1] sm:$0xff]  ;;  %v163_v2 = vld [vmem:[%s6224_s1 + $0x8] sm:$0xff]  ;;  %v164_v3 = vld [vmem:[%s6224_s1 + $0x10] sm:$0xff]  ;;  %3702 = vmatprep.mubr.msk.f32.mxu0 %vm4541_vm0, %v4542_v4  ;;  %vm176_vm2 = vcmask 400384  }
   0x2   :  { %v4212_v5 = vpack.c.bf16 %v163_v2, %v162_v1  ;;  %v165_v6 = vld [vmem:[%s6224_s1 + $0x18] sm:$0xff]  ;;  %4450 = vmatprep.subr.bf16.mxu1 %v4540_v0  ;;  %3993 = vmatprep.mubr.msk.f32.mxu1 %vm4541_vm0, %v4542_v4  ;;  %v166_v8 = vld [vmem:[%s6224_s1 + $0x20] sm:$0xff]  ;;  %v167_v9 = vld [vmem:[%s6224_s1 + $0x28] sm:$0xff] }
   0x3   :  { %v4215_v7 = vpack.c.bf16 %v165_v6, %v164_v3  ;;  %v4218_v10 = vpack.c.bf16 %v167_v9, %v166_v8  ;;  %v168_v11 = vld [vmem:[%s6224_s1 + $0x30] sm:$0x1]  ;;  %v37_v12 = vld [vmem:[%s6225_s0] sm:$0xff]  ;;  %v38_v13 = vld [vmem:[%s6225_s0 + $0x8] sm:$0xff] }
   0x4   :  { %4213 = vmatpush3.bf16.msra.mxu0 %v4212_v5  ;;  %4454 = vmatpush3.bf16.msra.mxu1 %v4212_v5  ;;  %v39_v14 = vld [vmem:[%s6225_s0 + $0x10] sm:$0xff]  ;;  %v40_v15 = vld [vmem:[%s6225_s0 + $0x18] sm:$0xff]  ;;  %v41_v16 = vld [vmem:[%s6225_s0 + $0x20] sm:$0xff] }
   0x5   :  { %4214 = vmatprep.subr.bf16.mxu0 %v4540_v0  ;;  %4451 = vmatprep.subr.bf16.mxu1 %v4540_v0  ;;  %v42_v17 = vld [vmem:[%s6225_s0 + $0x28] sm:$0xff]  ;;  %v43_v18 = vld [vmem:[%s6225_s0 + $0x30] sm:$0xff]  ;;  %v44_v19 = vld [vmem:[%s6225_s0 + $0x38] sm:$0xff] }
   0x6   :  { %v45_v20 = vld [vmem:[%s6225_s0 + $0x40] sm:$0xff]  ;;  %v46_v21 = vld [vmem:[%s6225_s0 + $0x48] sm:$0xff]  ;;  %v47_v22 = vld [vmem:[%s6225_s0 + $0x50] sm:$0xff] }
   0x7   :  { %v48_v23 = vld [vmem:[%s6225_s0 + $0x58] sm:$0xff]  ;;  %v49_v24 = vld [vmem:[%s6225_s0 + $0x60] sm:$0xff]  ;;  %v50_v25 = vld [vmem:[%s6225_s0 + $0x68] sm:$0xff] }
   0x8   :  { %4216 = vmatpush3.bf16.msra.mxu0 %v4215_v7  ;;  %4455 = vmatpush3.bf16.msra.mxu1 %v4215_v7  ;;  %v51_v26 = vld [vmem:[%s6225_s0 + $0x70] sm:$0xff]  ;;  %v52_v27 = vld [vmem:[%s6225_s0 + $0x78] sm:$0xff]  ;;  %v53_v28 = vld [vmem:[%s6225_s0 + $0x80] sm:$0xff] }
   0x9   :  { %4217 = vmatprep.subr.bf16.mxu0 %v4540_v0  ;;  %4452 = vmatprep.subr.bf16.mxu1 %v4540_v0  ;;  %v54_v29 = vld [vmem:[%s6225_s0 + $0x88] sm:$0xff]  ;;  %v55_v30 = vld [vmem:[%s6225_s0 + $0x90] sm:$0xff]  ;;  %v56_v31 = vld [vmem:[%s6225_s0 + $0x98] sm:$0xff] }
   0xa   :  { %v57_v32 = vld [vmem:[%s6225_s0 + $0xa0] sm:$0xff]  ;;  %v58_v33 = vld [vmem:[%s6225_s0 + $0xa8] sm:$0xff]  ;;  %v59_v34 = vld [vmem:[%s6225_s0 + $0xb0] sm:$0xff] }
   0xb   :  { %v60_v35 = vld [vmem:[%s6225_s0 + $0xb8] sm:$0xff]  ;;  %v61_v36 = vld [vmem:[%s6225_s0 + $0xc0] sm:$0xff]  ;;  %v62_v37 = vld [vmem:[%s6225_s0 + $0xc8] sm:$0xff] }
   0xc   :  { %4219 = vmatpush3.bf16.msra.mxu0 %v4218_v10  ;;  %4456 = vmatpush3.bf16.msra.mxu1 %v4218_v10  ;;  %v63_v38 = vld [vmem:[%s6225_s0 + $0xd0] sm:$0xff]  ;;  %v64_v39 = vld [vmem:[%s6225_s0 + $0xd8] sm:$0xff]  ;;  %v65_v40 = vld [vmem:[%s6225_s0 + $0xe0] sm:$0xff] }
   0xd   :  { %3700 = vmatprep.subr.mxu0 %v4542_v4  ;;  %4453 = vmatprep.subr.mxu1 %v4542_v4  ;;  %v66_v41 = vld [vmem:[%s6225_s0 + $0xe8] sm:$0xff]  ;;  %v67_v42 = vld [vmem:[%s6225_s0 + $0xf0] sm:$0xff]  ;;  %v68_v43 = vld [vmem:[%s6225_s0 + $0xf8] sm:$0xff] }
   0xe   :  { %v69_v44 = vld [vmem:[%s6225_s0 + $0x100] sm:$0xff]  ;;  %v70_v45 = vld [vmem:[%s6225_s0 + $0x108] sm:$0xff]  ;;  %v71_v46 = vld [vmem:[%s6225_s0 + $0x110] sm:$0xff] }
   0xf   :  { %v72_v47 = vld [vmem:[%s6225_s0 + $0x118] sm:$0xff]  ;;  %v73_v48 = vld [vmem:[%s6225_s0 + $0x120] sm:$0xff]  ;;  %v74_v49 = vld [vmem:[%s6225_s0 + $0x128] sm:$0xff] }
  0x10   :  { %3701 = vmatpush3.msk.msra.mxu0 %vm552_vm1, %v168_v11  ;;  %4457 = vmatpush3.msk.msra.mxu1 %vm552_vm1, %v168_v11  ;;  %v75_v50 = vld [vmem:[%s6225_s0 + $0x130] sm:$0xff]  ;;  %v76_v51 = vld [vmem:[%s6225_s0 + $0x138] sm:$0xff]  ;;  %v77_v52 = vld [vmem:[%s6225_s0 + $0x140] sm:$0xff] }
  0x11   :  { %3703 = vmatmul.mubr.msk.f32.vlgmr.msra.gmra.mrb[0].mxu0 %vm176_vm2, %v37_v12  ;;  %v134_v53 = vld [vmem:[%s6225_s0 + $0x308] sm:$0xff]  ;;  %v79_v55 = vld [vmem:[%s6225_s0 + $0x150] sm:$0xff]  ;;  %v80_v56 = vld [vmem:[%s6225_s0 + $0x158] sm:$0xff] }
  0x12   :  { %3705 = vmatprep.mubr.msk.f32.mxu0 %vm4541_vm0, %v4542_v4  ;;  %3994 = vmatmul.mubr.msk.f32.vlgmr.msra.gmra.mrb[0].mxu1 %vm176_vm2, %v134_v53  ;;  %v78_v54 = vld [vmem:[%s6225_s0 + $0x148] sm:$0xff]  ;;  %v81_v57 = vld [vmem:[%s6225_s0 + $0x160] sm:$0xff]  ;;  %v135_v59 = vld [vmem:[%s6225_s0 + $0x310] sm:$0xff] }
  0x13   :  { %3996 = vmatprep.mubr.msk.f32.mxu1 %vm4541_vm0, %v4542_v4  ;;  %v82_v58 = vld [vmem:[%s6225_s0 + $0x168] sm:$0xff]  ;;  %v83_v60 = vld [vmem:[%s6225_s0 + $0x170] sm:$0xff]  ;;  %v136_v61 = vld [vmem:[%s6225_s0 + $0x318] sm:$0xff] }
  0x14   :  { %v84_v62 = vld [vmem:[%s6225_s0 + $0x178] sm:$0xff]  ;;  %v137_v63 = vld [vmem:[%s6225_s0 + $0x320] sm:$0xff]  ;;  %v138_v2 = vld [vmem:[%s6225_s0 + $0x328] sm:$0xff] }
  0x15   :  { %3706 = vmatmul.mubr.msk.f32.gmra.mrb[2].mxu0 %vm176_vm2, %v38_v13  ;;  %v85_v1 = vld [vmem:[%s6225_s0 + $0x180] sm:$0xff]  ;;  %v86_v3 = vld [vmem:[%s6225_s0 + $0x188] sm:$0xff]  ;;  %v139_v5 = vld [vmem:[%s6225_s0 + $0x330] sm:$0xff] }
  0x16   :  { %3708 = vmatprep.mubr.msk.f32.mxu0 %vm4541_vm0, %v4542_v4  ;;  %3997 = vmatmul.mubr.msk.f32.gmra.mrb[2].mxu1 %vm176_vm2, %v135_v59  ;;  %v87_v6 = vld [vmem:[%s6225_s0 + $0x190] sm:$0xff]  ;;  %v140_v7 = vld [vmem:[%s6225_s0 + $0x338] sm:$0xff]  ;;  %v141_v9 = vld [vmem:[%s6225_s0 + $0x340] sm:$0xff] }
  0x17   :  { %3999 = vmatprep.mubr.msk.f32.mxu1 %vm4541_vm0, %v4542_v4  ;;  %v88_v8 = vld [vmem:[%s6225_s0 + $0x198] sm:$0xff]  ;;  %v89_v10 = vld [vmem:[%s6225_s0 + $0x1a0] sm:$0xff]  ;;  %v142_v11 = vld [vmem:[%s6225_s0 + $0x348] sm:$0xff] }
  0x18   :  { %v90_v12 = vld [vmem:[%s6225_s0 + $0x1a8] sm:$0xff]  ;;  %v143_v13 = vld [vmem:[%s6225_s0 + $0x350] sm:$0xff] }
  0x19   :  { %3709 = vmatmul.mubr.msk.f32.gmra.mrb[4].mxu0 %vm176_vm2, %v39_v14  ;;  %v5016_v14 = vld [vmem:[%s6226_s2] ss:$0 sm:$0xff] }
  0x1a   :  { %3711 = vmatprep.mubr.msk.f32.mxu0 %vm4541_vm0, %v4542_v4  ;;  %4000 = vmatmul.mubr.msk.f32.gmra.mrb[4].mxu1 %vm176_vm2, %v136_v61 }
  0x1b   :  { %4002 = vmatprep.mubr.msk.f32.mxu1 %vm4541_vm0, %v4542_v4 }
  0x1d   :  { %3712 = vmatmul.mubr.msk.f32.gmra.mrb[6].mxu0 %vm176_vm2, %v40_v15 }
  0x1e   :  { %3714 = vmatprep.mubr.msk.f32.mxu0 %vm4541_vm0, %v4542_v4  ;;  %4003 = vmatmul.mubr.msk.f32.gmra.mrb[6].mxu1 %vm176_vm2, %v137_v63 }
  0x1f   :  { %4005 = vmatprep.mubr.msk.f32.mxu1 %vm4541_vm0, %v4542_v4 }
  0x21   :  { %3715 = vmatmul.mubr.msk.f32.gmra.mrb[8].mxu0 %vm176_vm2, %v41_v16 }
  0x22   :  { %3717 = vmatprep.mubr.msk.f32.mxu0 %vm4541_vm0, %v4542_v4  ;;  %4006 = vmatmul.mubr.msk.f32.gmra.mrb[8].mxu1 %vm176_vm2, %v138_v2  ;;  %v151_v2 = vld [vmem:[%s6225_s0 + $0x390] sm:$0xff] }
  0x23   :  { %4008 = vmatprep.mubr.msk.f32.mxu1 %vm4541_vm0, %v4542_v4 }
  0x25   :  { %3718 = vmatmul.mubr.msk.f32.gmra.mrb[10].mxu0 %vm176_vm2, %v42_v17  ;;  %v91_v17 = vld [vmem:[%s6225_s0 + $0x1b0] sm:$0xff] }
  0x26   :  { %3720 = vmatprep.mubr.msk.f32.mxu0 %vm4541_vm0, %v4542_v4  ;;  %4009 = vmatmul.mubr.msk.f32.gmra.mrb[10].mxu1 %vm176_vm2, %v139_v5 }
  0x27   :  { %4011 = vmatprep.mubr.msk.f32.mxu1 %vm4541_vm0, %v4542_v4 }
  0x29   :  { %3721 = vmatmul.mubr.msk.f32.gmra.mrb[12].mxu0 %vm176_vm2, %v43_v18 }
  0x2a   :  { %3723 = vmatprep.mubr.msk.f32.mxu0 %vm4541_vm0, %v4542_v4  ;;  %4012 = vmatmul.mubr.msk.f32.gmra.mrb[12].mxu1 %vm176_vm2, %v140_v7  ;;  %v99_v7 = vld [vmem:[%s6225_s0 + $0x1f0] sm:$0xff] }
  0x2b   :  { %4014 = vmatprep.mubr.msk.f32.mxu1 %vm4541_vm0, %v4542_v4 }
  0x2d   :  { %3724 = vmatmul.mubr.msk.f32.gmra.mrb[14].mxu0 %vm176_vm2, %v44_v19  ;;  %v144_v19 = vld [vmem:[%s6225_s0 + $0x358] sm:$0xff] }
  0x2e   :  { %3726 = vmatprep.mubr.msk.f32.mxu0 %vm4541_vm0, %v4542_v4  ;;  %4015 = vmatmul.mubr.msk.f32.gmra.mrb[14].mxu1 %vm176_vm2, %v141_v9  ;;  %v152_v9 = vld [vmem:[%s6225_s0 + $0x398] sm:$0xff] }
  0x2f   :  { %4017 = vmatprep.mubr.msk.f32.mxu1 %vm4541_vm0, %v4542_v4 }
  0x31   :  { %3727 = vmatmul.mubr.msk.f32.gmra.mrb[16].mxu0 %vm176_vm2, %v45_v20 }
  0x32   :  { %3729 = vmatprep.mubr.msk.f32.mxu0 %vm4541_vm0, %v4542_v4  ;;  %4018 = vmatmul.mubr.msk.f32.gmra.mrb[16].mxu1 %vm176_vm2, %v142_v11 }
  0x33   :  { %4020 = vmatprep.mubr.msk.f32.mxu1 %vm4541_vm0, %v4542_v4 }
  0x35   :  { %3730 = vmatmul.mubr.msk.f32.gmra.mrb[18].mxu0 %vm176_vm2, %v46_v21 }
  0x36   :  { %3732 = vmatprep.mubr.msk.f32.mxu0 %vm4541_vm0, %v4542_v4  ;;  %4021 = vmatmul.mubr.msk.f32.gmra.mrb[18].mxu1 %vm176_vm2, %v143_v13  ;;  %v100_v13 = vld [vmem:[%s6225_s0 + $0x1f8] sm:$0xff] }
  0x37   :  { %4023 = vmatprep.mubr.msk.f32.mxu1 %vm4541_vm0, %v4542_v4 }
  0x39   :  { %3733 = vmatmul.mubr.msk.f32.gmra.mrb[20].mxu0 %vm176_vm2, %v47_v22 }
  0x3a   :  { %3735 = vmatprep.mubr.msk.f32.mxu0 %vm4541_vm0, %v4542_v4  ;;  %4024 = vmatmul.mubr.msk.f32.gmra.mrb[20].mxu1 %vm176_vm2, %v144_v19 }
  0x3b   :  { %4026 = vmatprep.mubr.msk.f32.mxu1 %vm4541_vm0, %v4542_v4 }
  0x3d   :  { %3736 = vmatmul.mubr.msk.f32.gmra.mrb[22].mxu0 %vm176_vm2, %v48_v23  ;;  %v92_v23 = vld [vmem:[%s6225_s0 + $0x1b8] sm:$0xff] }
  0x3e   :  { %3738 = vmatprep.mubr.msk.f32.mxu0 %vm4541_vm0, %v4542_v4 }
  0x41   :  { %3739 = vmatmul.mubr.msk.f32.gmra.mrb[24].mxu0 %vm176_vm2, %v49_v24 }
  0x42   :  { %3741 = vmatprep.mubr.msk.f32.mxu0 %vm4541_vm0, %v4542_v4 }
  0x45   :  { %3742 = vmatmul.mubr.msk.f32.gmra.mrb[26].mxu0 %vm176_vm2, %v50_v25 }
  0x46   :  { %3744 = vmatprep.mubr.msk.f32.mxu0 %vm4541_vm0, %v4542_v4 }
  0x49   :  { %3745 = vmatmul.mubr.msk.f32.gmra.mrb[28].mxu0 %vm176_vm2, %v51_v26  ;;  %v145_v26 = vld [vmem:[%s6225_s0 + $0x360] sm:$0xff] }
  0x4a   :  { %3747 = vmatprep.mubr.msk.f32.mxu0 %vm4541_vm0, %v4542_v4  ;;  %4027 = vmatmul.mubr.msk.f32.gmra.mrb[22].mxu1 %vm176_vm2, %v145_v26 }
  0x4b   :  { %4029 = vmatprep.mubr.msk.f32.mxu1 %vm4541_vm0, %v4542_v4 }
  0x4d   :  { %3748 = vmatmul.mubr.msk.f32.gmra.mrb[30].mxu0 %vm176_vm2, %v52_v27 }
  0x4e   :  { %3750 = vmatprep.mubr.msk.f32.mxu0 %vm4541_vm0, %v4542_v4 }
  0x51   :  { %3751 = vmatmul.mubr.msk.f32.gmra.mrb[32].mxu0 %vm176_vm2, %v53_v28 }
  0x52   :  { %3753 = vmatprep.mubr.msk.f32.mxu0 %vm4541_vm0, %v4542_v4 }
  0x55   :  { %3754 = vmatmul.mubr.msk.f32.gmra.mrb[34].mxu0 %vm176_vm2, %v54_v29 }
  0x56   :  { %3756 = vmatprep.mubr.msk.f32.mxu0 %vm4541_vm0, %v4542_v4 }
  0x59   :  { %3757 = vmatmul.mubr.msk.f32.gmra.mrb[36].mxu0 %vm176_vm2, %v55_v30  ;;  %v93_v30 = vld [vmem:[%s6225_s0 + $0x1c0] sm:$0xff] }
  0x5a   :  { %3759 = vmatprep.mubr.msk.f32.mxu0 %vm4541_vm0, %v4542_v4 }
  0x5d   :  { %3760 = vmatmul.mubr.msk.f32.gmra.mrb[38].mxu0 %vm176_vm2, %v56_v31 }
  0x5e   :  { %3762 = vmatprep.mubr.msk.f32.mxu0 %vm4541_vm0, %v4542_v4 }
  0x61   :  { %3763 = vmatmul.mubr.msk.f32.gmra.mrb[40].mxu0 %vm176_vm2, %v57_v32  ;;  %v146_v32 = vld [vmem:[%s6225_s0 + $0x368] sm:$0xff] }
  0x62   :  { %3765 = vmatprep.mubr.msk.f32.mxu0 %vm4541_vm0, %v4542_v4  ;;  %4030 = vmatmul.mubr.msk.f32.gmra.mrb[24].mxu1 %vm176_vm2, %v146_v32 }
  0x63   :  { %4032 = vmatprep.mubr.msk.f32.mxu1 %vm4541_vm0, %v4542_v4 }
  0x65   :  { %3766 = vmatmul.mubr.msk.f32.gmra.mrb[42].mxu0 %vm176_vm2, %v58_v33 }
  0x66   :  { %3768 = vmatprep.mubr.msk.f32.mxu0 %vm4541_vm0, %v4542_v4 }
  0x69   :  { %3769 = vmatmul.mubr.msk.f32.gmra.mrb[44].mxu0 %vm176_vm2, %v59_v34 }
  0x6a   :  { %3771 = vmatprep.mubr.msk.f32.mxu0 %vm4541_vm0, %v4542_v4 }
  0x6d   :  { %3772 = vmatmul.mubr.msk.f32.gmra.mrb[46].mxu0 %vm176_vm2, %v60_v35 }
  0x6e   :  { %3774 = vmatprep.mubr.msk.f32.mxu0 %vm4541_vm0, %v4542_v4 }
  0x71   :  { %3775 = vmatmul.mubr.msk.f32.gmra.mrb[48].mxu0 %vm176_vm2, %v61_v36  ;;  %v94_v36 = vld [vmem:[%s6225_s0 + $0x1c8] sm:$0xff] }
  0x72   :  { %3777 = vmatprep.mubr.msk.f32.mxu0 %vm4541_vm0, %v4542_v4 }
  0x75   :  { %3778 = vmatmul.mubr.msk.f32.gmra.mrb[50].mxu0 %vm176_vm2, %v62_v37 }
  0x76   :  { %3780 = vmatprep.mubr.msk.f32.mxu0 %vm4541_vm0, %v4542_v4 }
  0x79   :  { %3781 = vmatmul.mubr.msk.f32.gmra.mrb[52].mxu0 %vm176_vm2, %v63_v38 }
  0x7a   :  { %3783 = vmatprep.mubr.msk.f32.mxu0 %vm4541_vm0, %v4542_v4 }
  0x7d   :  { %3784 = vmatmul.mubr.msk.f32.gmra.mrb[54].mxu0 %vm176_vm2, %v64_v39  ;;  %v147_v39 = vld [vmem:[%s6225_s0 + $0x370] sm:$0xff] }
  0x7e   :  { %3786 = vmatprep.mubr.msk.f32.mxu0 %vm4541_vm0, %v4542_v4  ;;  %4033 = vmatmul.mubr.msk.f32.gmra.mrb[26].mxu1 %vm176_vm2, %v147_v39 }
  0x7f   :  { %4035 = vmatprep.mubr.msk.f32.mxu1 %vm4541_vm0, %v4542_v4 }
  0x81   :  { %3787 = vmatmul.mubr.msk.f32.gmra.mrb[56].mxu0 %vm176_vm2, %v65_v40 }
  0x82   :  { %3789 = vmatprep.mubr.msk.f32.mxu0 %vm4541_vm0, %v4542_v4 }
  0x85   :  { %3790 = vmatmul.mubr.msk.f32.gmra.mrb[58].mxu0 %vm176_vm2, %v66_v41 }
  0x86   :  { %3792 = vmatprep.mubr.msk.f32.mxu0 %vm4541_vm0, %v4542_v4 }
  0x89   :  { %3793 = vmatmul.mubr.msk.f32.gmra.mrb[60].mxu0 %vm176_vm2, %v67_v42 }
  0x8a   :  { %3795 = vmatprep.mubr.msk.f32.mxu0 %vm4541_vm0, %v4542_v4 }
  0x8d   :  { %3796 = vmatmul.mubr.msk.f32.gmra.mrb[62].mxu0 %vm176_vm2, %v68_v43  ;;  %v95_v43 = vld [vmem:[%s6225_s0 + $0x1d0] sm:$0xff] }
  0x8e   :  { %3798 = vmatprep.mubr.msk.f32.mxu0 %vm4541_vm0, %v4542_v4 }
  0x91   :  { %3799 = vmatmul.mubr.msk.f32.gmra.mrb[64].mxu0 %vm176_vm2, %v69_v44 }
  0x92   :  { %3801 = vmatprep.mubr.msk.f32.mxu0 %vm4541_vm0, %v4542_v4 }
  0x95   :  { %3802 = vmatmul.mubr.msk.f32.gmra.mrb[66].mxu0 %vm176_vm2, %v70_v45  ;;  %v148_v45 = vld [vmem:[%s6225_s0 + $0x378] sm:$0xff] }
  0x96   :  { %3804 = vmatprep.mubr.msk.f32.mxu0 %vm4541_vm0, %v4542_v4  ;;  %4036 = vmatmul.mubr.msk.f32.gmra.mrb[28].mxu1 %vm176_vm2, %v148_v45  ;;  %v157_v45 = vld [vmem:[%s6225_s0 + $0x3c0] sm:$0xff] }
  0x97   :  { %4038 = vmatprep.mubr.msk.f32.mxu1 %vm4541_vm0, %v4542_v4 }
  0x99   :  { %3805 = vmatmul.mubr.msk.f32.gmra.mrb[68].mxu0 %vm176_vm2, %v71_v46 }
  0x9a   :  { %3807 = vmatprep.mubr.msk.f32.mxu0 %vm4541_vm0, %v4542_v4 }
  0x9d   :  { %3808 = vmatmul.mubr.msk.f32.gmra.mrb[70].mxu0 %vm176_vm2, %v72_v47 }
  0x9e   :  { %3810 = vmatprep.mubr.msk.f32.mxu0 %vm4541_vm0, %v4542_v4 }
  0xa1   :  { %3811 = vmatmul.mubr.msk.f32.gmra.mrb[72].mxu0 %vm176_vm2, %v73_v48 }
  0xa2   :  { %3813 = vmatprep.mubr.msk.f32.mxu0 %vm4541_vm0, %v4542_v4 }
  0xa5   :  { %3814 = vmatmul.mubr.msk.f32.gmra.mrb[74].mxu0 %vm176_vm2, %v74_v49  ;;  %v96_v49 = vld [vmem:[%s6225_s0 + $0x1d8] sm:$0xff] }
  0xa6   :  { %3816 = vmatprep.mubr.msk.f32.mxu0 %vm4541_vm0, %v4542_v4 }
  0xa9   :  { %3817 = vmatmul.mubr.msk.f32.gmra.mrb[76].mxu0 %vm176_vm2, %v75_v50 }
  0xaa   :  { %3819 = vmatprep.mubr.msk.f32.mxu0 %vm4541_vm0, %v4542_v4 }
  0xad   :  { %3820 = vmatmul.mubr.msk.f32.gmra.mrb[78].mxu0 %vm176_vm2, %v76_v51 }
  0xae   :  { %3822 = vmatprep.mubr.msk.f32.mxu0 %vm4541_vm0, %v4542_v4 }
  0xb1   :  { %3823 = vmatmul.mubr.msk.f32.gmra.mrb[80].mxu0 %vm176_vm2, %v77_v52  ;;  %v149_v52 = vld [vmem:[%s6225_s0 + $0x380] sm:$0xff] }
  0xb2   :  { %3825 = vmatprep.mubr.msk.f32.mxu0 %vm4541_vm0, %v4542_v4  ;;  %4039 = vmatmul.mubr.msk.f32.gmra.mrb[30].mxu1 %vm176_vm2, %v149_v52 }
  0xb3   :  { %4041 = vmatprep.mubr.msk.f32.mxu1 %vm4541_vm0, %v4542_v4 }
  0xb5   :  { %3826 = vmatmul.mubr.msk.f32.gmra.mrb[82].mxu0 %vm176_vm2, %v78_v54 }
  0xb6   :  { %3828 = vmatprep.mubr.msk.f32.mxu0 %vm4541_vm0, %v4542_v4 }
  0xb9   :  { %3829 = vmatmul.mubr.msk.f32.gmra.mrb[84].mxu0 %vm176_vm2, %v79_v55 }
  0xba   :  { %3831 = vmatprep.mubr.msk.f32.mxu0 %vm4541_vm0, %v4542_v4 }
  0xbd   :  { %3832 = vmatmul.mubr.msk.f32.gmra.mrb[86].mxu0 %vm176_vm2, %v80_v56  ;;  %v97_v56 = vld [vmem:[%s6225_s0 + $0x1e0] sm:$0xff] }
  0xbe   :  { %3834 = vmatprep.mubr.msk.f32.mxu0 %vm4541_vm0, %v4542_v4 }
  0xc1   :  { %3835 = vmatmul.mubr.msk.f32.gmra.mrb[88].mxu0 %vm176_vm2, %v81_v57 }
  0xc2   :  { %3837 = vmatprep.mubr.msk.f32.mxu0 %vm4541_vm0, %v4542_v4 }
  0xc5   :  { %3838 = vmatmul.mubr.msk.f32.gmra.mrb[90].mxu0 %vm176_vm2, %v82_v58  ;;  %v150_v58 = vld [vmem:[%s6225_s0 + $0x388] sm:$0xff] }
  0xc6   :  { %3840 = vmatprep.mubr.msk.f32.mxu0 %vm4541_vm0, %v4542_v4  ;;  %4042 = vmatmul.mubr.msk.f32.gmra.mrb[32].mxu1 %vm176_vm2, %v150_v58 }
  0xc7   :  { %4044 = vmatprep.mubr.msk.f32.mxu1 %vm4541_vm0, %v4542_v4 }
  0xc9   :  { %3841 = vmatmul.mubr.msk.f32.gmra.mrb[92].mxu0 %vm176_vm2, %v83_v60 }
  0xca   :  { %3843 = vmatprep.mubr.msk.f32.mxu0 %vm4541_vm0, %v4542_v4  ;;  %4045 = vmatmul.mubr.msk.f32.gmra.mrb[34].mxu1 %vm176_vm2, %v151_v2  ;;  %v107_v2 = vld [vmem:[%s6225_s0 + $0x230] sm:$0xff] }
  0xcb   :  { %4047 = vmatprep.mubr.msk.f32.mxu1 %vm4541_vm0, %v4542_v4 }
  0xcd   :  { %3844 = vmatmul.mubr.msk.f32.gmra.mrb[94].mxu0 %vm176_vm2, %v84_v62  ;;  %v98_v62 = vld [vmem:[%s6225_s0 + $0x1e8] sm:$0xff] }
  0xce   :  { %3846 = vmatprep.mubr.msk.f32.mxu0 %vm4541_vm0, %v4542_v4  ;;  %4048 = vmatmul.mubr.msk.f32.gmra.mrb[36].mxu1 %vm176_vm2, %v152_v9 }
  0xcf   :  { %4050 = vmatprep.mubr.msk.f32.mxu1 %vm4541_vm0, %v4542_v4 }
  0xd1   :  { %3847 = vmatmul.mubr.msk.f32.gmra.mrb[96].mxu0 %vm176_vm2, %v85_v1 }
  0xd2   :  { %3849 = vmatprep.mubr.msk.f32.mxu0 %vm4541_vm0, %v4542_v4 }
  0xd5   :  { %3850 = vmatmul.mubr.msk.f32.gmra.mrb[98].mxu0 %vm176_vm2, %v86_v3 }
  0xd6   :  { %3852 = vmatprep.mubr.msk.f32.mxu0 %vm4541_vm0, %v4542_v4 }
  0xd9   :  { %3853 = vmatmul.mubr.msk.f32.gmra.mrb[100].mxu0 %vm176_vm2, %v87_v6 }
  0xda   :  { %3855 = vmatprep.mubr.msk.f32.mxu0 %vm4541_vm0, %v4542_v4 }
  0xdd   :  { %3856 = vmatmul.mubr.msk.f32.gmra.mrb[102].mxu0 %vm176_vm2, %v88_v8 }
  0xde   :  { %3858 = vmatprep.mubr.msk.f32.mxu0 %vm4541_vm0, %v4542_v4 }
  0xe1   :  { %3859 = vmatmul.mubr.msk.f32.gmra.mrb[104].mxu0 %vm176_vm2, %v89_v10 }
  0xe2   :  { %3861 = vmatprep.mubr.msk.f32.mxu0 %vm4541_vm0, %v4542_v4 }
  0xe4   :  { %v622_v15 = vpop.f32.mrb[0].mxu0 }
  0xe5   :  { %v3704_v16 = vpop.f32.mrb[1].mxu0  ;;  %3862 = vmatmul.mubr.msk.f32.gmra.mrb[106].mxu0 %vm176_vm2, %v90_v12  ;;  %v623_v18 = vadd.f32 %v5016_v14, %v622_v15 }
  0xe6   :  { %3864 = vmatprep.mubr.msk.f32.mxu0 %vm4541_vm0, %v4542_v4 }
  0xe7   :  { %v1246_v24 = vmax.f32 %v623_v18, 0.0 }
  0xe8   :  { %v627_v20 = vpop.f32.mrb[2].mxu0 }
  0xe9   :  { %v628_v21 = vadd.f32 %v5016_v14, %v627_v20  ;;  %v3707_v22 = vpop.f32.mrb[3].mxu0  ;;  %3865 = vmatmul.mubr.msk.f32.gmra.mrb[108].mxu0 %vm176_vm2, %v91_v17  ;;  %v153_v17 = vld [vmem:[%s6225_s0 + $0x3a0] sm:$0xff] }
  0xea   :  { %3867 = vmatprep.mubr.msk.f32.mxu0 %vm4541_vm0, %v4542_v4  ;;  %4051 = vmatmul.mubr.msk.f32.gmra.mrb[38].mxu1 %vm176_vm2, %v153_v17 }
  0xeb   :  { %v1247_v25 = vmax.f32 %v628_v21, 0.0  ;;  %4053 = vmatprep.mubr.msk.f32.mxu1 %vm4541_vm0, %v4542_v4  ;;  %v101_v21 = vld [vmem:[%s6225_s0 + $0x200] sm:$0xff] }
  0xec   :  { %v632_v27 = vpop.f32.mrb[4].mxu0 }
  0xed   :  { %v5045_v28 = vpack.c.bf16 %v1247_v25, %v1246_v24  ;;  %v3710_v29 = vpop.f32.mrb[5].mxu0  ;;  %3868 = vmatmul.mubr.msk.f32.gmra.mrb[110].mxu0 %vm176_vm2, %v92_v23  ;;  %v633_v31 = vadd.f32 %v5016_v14, %v632_v27  ;;  %v154_v23 = vld [vmem:[%s6225_s0 + $0x3a8] sm:$0xff] }
  0xee   :  { %3870 = vmatprep.mubr.msk.f32.mxu0 %vm4541_vm0, %v4542_v4  ;;  %4054 = vmatmul.mubr.msk.f32.gmra.mrb[40].mxu1 %vm176_vm2, %v154_v23  ;;  %v102_v27 = vld [vmem:[%s6225_s0 + $0x208] sm:$0xff] }
  0xef   :  { %v1248_v37 = vmax.f32 %v633_v31, 0.0  ;;  %4056 = vmatprep.mubr.msk.f32.mxu1 %vm4541_vm0, %v4542_v4  ;;  %v155_v31 = vld [vmem:[%s6225_s0 + $0x3b0] sm:$0xff] }
  0xf0   :  { %v637_v33 = vpop.f32.mrb[6].mxu0 }
  0xf1   :  { %v638_v34 = vadd.f32 %v5016_v14, %v637_v33  ;;  %v3713_v35 = vpop.f32.mrb[7].mxu0  ;;  %3871 = vmatmul.mubr.msk.f32.gmra.mrb[112].mxu0 %vm176_vm2, %v93_v30 }
  0xf2   :  { %3873 = vmatprep.mubr.msk.f32.mxu0 %vm4541_vm0, %v4542_v4  ;;  %4057 = vmatmul.mubr.msk.f32.gmra.mrb[42].mxu1 %vm176_vm2, %v155_v31  ;;  %v103_v35 = vld [vmem:[%s6225_s0 + $0x210] sm:$0xff]  ;;  %v110_v31 = vld [vmem:[%s6225_s0 + $0x248] sm:$0xff] }
  0xf3   :  { %v1249_v38 = vmax.f32 %v638_v34, 0.0  ;;  %4059 = vmatprep.mubr.msk.f32.mxu1 %vm4541_vm0, %v4542_v4 }
  0xf4   :  { %v642_v40 = vpop.f32.mrb[8].mxu0 }
  0xf5   :  { %v5073_v41 = vpack.c.bf16 %v1249_v38, %v1248_v37  ;;  %v3716_v42 = vpop.f32.mrb[9].mxu0  ;;  %3874 = vmatmul.mubr.msk.f32.gmra.mrb[114].mxu0 %vm176_vm2, %v94_v36  ;;  %v643_v44 = vadd.f32 %v5016_v14, %v642_v40  ;;  %v156_v37 = vld [vmem:[%s6225_s0 + $0x3b8] sm:$0xff] }
  0xf6   :  { %3876 = vmatprep.mubr.msk.f32.mxu0 %vm4541_vm0, %v4542_v4  ;;  %4060 = vmatmul.mubr.msk.f32.gmra.mrb[44].mxu1 %vm176_vm2, %v156_v37  ;;  %v104_v42 = vld [vmem:[%s6225_s0 + $0x218] sm:$0xff] }
  0xf7   :  { %v1250_v50 = vmax.f32 %v643_v44, 0.0  ;;  %4062 = vmatprep.mubr.msk.f32.mxu1 %vm4541_vm0, %v4542_v4 }
  0xf8   :  { %v647_v46 = vpop.f32.mrb[10].mxu0 }
  0xf9   :  { %v648_v47 = vadd.f32 %v5016_v14, %v647_v46  ;;  %v3719_v48 = vpop.f32.mrb[11].mxu0  ;;  %3877 = vmatmul.mubr.msk.f32.gmra.mrb[116].mxu0 %vm176_vm2, %v95_v43 }
  0xfa   :  { %3879 = vmatprep.mubr.msk.f32.mxu0 %vm4541_vm0, %v4542_v4  ;;  %4063 = vmatmul.mubr.msk.f32.gmra.mrb[46].mxu1 %vm176_vm2, %v157_v45 }
  0xfb   :  { %v1251_v51 = vmax.f32 %v648_v47, 0.0  ;;  %4065 = vmatprep.mubr.msk.f32.mxu1 %vm4541_vm0, %v4542_v4 }
  0xfc   :  { %v652_v53 = vpop.f32.mrb[12].mxu0 }
  0xfd   :  { %v5101_v54 = vpack.c.bf16 %v1251_v51, %v1250_v50  ;;  %v3722_v55 = vpop.f32.mrb[13].mxu0  ;;  %3880 = vmatmul.mubr.msk.f32.gmra.mrb[118].mxu0 %vm176_vm2, %v96_v49  ;;  %v653_v57 = vadd.f32 %v5016_v14, %v652_v53  ;;  %v105_v49 = vld [vmem:[%s6225_s0 + $0x220] sm:$0xff]  ;;  %v158_v51 = vld [vmem:[%s6225_s0 + $0x3c8] sm:$0xff] }
  0xfe   :  { %3882 = vmatprep.mubr.msk.f32.mxu0 %vm4541_vm0, %v4542_v4  ;;  %4066 = vmatmul.mubr.msk.f32.gmra.mrb[48].mxu1 %vm176_vm2, %v158_v51 }
  0xff   :  { %v1252_v63 = vmax.f32 %v653_v57, 0.0  ;;  %4068 = vmatprep.mubr.msk.f32.mxu1 %vm4541_vm0, %v4542_v4 }
 0x100   :  { %v657_v59 = vpop.f32.mrb[14].mxu0 }
 0x101   :  { %v658_v60 = vadd.f32 %v5016_v14, %v657_v59  ;;  %v3725_v61 = vpop.f32.mrb[15].mxu0  ;;  %3883 = vmatmul.mubr.msk.f32.gmra.mrb[120].mxu0 %vm176_vm2, %v97_v56  ;;  %v106_v56 = vld [vmem:[%s6225_s0 + $0x228] sm:$0xff]  ;;  %v159_v59 = vld [vmem:[%s6225_s0 + $0x3d0] sm:$0xff] }
 0x102   :  { %3885 = vmatprep.mubr.msk.f32.mxu0 %vm4541_vm0, %v4542_v4  ;;  %4069 = vmatmul.mubr.msk.f32.gmra.mrb[50].mxu1 %vm176_vm2, %v159_v59 }
 0x103   :  { %v1253_v1 = vmax.f32 %v658_v60, 0.0  ;;  %4071 = vmatprep.mubr.msk.f32.mxu1 %vm4541_vm0, %v4542_v4 }
 0x104   :  { %v662_v3 = vpop.f32.mrb[16].mxu0 }
 0x105   :  { %v5129_v5 = vpack.c.bf16 %v1253_v1, %v1252_v63  ;;  %v3728_v6 = vpop.f32.mrb[17].mxu0  ;;  %3886 = vmatmul.mubr.msk.f32.gmra.mrb[122].mxu0 %vm176_vm2, %v98_v62  ;;  %v663_v8 = vadd.f32 %v5016_v14, %v662_v3  ;;  %v1371_v63 = vlaneseq  ;;  %v160_v3 = vld [vmem:[%s6225_s0 + $0x3d8] sm:$0xff] }
 0x106   :  { %3888 = vmatprep.mubr.msk.f32.mxu0 %vm4541_vm0, %v4542_v4  ;;  %4072 = vmatmul.mubr.msk.f32.gmra.mrb[52].mxu1 %vm176_vm2, %v160_v3  ;;  %v116_v3 = vld [vmem:[%s6225_s0 + $0x278] sm:$0xff] }
 0x107   :  { %v1254_v15 = vmax.f32 %v663_v8, 0.0  ;;  %v5255_v6 = vshrl.u32 %v1371_v63, 7  ;;  %4074 = vmatprep.mubr.msk.f32.mxu1 %vm4541_vm0, %v4542_v4 }
 0x108   :  { %v667_v10 = vpop.f32.mrb[18].mxu0 }
 0x109   :  { %v668_v11 = vadd.f32 %v5016_v14, %v667_v10  ;;  %v3731_v12 = vpop.f32.mrb[19].mxu0  ;;  %3889 = vmatmul.mubr.msk.f32.gmra.mrb[124].mxu0 %vm176_vm2, %v99_v7  ;;  %v5262_v10 = vand.u32 127, %v1371_v63 }
 0x10a   :  { %3891 = vmatprep.mubr.msk.f32.mxu0 %vm4541_vm0, %v4542_v4 }
 0x10b   :  { %v1255_v16 = vmax.f32 %v668_v11, 0.0  ;;  %v1431_v11 = vadd.s32 1, %v5255_v6  ;;  %v5274_v17 = vadd.s32 128, %v5262_v10 }
 0x10c   :  { %v672_v18 = vpop.f32.mrb[20].mxu0 }
 0x10d   :  { %v5157_v19 = vpack.c.bf16 %v1255_v16, %v1254_v15  ;;  %v3734_v20 = vpop.f32.mrb[21].mxu0  ;;  %3892 = vmatmul.mubr.msk.f32.gmra.mrb[126].mxu0 %vm176_vm2, %v100_v13  ;;  %v673_v22 = vadd.f32 %v5016_v14, %v672_v18  ;;  %v108_v13 = vld [vmem:[%s6225_s0 + $0x238] sm:$0xff]  ;;  %v161_v16 = vld [vmem:[%s6225_s0 + $0x3e0] sm:$0xff]  ;;  %v5277_v18 = vmul.u32 25, %v5255_v6 }
 0x10e   :  { %3894 = vmatprep.mubr.msk.f32.mxu0 %vm4541_vm0, %v4542_v4  ;;  %v5279_v20 = vmul.u32 25, %v1431_v11  ;;  %4075 = vmatmul.mubr.msk.f32.gmra.mrb[54].mxu1 %vm176_vm2, %v161_v16 }
 0x10f   :  { %v1256_v29 = vmax.f32 %v673_v22, 0.0  ;;  %vm1392_vm3 = vcmp.ge.s32.totalorder %v5274_v17, %v5277_v18  ;;  %vm1391_vm6 = vcmp.ge.s32.totalorder %v5262_v10, %v5277_v18 }
 0x110   :  { %v677_v24 = vpop.f32.mrb[22].mxu0  ;;  %vm1442_vm4 = vcmp.lt.s32.totalorder %v5274_v17, %v5279_v20  ;;  %vm1441_vm7 = vcmp.lt.s32.totalorder %v5262_v10, %v5279_v20 }
 0x111   :  { %v678_v25 = vadd.f32 %v5016_v14, %v677_v24  ;;  %v3737_v26 = vpop.f32.mrb[23].mxu0  ;;  %3895 = vmatmul.mubr.msk.f32.gmra.mrb[128].mxu0 %vm176_vm2, %v101_v21  ;;  %v109_v24 = vld [vmem:[%s6225_s0 + $0x240] sm:$0xff]  ;;  %vm1482_vm5 = vmand %vm1392_vm3, %vm1442_vm4 }
 0x112   :  { %3897 = vmatprep.mubr.msk.f32.mxu0 %vm4541_vm0, %v4542_v4  ;;  %v4543_v26 = vmov 0.04   ;;  %vm1481_vm8 = vmand %vm1391_vm6, %vm1441_vm7 }
 0x113   :  { %v1257_v30 = vmax.f32 %v678_v25, 0.0  ;;  %3254 = vmatprep.mubr.msk.f32.mxu1 %vm1482_vm5, %v4543_v26 }
 0x114   :  { %v682_v32 = vpop.f32.mrb[24].mxu0 }
 0x115   :  { %v5185_v33 = vpack.c.bf16 %v1257_v30, %v1256_v29  ;;  %v3740_v34 = vpop.f32.mrb[25].mxu0  ;;  %3898 = vmatmul.mubr.msk.f32.gmra.mrb[130].mxu0 %vm176_vm2, %v102_v27  ;;  %v683_v36 = vadd.f32 %v5016_v14, %v682_v32 }
 0x116   :  { %3900 = vmatprep.mubr.msk.f32.mxu0 %vm4541_vm0, %v4542_v4 }
 0x117   :  { %v1258_v43 = vmax.f32 %v683_v36, 0.0 }
 0x118   :  { %v687_v38 = vpop.f32.mrb[26].mxu0 }
 0x119   :  { %v688_v39 = vadd.f32 %v5016_v14, %v687_v38  ;;  %v3743_v40 = vpop.f32.mrb[27].mxu0  ;;  %3901 = vmatmul.mubr.msk.f32.gmra.mrb[132].mxu0 %vm176_vm2, %v103_v35 }
 0x11a   :  { %3903 = vmatprep.mubr.msk.f32.mxu0 %vm4541_vm0, %v4542_v4 }
 0x11b   :  { %v1259_v44 = vmax.f32 %v688_v39, 0.0 }
 0x11c   :  { %v692_v46 = vpop.f32.mrb[28].mxu0 }
 0x11d   :  { %v5213_v47 = vpack.c.bf16 %v1259_v44, %v1258_v43  ;;  %v3746_v48 = vpop.f32.mrb[29].mxu0  ;;  %3904 = vmatmul.mubr.msk.f32.gmra.mrb[134].mxu0 %vm176_vm2, %v104_v42  ;;  %v693_v50 = vadd.f32 %v5016_v14, %v692_v46  ;;  %v112_v43 = vld [vmem:[%s6225_s0 + $0x258] sm:$0xff] }
 0x11e   :  { %3906 = vmatprep.mubr.msk.f32.mxu0 %vm4541_vm0, %v4542_v4 }
 0x11f   :  { %v1260_v57 = vmax.f32 %v693_v50, 0.0 }
 0x120   :  { %v697_v52 = vpop.f32.mrb[30].mxu0 }
 0x121   :  { %v698_v53 = vadd.f32 %v5016_v14, %v697_v52  ;;  %v3749_v55 = vpop.f32.mrb[31].mxu0  ;;  %3907 = vmatmul.mubr.msk.f32.gmra.mrb[136].mxu0 %vm176_vm2, %v105_v49 }
 0x122   :  { %3909 = vmatprep.mubr.msk.f32.mxu0 %vm4541_vm0, %v4542_v4  ;;  %v114_v55 = vld [vmem:[%s6225_s0 + $0x268] sm:$0xff] }
 0x123   :  { %v1261_v58 = vmax.f32 %v698_v53, 0.0 }
 0x124   :  { %v702_v60 = vpop.f32.mrb[32].mxu0 }
 0x125   :  { %v5241_v61 = vpack.c.bf16 %v1261_v58, %v1260_v57  ;;  %v3752_v62 = vpop.f32.mrb[33].mxu0  ;;  %3910 = vmatmul.mubr.msk.f32.gmra.mrb[138].mxu0 %vm176_vm2, %v106_v56  ;;  %v703_v1 = vadd.f32 %v5016_v14, %v702_v60 }
 0x126   :  { %3912 = vmatprep.mubr.msk.f32.mxu0 %vm4541_vm0, %v4542_v4 }
 0x127   :  { %v1262_v12 = vmax.f32 %v703_v1, 0.0 }
 0x128   :  { %v707_v7 = vpop.f32.mrb[34].mxu0 }
 0x129   :  { %v708_v8 = vadd.f32 %v5016_v14, %v707_v7  ;;  %v3755_v9 = vpop.f32.mrb[35].mxu0  ;;  %3913 = vmatmul.mubr.msk.f32.gmra.mrb[140].mxu0 %vm176_vm2, %v107_v2 }
 0x12a   :  { %3915 = vmatprep.mubr.msk.f32.mxu0 %vm4541_vm0, %v4542_v4 }
 0x12b   :  { %v1263_v15 = vmax.f32 %v708_v8, 0.0 }
 0x12c   :  { %v712_v21 = vpop.f32.mrb[36].mxu0 }
 0x12d   :  { %v4220_v22 = vpack.c.bf16 %v1263_v15, %v1262_v12  ;;  %v3758_v23 = vpop.f32.mrb[37].mxu0  ;;  %3916 = vmatmul.mubr.msk.f32.gmra.mrb[142].mxu0 %vm176_vm2, %v108_v13  ;;  %v713_v25 = vadd.f32 %v5016_v14, %v712_v21 }
 0x12e   :  { %3918 = vmatprep.mubr.msk.f32.mxu0 %vm4541_vm0, %v4542_v4 }
 0x12f   :  { %4221 = vmatprep.subr.bf16.mxu1 %v4220_v22  ;;  %v1264_v32 = vmax.f32 %v713_v25, 0.0  ;;  %v118_v22 = vld [vmem:[%s6225_s0 + $0x288] sm:$0xff] }
 0x130   :  { %v717_v27 = vpop.f32.mrb[38].mxu0  ;;  %4223 = vmatpush3.bf16.msra.mxu1 %v5045_v28  ;;  %v111_v28 = vld [vmem:[%s6225_s0 + $0x250] sm:$0xff] }
 0x131   :  { %v718_v29 = vadd.f32 %v5016_v14, %v717_v27  ;;  %v3761_v30 = vpop.f32.mrb[39].mxu0  ;;  %3919 = vmatmul.mubr.msk.f32.gmra.mrb[144].mxu0 %vm176_vm2, %v109_v24 }
 0x132   :  { %3921 = vmatprep.mubr.msk.f32.mxu0 %vm4541_vm0, %v4542_v4 }
 0x133   :  { %v1265_v34 = vmax.f32 %v718_v29, 0.0 }
 0x134   :  { %v722_v35 = vpop.f32.mrb[40].mxu0 }
 0x135   :  { %v4224_v36 = vpack.c.bf16 %v1265_v34, %v1264_v32  ;;  %v3764_v37 = vpop.f32.mrb[41].mxu0  ;;  %3922 = vmatmul.mubr.msk.f32.gmra.mrb[146].mxu0 %vm176_vm2, %v110_v31  ;;  %v723_v38 = vadd.f32 %v5016_v14, %v722_v35  ;;  %v120_v35 = vld [vmem:[%s6225_s0 + $0x298] sm:$0xff] }
 0x136   :  { %3924 = vmatprep.mubr.msk.f32.mxu0 %vm4541_vm0, %v4542_v4 }
 0x137   :  { %4225 = vmatprep.subr.bf16.mxu1 %v4224_v36  ;;  %v1266_v44 = vmax.f32 %v723_v38, 0.0 }
 0x138   :  { %v727_v39 = vpop.f32.mrb[42].mxu0  ;;  %4227 = vmatpush3.bf16.msra.mxu1 %v5073_v41  ;;  %v113_v41 = vld [vmem:[%s6225_s0 + $0x260] sm:$0xff] }
 0x139   :  { %v728_v40 = vadd.f32 %v5016_v14, %v727_v39  ;;  %v3767_v42 = vpop.f32.mrb[43].mxu0  ;;  %3925 = vmatmul.mubr.msk.f32.gmra.mrb[148].mxu0 %vm176_vm2, %v111_v28 }
 0x13a   :  { %3927 = vmatprep.mubr.msk.f32.mxu0 %vm4541_vm0, %v4542_v4 }
 0x13b   :  { %v1267_v45 = vmax.f32 %v728_v40, 0.0 }
 0x13c   :  { %v732_v46 = vpop.f32.mrb[44].mxu0 }
 0x13d   :  { %v4228_v48 = vpack.c.bf16 %v1267_v45, %v1266_v44  ;;  %v3770_v49 = vpop.f32.mrb[45].mxu0  ;;  %3928 = vmatmul.mubr.msk.f32.gmra.mrb[150].mxu0 %vm176_vm2, %v112_v43  ;;  %v733_v50 = vadd.f32 %v5016_v14, %v732_v46  ;;  %v122_v45 = vld [vmem:[%s6225_s0 + $0x2a8] sm:$0xff] }
 0x13e   :  { %3930 = vmatprep.mubr.msk.f32.mxu0 %vm4541_vm0, %v4542_v4 }
 0x13f   :  { %4229 = vmatprep.subr.bf16.mxu1 %v4228_v48  ;;  %v1268_v56 = vmax.f32 %v733_v50, 0.0 }
 0x140   :  { %v737_v51 = vpop.f32.mrb[46].mxu0  ;;  %4231 = vmatpush3.bf16.msra.mxu1 %v5101_v54  ;;  %v115_v54 = vld [vmem:[%s6225_s0 + $0x270] sm:$0xff] }
 0x141   :  { %v738_v52 = vadd.f32 %v5016_v14, %v737_v51  ;;  %v3773_v53 = vpop.f32.mrb[47].mxu0  ;;  %3931 = vmatmul.mubr.msk.f32.gmra.mrb[152].mxu0 %vm176_vm2, %v113_v41 }
 0x142   :  { %3933 = vmatprep.mubr.msk.f32.mxu0 %vm4541_vm0, %v4542_v4 }
 0x143   :  { %v1269_v57 = vmax.f32 %v738_v52, 0.0 }
 0x144   :  { %v742_v58 = vpop.f32.mrb[48].mxu0 }
 0x145   :  { %v4232_v59 = vpack.c.bf16 %v1269_v57, %v1268_v56  ;;  %v3776_v60 = vpop.f32.mrb[49].mxu0  ;;  %3934 = vmatmul.mubr.msk.f32.gmra.mrb[154].mxu0 %vm176_vm2, %v114_v55  ;;  %v743_v62 = vadd.f32 %v5016_v14, %v742_v58  ;;  %v124_v56 = vld [vmem:[%s6225_s0 + $0x2b8] sm:$0xff] }
 0x146   :  { %3936 = vmatprep.mubr.msk.f32.mxu0 %vm4541_vm0, %v4542_v4 }
 0x147   :  { %4233 = vmatprep.subr.bf16.mxu1 %v4232_v59  ;;  %v1270_v7 = vmax.f32 %v743_v62, 0.0 }
 0x148   :  { %v747_v63 = vpop.f32.mrb[50].mxu0  ;;  %4235 = vmatpush3.bf16.msra.mxu1 %v5129_v5  ;;  %v117_v5 = vld [vmem:[%s6225_s0 + $0x280] sm:$0xff] }
 0x149   :  { %v748_v1 = vadd.f32 %v5016_v14, %v747_v63  ;;  %v3779_v2 = vpop.f32.mrb[51].mxu0  ;;  %3937 = vmatmul.mubr.msk.f32.gmra.mrb[156].mxu0 %vm176_vm2, %v115_v54  ;;  %v125_v54 = vld [vmem:[%s6225_s0 + $0x2c0] sm:$0xff] }
 0x14a   :  { %3939 = vmatprep.mubr.msk.f32.mxu0 %vm4541_vm0, %v4542_v4 }
 0x14b   :  { %v1271_v8 = vmax.f32 %v748_v1, 0.0 }
 0x14c   :  { %v752_v9 = vpop.f32.mrb[52].mxu0 }
 0x14d   :  { %v4236_v11 = vpack.c.bf16 %v1271_v8, %v1270_v7  ;;  %v3782_v12 = vpop.f32.mrb[53].mxu0  ;;  %3940 = vmatmul.mubr.msk.f32.gmra.mrb[158].mxu0 %vm176_vm2, %v116_v3  ;;  %v753_v13 = vadd.f32 %v5016_v14, %v752_v9  ;;  %v126_v3 = vld [vmem:[%s6225_s0 + $0x2c8] sm:$0xff] }
 0x14e   :  { %3942 = vmatprep.mubr.msk.f32.mxu0 %vm4541_vm0, %v4542_v4 }
 0x14f   :  { %4237 = vmatprep.subr.bf16.mxu1 %v4236_v11  ;;  %v1272_v23 = vmax.f32 %v753_v13, 0.0 }
 0x150   :  { %v757_v15 = vpop.f32.mrb[54].mxu0  ;;  %4239 = vmatpush3.bf16.msra.mxu1 %v5157_v19  ;;  %v119_v19 = vld [vmem:[%s6225_s0 + $0x290] sm:$0xff] }
 0x151   :  { %v758_v16 = vadd.f32 %v5016_v14, %v757_v15  ;;  %v3785_v21 = vpop.f32.mrb[55].mxu0  ;;  %3943 = vmatmul.mubr.msk.f32.gmra.mrb[160].mxu0 %vm176_vm2, %v117_v5  ;;  %v127_v5 = vld [vmem:[%s6225_s0 + $0x2d0] sm:$0xff] }
 0x152   :  { %3945 = vmatprep.mubr.msk.f32.mxu0 %vm4541_vm0, %v4542_v4 }
 0x153   :  { %v1273_v24 = vmax.f32 %v758_v16, 0.0 }
 0x154   :  { %v762_v25 = vpop.f32.mrb[56].mxu0 }
 0x155   :  { %v4240_v27 = vpack.c.bf16 %v1273_v24, %v1272_v23  ;;  %v3788_v29 = vpop.f32.mrb[57].mxu0  ;;  %3946 = vmatmul.mubr.msk.f32.gmra.mrb[162].mxu0 %vm176_vm2, %v118_v22  ;;  %v763_v30 = vadd.f32 %v5016_v14, %v762_v25  ;;  %v128_v22 = vld [vmem:[%s6225_s0 + $0x2d8] sm:$0xff] }
 0x156   :  { %3948 = vmatprep.mubr.msk.f32.mxu0 %vm4541_vm0, %v4542_v4 }
 0x157   :  { %4241 = vmatprep.subr.bf16.mxu1 %v4240_v27  ;;  %v1274_v36 = vmax.f32 %v763_v30, 0.0 }
 0x158   :  { %v767_v31 = vpop.f32.mrb[58].mxu0  ;;  %4243 = vmatpush3.bf16.msra.mxu1 %v5185_v33  ;;  %v121_v33 = vld [vmem:[%s6225_s0 + $0x2a0] sm:$0xff] }
 0x159   :  { %v768_v32 = vadd.f32 %v5016_v14, %v767_v31  ;;  %v3791_v34 = vpop.f32.mrb[59].mxu0  ;;  %3949 = vmatmul.mubr.msk.f32.gmra.mrb[164].mxu0 %vm176_vm2, %v119_v19  ;;  %v129_v19 = vld [vmem:[%s6225_s0 + $0x2e0] sm:$0xff] }
 0x15a   :  { %3951 = vmatprep.mubr.msk.f32.mxu0 %vm4541_vm0, %v4542_v4 }
 0x15b   :  { %v1275_v37 = vmax.f32 %v768_v32, 0.0 }
 0x15c   :  { %v772_v28 = vpop.f32.mrb[60].mxu0 }
 0x15d   :  { %v4244_v38 = vpack.c.bf16 %v1275_v37, %v1274_v36  ;;  %v3794_v39 = vpop.f32.mrb[61].mxu0  ;;  %3952 = vmatmul.mubr.msk.f32.gmra.mrb[166].mxu0 %vm176_vm2, %v120_v35  ;;  %v773_v40 = vadd.f32 %v5016_v14, %v772_v28  ;;  %v130_v35 = vld [vmem:[%s6225_s0 + $0x2e8] sm:$0xff] }
 0x15e   :  { %3954 = vmatprep.mubr.msk.f32.mxu0 %vm4541_vm0, %v4542_v4 }
 0x15f   :  { %4245 = vmatprep.subr.bf16.mxu1 %v4244_v38  ;;  %v1276_v46 = vmax.f32 %v773_v40, 0.0 }
 0x160   :  { %v777_v42 = vpop.f32.mrb[62].mxu0  ;;  %4247 = vmatpush3.bf16.msra.mxu1 %v5213_v47  ;;  %v123_v47 = vld [vmem:[%s6225_s0 + $0x2b0] sm:$0xff] }
 0x161   :  { %v778_v43 = vadd.f32 %v5016_v14, %v777_v42  ;;  %v3797_v44 = vpop.f32.mrb[63].mxu0  ;;  %3955 = vmatmul.mubr.msk.f32.gmra.mrb[168].mxu0 %vm176_vm2, %v121_v33  ;;  %v131_v33 = vld [vmem:[%s6225_s0 + $0x2f0] sm:$0xff] }
 0x162   :  { %3957 = vmatprep.mubr.msk.f32.mxu0 %vm4541_vm0, %v4542_v4 }
 0x163   :  { %v1277_v48 = vmax.f32 %v778_v43, 0.0 }
 0x164   :  { %v782_v49 = vpop.f32.mrb[64].mxu0 }
 0x165   :  { %v4248_v41 = vpack.c.bf16 %v1277_v48, %v1276_v46  ;;  %v3800_v50 = vpop.f32.mrb[65].mxu0  ;;  %3958 = vmatmul.mubr.msk.f32.gmra.mrb[170].mxu0 %vm176_vm2, %v122_v45  ;;  %v783_v51 = vadd.f32 %v5016_v14, %v782_v49  ;;  %v132_v45 = vld [vmem:[%s6225_s0 + $0x2f8] sm:$0xff] }
 0x166   :  { %3960 = vmatprep.mubr.msk.f32.mxu0 %vm4541_vm0, %v4542_v4 }
 0x167   :  { %4249 = vmatprep.subr.bf16.mxu1 %v4248_v41  ;;  %v1278_v57 = vmax.f32 %v783_v51, 0.0 }
 0x168   :  { %v787_v52 = vpop.f32.mrb[66].mxu0  ;;  %4251 = vmatpush3.bf16.msra.mxu1 %v5241_v61 }
 0x169   :  { %v788_v53 = vadd.f32 %v5016_v14, %v787_v52  ;;  %v3803_v55 = vpop.f32.mrb[67].mxu0  ;;  %3961 = vmatmul.mubr.msk.f32.gmra.mrb[172].mxu0 %vm176_vm2, %v123_v47  ;;  %v133_v47 = vld [vmem:[%s6225_s0 + $0x300] sm:$0xff] }
 0x16a   :  { %3963 = vmatprep.mubr.msk.f32.mxu0 %vm4541_vm0, %v4542_v4 }
 0x16b   :  { %v1279_v58 = vmax.f32 %v788_v53, 0.0  ;;  %3255 = vmatmul.mubr.msk.f32.vlgmr.msra.gmra.mrb[56].mxu1 %vm1481_vm8, %v4543_v26 }
 0x16c   :  { %v792_v59 = vpop.f32.mrb[68].mxu0 }
 0x16d   :  { %v5412_v60 = vpack.c.bf16 %v1279_v58, %v1278_v57  ;;  %v3806_v61 = vpop.f32.mrb[69].mxu0  ;;  %3964 = vmatmul.mubr.msk.f32.gmra.mrb[174].mxu0 %vm176_vm2, %v124_v56  ;;  %v793_v62 = vadd.f32 %v5016_v14, %v792_v59  ;;  %v1373_v56 = vadd.s32 8, %v5255_v6 }
 0x16e   :  { %3966 = vmatprep.mubr.msk.f32.mxu0 %vm4541_vm0, %v4542_v4 }
 0x16f   :  { %v1280_v7 = vmax.f32 %v793_v62, 0.0  ;;  %v1432_v61 = vadd.s32 1, %v1373_v56 }
 0x170   :  { %v797_v63 = vpop.f32.mrb[70].mxu0 }
 0x171   :  { %v798_v1 = vadd.f32 %v5016_v14, %v797_v63  ;;  %v3809_v2 = vpop.f32.mrb[71].mxu0  ;;  %3967 = vmatmul.mubr.msk.f32.gmra.mrb[176].mxu0 %vm176_vm2, %v125_v54  ;;  %v5490_v63 = vmul.u32 25, %v1373_v56 }
 0x172   :  { %3969 = vmatprep.mubr.msk.f32.mxu0 %vm4541_vm0, %v4542_v4  ;;  %v1374_v2 = vadd.s32 16, %v5255_v6 }
 0x173   :  { %v1281_v8 = vmax.f32 %v798_v1, 0.0  ;;  %v5492_v1 = vmul.u32 25, %v1432_v61  ;;  %vm1400_vm9 = vcmp.ge.s32.totalorder %v5274_v17, %v5490_v63  ;;  %vm1399_vm12 = vcmp.ge.s32.totalorder %v5262_v10, %v5490_v63 }
 0x174   :  { %v802_v9 = vpop.f32.mrb[72].mxu0 }
 0x175   :  { %v5428_v11 = vpack.c.bf16 %v1281_v8, %v1280_v7  ;;  %v3812_v12 = vpop.f32.mrb[73].mxu0  ;;  %3970 = vmatmul.mubr.msk.f32.gmra.mrb[178].mxu0 %vm176_vm2, %v126_v3  ;;  %v803_v13 = vadd.f32 %v5016_v14, %v802_v9  ;;  %vm1450_vm10 = vcmp.lt.s32.totalorder %v5274_v17, %v5492_v1  ;;  %v1433_v8 = vadd.s32 1, %v1374_v2 }
 0x176   :  { %3972 = vmatprep.mubr.msk.f32.mxu0 %vm4541_vm0, %v4542_v4  ;;  %vm1490_vm11 = vmand %vm1400_vm9, %vm1450_vm10  ;;  %vm1449_vm13 = vcmp.lt.s32.totalorder %v5262_v10, %v5492_v1 }
 0x177   :  { %v1282_v23 = vmax.f32 %v803_v13, 0.0  ;;  %3256 = vmatprep.mubr.msk.f32.mxu1 %vm1490_vm11, %v4543_v26  ;;  %vm1489_vm14 = vmand %vm1399_vm12, %vm1449_vm13  ;;  %v5508_v13 = vmul.u32 25, %v1433_v8 }
 0x178   :  { %v807_v15 = vpop.f32.mrb[74].mxu0  ;;  %3257 = vmatmul.mubr.msk.f32.gmra.mrb[58].mxu1 %vm1489_vm14, %v4543_v26 }
 0x179   :  { %v808_v16 = vadd.f32 %v5016_v14, %v807_v15  ;;  %v3815_v21 = vpop.f32.mrb[75].mxu0  ;;  %3973 = vmatmul.mubr.msk.f32.gmra.mrb[180].mxu0 %vm176_vm2, %v127_v5  ;;  %v5506_v5 = vmul.u32 25, %v1374_v2  ;;  %v1375_v15 = vadd.s32 24, %v5255_v6  ;;  %vm1458_vm1 = vcmp.lt.s32.totalorder %v5274_v17, %v5508_v13 }
 0x17a   :  { %3975 = vmatprep.mubr.msk.f32.mxu0 %vm4541_vm0, %v4542_v4  ;;  %vm1457_vm4 = vcmp.lt.s32.totalorder %v5262_v10, %v5508_v13 }
 0x17b   :  { %v1283_v24 = vmax.f32 %v808_v16, 0.0  ;;  %vm1408_vm15 = vcmp.ge.s32.totalorder %v5274_v17, %v5506_v5  ;;  %vm1407_vm3 = vcmp.ge.s32.totalorder %v5262_v10, %v5506_v5 }
 0x17c   :  { %v812_v25 = vpop.f32.mrb[76].mxu0  ;;  %vm1497_vm5 = vmand %vm1407_vm3, %vm1457_vm4 }
 0x17d   :  { %v5444_v27 = vpack.c.bf16 %v1283_v24, %v1282_v23  ;;  %v3818_v29 = vpop.f32.mrb[77].mxu0  ;;  %3976 = vmatmul.mubr.msk.f32.gmra.mrb[182].mxu0 %vm176_vm2, %v128_v22  ;;  %v813_v30 = vadd.f32 %v5016_v14, %v812_v25  ;;  %v1434_v23 = vadd.s32 1, %v1375_v15 }
 0x17e   :  { %3978 = vmatprep.mubr.msk.f32.mxu0 %vm4541_vm0, %v4542_v4  ;;  %v5523_v29 = vmul.u32 25, %v1375_v15 }
 0x17f   :  { %v1284_v36 = vmax.f32 %v813_v30, 0.0  ;;  %v1376_v30 = vadd.s32 32, %v5255_v6 }
 0x180   :  { %v817_v31 = vpop.f32.mrb[78].mxu0  ;;  %vm1416_vm6 = vcmp.ge.s32.totalorder %v5274_v17, %v5523_v29  ;;  %vm1415_vm9 = vcmp.ge.s32.totalorder %v5262_v10, %v5523_v29 }
 0x181   :  { %v818_v32 = vadd.f32 %v5016_v14, %v817_v31  ;;  %v3821_v34 = vpop.f32.mrb[79].mxu0  ;;  %3979 = vmatmul.mubr.msk.f32.gmra.mrb[184].mxu0 %vm176_vm2, %v129_v19  ;;  %v5525_v19 = vmul.u32 25, %v1434_v23  ;;  %v5540_v6 = vmul.u32 25, %v1376_v30 }
 0x182   :  { %3981 = vmatprep.mubr.msk.f32.mxu0 %vm4541_vm0, %v4542_v4  ;;  %v1435_v34 = vadd.s32 1, %v1376_v30 }
 0x183   :  { %v1285_v37 = vmax.f32 %v818_v32, 0.0  ;;  %vm1466_vm7 = vcmp.lt.s32.totalorder %v5274_v17, %v5525_v19  ;;  %vm1465_vm10 = vcmp.lt.s32.totalorder %v5262_v10, %v5525_v19  ;;  %vm1424_vm12 = vcmp.ge.s32.totalorder %v5274_v17, %v5540_v6 }
 0x184   :  { %v822_v28 = vpop.f32.mrb[80].mxu0  ;;  %vm1506_vm8 = vmand %vm1416_vm6, %vm1466_vm7 }
 0x185   :  { %v5460_v38 = vpack.c.bf16 %v1285_v37, %v1284_v36  ;;  %v3824_v39 = vpop.f32.mrb[81].mxu0  ;;  %3982 = vmatmul.mubr.msk.f32.gmra.mrb[186].mxu0 %vm176_vm2, %v130_v35  ;;  %v823_v40 = vadd.f32 %v5016_v14, %v822_v28  ;;  %vm1505_vm11 = vmand %vm1415_vm9, %vm1465_vm10  ;;  %v5542_v37 = vmul.u32 25, %v1435_v34 }
 0x186   :  { %3984 = vmatprep.mubr.msk.f32.mxu0 %vm4541_vm0, %v4542_v4 }
 0x187   :  { %v1286_v46 = vmax.f32 %v823_v40, 0.0  ;;  %vm1474_vm13 = vcmp.lt.s32.totalorder %v5274_v17, %v5542_v37 }
 0x188   :  { %v827_v42 = vpop.f32.mrb[82].mxu0  ;;  %vm1514_vm14 = vmand %vm1424_vm12, %vm1474_vm13 }
 0x189   :  { %v828_v43 = vadd.f32 %v5016_v14, %v827_v42  ;;  %v3827_v44 = vpop.f32.mrb[83].mxu0  ;;  %3985 = vmatmul.mubr.msk.f32.gmra.mrb[188].mxu0 %vm176_vm2, %v131_v33 }
 0x18a   :  { %3987 = vmatprep.mubr.msk.f32.mxu0 %vm4541_vm0, %v4542_v4 }
 0x18b   :  { %v1287_v48 = vmax.f32 %v828_v43, 0.0  ;;  %v5557_v43 = vadd.s32 384, %v5262_v10 }
 0x18c   :  { %v832_v49 = vpop.f32.mrb[84].mxu0 }
 0x18d   :  { %v5476_v41 = vpack.c.bf16 %v1287_v48, %v1286_v46  ;;  %v3830_v50 = vpop.f32.mrb[85].mxu0  ;;  %3988 = vmatmul.mubr.msk.f32.gmra.mrb[190].mxu0 %vm176_vm2, %v132_v45  ;;  %v833_v51 = vadd.f32 %v5016_v14, %v832_v49  ;;  %vm1394_vm3 = vcmp.ge.s32.totalorder %v5557_v43, %v5277_v18  ;;  %vm1444_vm4 = vcmp.lt.s32.totalorder %v5557_v43, %v5279_v20 }
 0x18e   :  { %3990 = vmatprep.mubr.msk.f32.mxu0 %vm4541_vm0, %v4542_v4  ;;  %vm1452_vm9 = vcmp.lt.s32.totalorder %v5557_v43, %v5492_v1 }
 0x18f   :  { %v1288_v57 = vmax.f32 %v833_v51, 0.0 }
 0x190   :  { %v837_v52 = vpop.f32.mrb[86].mxu0 }
 0x191   :  { %v838_v53 = vadd.f32 %v5016_v14, %v837_v52  ;;  %v3833_v55 = vpop.f32.mrb[87].mxu0  ;;  %3991 = vmatmul.mubr.msk.f32.gmra.mrb[192].mxu0 %vm176_vm2, %v133_v47  ;;  %vm1498_vm2 = vmand %vm1408_vm15, %vm1458_vm1  ;;  %vm1423_vm15 = vcmp.ge.s32.totalorder %v5262_v10, %v5540_v6  ;;  %vm1473_vm1 = vcmp.lt.s32.totalorder %v5262_v10, %v5542_v37 }
 0x192   :  { %3258 = vmatprep.mubr.msk.f32.mxu1 %vm1498_vm2, %v4543_v26  ;;  %vm1513_vm2 = vmand %vm1423_vm15, %vm1473_vm1  ;;  %v5569_v55 = vpop.f32.mrb[0].mxu1  ;;  %vm1460_vm15 = vcmp.lt.s32.totalorder %v5557_v43, %v5508_v13 }
 0x193   :  { %v1289_v58 = vmax.f32 %v838_v53, 0.0  ;;  %3259 = vmatmul.mubr.msk.f32.gmra.mrb[60].mxu1 %vm1497_vm5, %v4543_v26  ;;  %vm1484_vm5 = vmand %vm1394_vm3, %vm1444_vm4 }
 0x194   :  { %v842_v59 = vpop.f32.mrb[88].mxu0  ;;  %3260 = vmatprep.mubr.msk.f32.mxu1 %vm1506_vm8, %v4543_v26  ;;  %vm1402_vm8 = vcmp.ge.s32.totalorder %v5557_v43, %v5490_v63 }
 0x195   :  { %v5488_v54 = vpack.c.bf16 %v1289_v58, %v1288_v57  ;;  %v3836_v62 = vpop.f32.mrb[89].mxu0  ;;  %v843_v3 = vadd.f32 %v5016_v14, %v842_v59  ;;  %v3995_v58 = vpop.f32.mrb[1].mxu1 }
 0x196   :  { %v1112_v62 = vpop.f32.mrb[2].mxu1 }
 0x197   :  { %v1290_v16 = vmax.f32 %v843_v3, 0.0  ;;  %3261 = vmatmul.mubr.msk.f32.gmra.mrb[62].mxu1 %vm1505_vm11, %v4543_v26  ;;  %v3998_v3 = vpop.f32.mrb[3].mxu1  ;;  %vm1492_vm11 = vmand %vm1402_vm8, %vm1452_vm9 }
 0x198   :  { %v847_v7 = vpop.f32.mrb[90].mxu0  ;;  %3262 = vmatprep.mubr.msk.f32.mxu1 %vm1514_vm14, %v4543_v26  ;;  %vm1410_vm14 = vcmp.ge.s32.totalorder %v5557_v43, %v5506_v5 }
 0x199   :  { %v848_v9 = vadd.f32 %v5016_v14, %v847_v7  ;;  %v3839_v12 = vpop.f32.mrb[91].mxu0  ;;  %vm1500_vm3 = vmand %vm1410_vm14, %vm1460_vm15 }
 0x19a   :  { %v1117_v12 = vpop.f32.mrb[4].mxu1 }
 0x19b   :  { %v1291_v21 = vmax.f32 %v848_v9, 0.0  ;;  %3263 = vmatmul.mubr.msk.f32.gmra.mrb[64].mxu1 %vm1513_vm2, %v4543_v26  ;;  %v5575_v9 = vld [vmem:[%s6226_s2] ss:$0 sm:$0xff] }
 0x19c   :  { %v852_v22 = vpop.f32.mrb[92].mxu0  ;;  %3264 = vmatprep.mubr.msk.f32.mxu1 %vm1484_vm5, %v4543_v26  ;;  %v1118_v15 = vadd.f32 %v5575_v9, %v1117_v12  ;;  %vm1418_vm5 = vcmp.ge.s32.totalorder %v5557_v43, %v5523_v29 }
 0x19d   :  { %v5516_v24 = vpack.c.bf16 %v1291_v21, %v1290_v16  ;;  %v3842_v25 = vpop.f32.mrb[93].mxu0  ;;  %v853_v31 = vadd.f32 %v5016_v14, %v852_v22 }
 0x19e   :  { %v1345_v23 = vmax.f32 %v1118_v15, 0.0 }
 0x19f   :  { %v1292_v28 = vmax.f32 %v853_v31, 0.0 }
 0x1a0   :  { %v857_v32 = vpop.f32.mrb[94].mxu0 }
 0x1a1   :  { %v858_v35 = vadd.f32 %v5016_v14, %v857_v32  ;;  %v3845_v36 = vpop.f32.mrb[95].mxu0 }
 0x1a3   :  { %v1293_v39 = vmax.f32 %v858_v35, 0.0 }
 0x1a4   :  { %v862_v33 = vpop.f32.mrb[96].mxu0 }
 0x1a5   :  { %v5549_v40 = vpack.c.bf16 %v1293_v39, %v1292_v28  ;;  %v3848_v42 = vpop.f32.mrb[97].mxu0  ;;  %v863_v44 = vadd.f32 %v5016_v14, %v862_v33 }
 0x1a7   :  { %v1294_v48 = vmax.f32 %v863_v44, 0.0 }
 0x1a8   :  { %v867_v17 = vpop.f32.mrb[98].mxu0 }
 0x1a9   :  { %v868_v45 = vadd.f32 %v5016_v14, %v867_v17  ;;  %v3851_v46 = vpop.f32.mrb[99].mxu0 }
 0x1ab   :  { %v1295_v49 = vmax.f32 %v868_v45, 0.0 }
 0x1ac   :  { %v872_v50 = vpop.f32.mrb[100].mxu0 }
 0x1ad   :  { %v4252_v47 = vpack.c.bf16 %v1295_v49, %v1294_v48  ;;  %v3854_v51 = vpop.f32.mrb[101].mxu0  ;;  %v873_v52 = vadd.f32 %v5016_v14, %v872_v50 }
 0x1af   :  { %4253 = vmatprep.subr.bf16.mxu1 %v4252_v47  ;;  %v1296_v59 = vmax.f32 %v873_v52, 0.0 }
 0x1b0   :  { %v877_v53 = vpop.f32.mrb[102].mxu0  ;;  %4255 = vmatpush3.bf16.msra.mxu1 %v5412_v60  ;;  %v1113_v60 = vadd.f32 %v5575_v9, %v1112_v62 }
 0x1b1   :  { %v878_v56 = vadd.f32 %v5016_v14, %v877_v53  ;;  %v3857_v57 = vpop.f32.mrb[103].mxu0  ;;  %v4001_v14 = vpop.f32.mrb[5].mxu1 }
 0x1b2   :  { %v1344_v21 = vmax.f32 %v1113_v60, 0.0  ;;  %v1122_v35 = vpop.f32.mrb[6].mxu1 }
 0x1b3   :  { %v1297_v61 = vmax.f32 %v878_v56, 0.0  ;;  %v4004_v28 = vpop.f32.mrb[7].mxu1  ;;  %v1123_v42 = vadd.f32 %v5575_v9, %v1122_v35 }
 0x1b4   :  { %v882_v2 = vpop.f32.mrb[104].mxu0  ;;  %v5582_v31 = vpack.c.bf16 %v1345_v23, %v1344_v21  ;;  %v1127_v44 = vpop.f32.mrb[8].mxu1 }
 0x1b5   :  { %v4256_v7 = vpack.c.bf16 %v1297_v61, %v1296_v59  ;;  %v3860_v8 = vpop.f32.mrb[105].mxu0  ;;  %v883_v16 = vadd.f32 %v5575_v9, %v882_v2  ;;  %v1128_v17 = vadd.f32 %v5575_v9, %v1127_v44  ;;  %v4007_v45 = vpop.f32.mrb[9].mxu1  ;;  %v1346_v46 = vmax.f32 %v1123_v42, 0.0 }
 0x1b6   :  { %v1132_v56 = vpop.f32.mrb[10].mxu1 }
 0x1b7   :  { %4257 = vmatprep.subr.bf16.mxu1 %v4256_v7  ;;  %v1298_v32 = vmax.f32 %v883_v16, 0.0  ;;  %v1347_v49 = vmax.f32 %v1128_v17, 0.0  ;;  %v4010_v58 = vpop.f32.mrb[11].mxu1  ;;  %v1133_v62 = vadd.f32 %v5575_v9, %v1132_v56 }
 0x1b8   :  { %v887_v22 = vpop.f32.mrb[106].mxu0  ;;  %4259 = vmatpush3.bf16.msra.mxu1 %v5428_v11  ;;  %v1137_v2 = vpop.f32.mrb[12].mxu1 }
 0x1b9   :  { %v888_v25 = vadd.f32 %v5575_v9, %v887_v22  ;;  %v3863_v30 = vpop.f32.mrb[107].mxu0  ;;  %v5589_v51 = vpack.c.bf16 %v1347_v49, %v1346_v46  ;;  %v1138_v3 = vadd.f32 %v5575_v9, %v1137_v2  ;;  %v4013_v7 = vpop.f32.mrb[13].mxu1  ;;  %v1348_v8 = vmax.f32 %v1133_v62, 0.0 }
 0x1ba   :  { %v1142_v23 = vpop.f32.mrb[14].mxu1 }
 0x1bb   :  { %v1299_v34 = vmax.f32 %v888_v25, 0.0  ;;  %v1349_v12 = vmax.f32 %v1138_v3, 0.0  ;;  %v4016_v30 = vpop.f32.mrb[15].mxu1  ;;  %v1143_v35 = vadd.f32 %v5575_v9, %v1142_v23 }
 0x1bc   :  { %v892_v36 = vpop.f32.mrb[108].mxu0 }
 0x1bd   :  { %v4260_v39 = vpack.c.bf16 %v1299_v34, %v1298_v32  ;;  %v3866_v33 = vpop.f32.mrb[109].mxu0  ;;  %v893_v11 = vadd.f32 %v5575_v9, %v892_v36  ;;  %v5596_v16 = vpack.c.bf16 %v1349_v12, %v1348_v8  ;;  %v1147_v36 = vpop.f32.mrb[16].mxu1 }
 0x1be   :  { %v1148_v28 = vadd.f32 %v5575_v9, %v1147_v36  ;;  %v1350_v33 = vmax.f32 %v1143_v35, 0.0 }
 0x1bf   :  { %4261 = vmatprep.subr.bf16.mxu1 %v4260_v39  ;;  %v1300_v52 = vmax.f32 %v893_v11, 0.0  ;;  %v4019_v39 = vpop.f32.mrb[17].mxu1 }
 0x1c0   :  { %v897_v48 = vpop.f32.mrb[110].mxu0  ;;  %4263 = vmatpush3.bf16.msra.mxu1 %v5444_v27  ;;  %v1351_v44 = vmax.f32 %v1148_v28, 0.0  ;;  %v1152_v49 = vpop.f32.mrb[18].mxu1 }
 0x1c1   :  { %v898_v50 = vadd.f32 %v5575_v9, %v897_v48  ;;  %v3869_v47 = vpop.f32.mrb[111].mxu0  ;;  %v1153_v56 = vadd.f32 %v5575_v9, %v1152_v49 }
 0x1c2   :  { %v5603_v11 = vpack.c.bf16 %v1351_v44, %v1350_v33  ;;  %v4022_v47 = vpop.f32.mrb[19].mxu1 }
 0x1c3   :  { %v1301_v53 = vmax.f32 %v898_v50, 0.0 }
 0x1c4   :  { %v902_v57 = vpop.f32.mrb[112].mxu0 }
 0x1c5   :  { %v4264_v59 = vpack.c.bf16 %v1301_v53, %v1300_v52  ;;  %v3872_v61 = vpop.f32.mrb[113].mxu0  ;;  %v903_v27 = vadd.f32 %v5575_v9, %v902_v57  ;;  %v1157_v57 = vpop.f32.mrb[20].mxu1 }
 0x1c6   :  { %v1158_v58 = vadd.f32 %v5575_v9, %v1157_v57  ;;  %v1352_v61 = vmax.f32 %v1153_v56, 0.0 }
 0x1c7   :  { %4265 = vmatprep.subr.bf16.mxu1 %v4264_v59  ;;  %v1302_v21 = vmax.f32 %v903_v27, 0.0  ;;  %v4025_v59 = vpop.f32.mrb[21].mxu1 }
 0x1c8   :  { %v907_v60 = vpop.f32.mrb[114].mxu0  ;;  %4267 = vmatpush3.bf16.msra.mxu1 %v5460_v38  ;;  %v1353_v2 = vmax.f32 %v1158_v58, 0.0  ;;  %v1162_v12 = vpop.f32.mrb[22].mxu1 }
 0x1c9   :  { %v908_v15 = vadd.f32 %v5575_v9, %v907_v60  ;;  %v3875_v14 = vpop.f32.mrb[115].mxu0  ;;  %v1163_v23 = vadd.f32 %v5575_v9, %v1162_v12 }
 0x1ca   :  { %v5610_v27 = vpack.c.bf16 %v1353_v2, %v1352_v61  ;;  %v4028_v14 = vpop.f32.mrb[23].mxu1 }
 0x1cb   :  { %v1303_v22 = vmax.f32 %v908_v15, 0.0 }
 0x1cc   :  { %v912_v25 = vpop.f32.mrb[116].mxu0 }
 0x1cd   :  { %v4268_v32 = vpack.c.bf16 %v1303_v22, %v1302_v21  ;;  %v3878_v34 = vpop.f32.mrb[117].mxu0  ;;  %v913_v38 = vadd.f32 %v5575_v9, %v912_v25  ;;  %v1167_v25 = vpop.f32.mrb[24].mxu1 }
 0x1ce   :  { %v1168_v30 = vadd.f32 %v5575_v9, %v1167_v25  ;;  %v1354_v34 = vmax.f32 %v1163_v23, 0.0 }
 0x1cf   :  { %4269 = vmatprep.subr.bf16.mxu1 %v4268_v32  ;;  %v1304_v46 = vmax.f32 %v913_v38, 0.0  ;;  %v4031_v32 = vpop.f32.mrb[25].mxu1  ;;  %v5618_v38 = vadd.s32 256, %v5262_v10 }
 0x1d0   :  { %v917_v42 = vpop.f32.mrb[118].mxu0  ;;  %4271 = vmatpush3.bf16.msra.mxu1 %v5476_v41  ;;  %v1355_v36 = vmax.f32 %v1168_v30, 0.0 }
 0x1d1   :  { %v918_v17 = vadd.f32 %v5575_v9, %v917_v42  ;;  %v3881_v45 = vpop.f32.mrb[119].mxu0  ;;  %vm1393_vm6 = vcmp.ge.s32.totalorder %v5618_v38, %v5277_v18  ;;  %vm1443_vm7 = vcmp.lt.s32.totalorder %v5618_v38, %v5279_v20  ;;  %vm1401_vm12 = vcmp.ge.s32.totalorder %v5618_v38, %v5490_v63 }
 0x1d2   :  { %v5620_v33 = vpack.c.bf16 %v1355_v36, %v1354_v34  ;;  %vm1483_vm10 = vmand %vm1393_vm6, %vm1443_vm7  ;;  %vm1451_vm13 = vcmp.lt.s32.totalorder %v5618_v38, %v5492_v1  ;;  %vm1409_vm2 = vcmp.ge.s32.totalorder %v5618_v38, %v5506_v5  ;;  %vm1459_vm4 = vcmp.lt.s32.totalorder %v5618_v38, %v5508_v13 }
 0x1d3   :  { %v1305_v48 = vmax.f32 %v918_v17, 0.0  ;;  %v1172_v17 = vpop.f32.mrb[26].mxu1  ;;  %vm1491_vm1 = vmand %vm1401_vm12, %vm1451_vm13  ;;  %vm1468_vm6 = vcmp.lt.s32.totalorder %v5557_v43, %v5525_v19  ;;  %vm1417_vm8 = vcmp.ge.s32.totalorder %v5618_v38, %v5523_v29  ;;  %vm1476_vm12 = vcmp.lt.s32.totalorder %v5557_v43, %v5542_v37 }
 0x1d4   :  { %v922_v50 = vpop.f32.mrb[120].mxu0  ;;  %vm1499_vm7 = vmand %vm1409_vm2, %vm1459_vm4  ;;  %vm1425_vm14 = vcmp.ge.s32.totalorder %v5618_v38, %v5540_v6 }
 0x1d5   :  { %v4272_v52 = vpack.c.bf16 %v1305_v48, %v1304_v46  ;;  %v3884_v53 = vpop.f32.mrb[121].mxu0  ;;  %v923_v41 = vadd.f32 %v5575_v9, %v922_v50  ;;  %v4034_v46 = vpop.f32.mrb[27].mxu1  ;;  %vm1508_vm9 = vmand %vm1418_vm5, %vm1468_vm6 }
 0x1d6   :  { %v1177_v50 = vpop.f32.mrb[28].mxu1 }
 0x1d7   :  { %4273 = vmatprep.subr.bf16.mxu1 %v4272_v52  ;;  %v1306_v8 = vmax.f32 %v923_v41, 0.0  ;;  %v1178_v47 = vadd.f32 %v5575_v9, %v1177_v50  ;;  %v4037_v52 = vpop.f32.mrb[29].mxu1 }
 0x1d8   :  { %v927_v62 = vpop.f32.mrb[122].mxu0  ;;  %4275 = vmatpush3.bf16.msra.mxu1 %v5488_v54  ;;  %v1182_v61 = vpop.f32.mrb[30].mxu1 }
 0x1d9   :  { %v928_v3 = vadd.f32 %v5575_v9, %v927_v62  ;;  %v3887_v7 = vpop.f32.mrb[123].mxu0  ;;  %v1357_v58 = vmax.f32 %v1178_v47, 0.0  ;;  %v1183_v62 = vadd.f32 %v5575_v9, %v1182_v61  ;;  %v4040_v2 = vpop.f32.mrb[31].mxu1 }
 0x1db   :  { %v1307_v60 = vmax.f32 %v928_v3, 0.0  ;;  %v1358_v14 = vmax.f32 %v1183_v62, 0.0 }
 0x1dc   :  { %v932_v15 = vpop.f32.mrb[124].mxu0 }
 0x1dd   :  { %v4276_v21 = vpack.c.bf16 %v1307_v60, %v1306_v8  ;;  %v3890_v22 = vpop.f32.mrb[125].mxu0  ;;  %v933_v54 = vadd.f32 %v5575_v9, %v932_v15  ;;  %v1187_v60 = vpop.f32.mrb[32].mxu1 }
 0x1de   :  { %v4043_v22 = vpop.f32.mrb[33].mxu1 }
 0x1df   :  { %4277 = vmatprep.subr.bf16.mxu1 %v4276_v21  ;;  %v1308_v42 = vmax.f32 %v933_v54, 0.0  ;;  %v1188_v21 = vadd.f32 %v5575_v9, %v1187_v60  ;;  %v1192_v32 = vpop.f32.mrb[34].mxu1 }
 0x1e0   :  { %v937_v35 = vpop.f32.mrb[126].mxu0  ;;  %4279 = vmatpush3.bf16.msra.mxu1 %v5516_v24  ;;  %v1173_v24 = vadd.f32 %v5575_v9, %v1172_v17  ;;  %v1193_v36 = vadd.f32 %v5575_v9, %v1192_v32 }
 0x1e1   :  { %v938_v28 = vadd.f32 %v5575_v9, %v937_v35  ;;  %v3893_v39 = vpop.f32.mrb[127].mxu0  ;;  %v1359_v25 = vmax.f32 %v1188_v21, 0.0 }
 0x1e2   :  { %v1356_v56 = vmax.f32 %v1173_v24, 0.0  ;;  %v5681_v39 = vadd.s32 640, %v5262_v10 }
 0x1e3   :  { %v1309_v44 = vmax.f32 %v938_v28, 0.0  ;;  %v5673_v35 = vpack.c.bf16 %v1359_v25, %v1358_v14  ;;  %v4046_v28 = vpop.f32.mrb[35].mxu1 }
 0x1e4   :  { %v942_v45 = vpop.f32.mrb[128].mxu0  ;;  %vm1396_vm2 = vcmp.ge.s32.totalorder %v5681_v39, %v5277_v18 }
 0x1e5   :  { %v4280_v48 = vpack.c.bf16 %v1309_v44, %v1308_v42  ;;  %v3896_v49 = vpop.f32.mrb[129].mxu0  ;;  %v943_v53 = vadd.f32 %v5575_v9, %v942_v45  ;;  %v1197_v45 = vpop.f32.mrb[36].mxu1 }
 0x1e6   :  { %v1198_v49 = vadd.f32 %v5575_v9, %v1197_v45  ;;  %v4049_v24 = vpop.f32.mrb[37].mxu1 }
 0x1e7   :  { %4281 = vmatprep.subr.bf16.mxu1 %v4280_v48  ;;  %v1310_v3 = vmax.f32 %v943_v53, 0.0  ;;  %v1360_v48 = vmax.f32 %v1193_v36, 0.0  ;;  %v1202_v53 = vpop.f32.mrb[38].mxu1 }
 0x1e8   :  { %v947_v57 = vpop.f32.mrb[130].mxu0  ;;  %4283 = vmatpush3.bf16.msra.mxu1 %v5549_v40  ;;  %v5643_v40 = vpack.c.bf16 %v1357_v58, %v1356_v56  ;;  %v1361_v47 = vmax.f32 %v1198_v49, 0.0 }
 0x1e9   :  { %v948_v59 = vadd.f32 %v5575_v9, %v947_v57  ;;  %v3899_v41 = vpop.f32.mrb[131].mxu0 }
 0x1ea   :  { %v5706_v58 = vpack.c.bf16 %v1361_v47, %v1360_v48  ;;  %v4052_v41 = vpop.f32.mrb[39].mxu1 }
 0x1eb   :  { %v1311_v7 = vmax.f32 %v948_v59, 0.0  ;;  %3265 = vmatmul.mubr.msk.f32.vlgmr.msra.gmra.mrb[66].mxu1 %vm1483_vm10, %v4543_v26  ;;  %vm1467_vm10 = vcmp.lt.s32.totalorder %v5618_v38, %v5525_v19  ;;  %v1203_v59 = vadd.f32 %v5575_v9, %v1202_v53 }
 0x1ec   :  { %v952_v8 = vpop.f32.mrb[132].mxu0  ;;  %3266 = vmatprep.mubr.msk.f32.mxu1 %vm1492_vm11, %v4543_v26  ;;  %vm1426_vm11 = vcmp.ge.s32.totalorder %v5557_v43, %v5540_v6  ;;  %vm1507_vm13 = vmand %vm1417_vm8, %vm1467_vm10  ;;  %vm1404_vm8 = vcmp.ge.s32.totalorder %v5681_v39, %v5490_v63 }
 0x1ed   :  { %v5650_v12 = vpack.c.bf16 %v1311_v7, %v1310_v3  ;;  %v3902_v15 = vpop.f32.mrb[133].mxu0  ;;  %v953_v23 = vadd.f32 %v5575_v9, %v952_v8  ;;  %vm1516_vm15 = vmand %vm1426_vm11, %vm1476_vm12  ;;  %v1207_v3 = vpop.f32.mrb[40].mxu1  ;;  %v1362_v8 = vmax.f32 %v1203_v59, 0.0 }
 0x1ee   :  { %v1208_v60 = vadd.f32 %v5575_v9, %v1207_v3  ;;  %v4055_v15 = vpop.f32.mrb[41].mxu1 }
 0x1ef   :  { %3267 = vmatmul.mubr.msk.f32.gmra.mrb[68].mxu1 %vm1491_vm1, %v4543_v26  ;;  %v1312_v42 = vmax.f32 %v953_v23, 0.0  ;;  %vm1475_vm1 = vcmp.lt.s32.totalorder %v5618_v38, %v5542_v37  ;;  %v1212_v23 = vpop.f32.mrb[42].mxu1 }
 0x1f0   :  { %v957_v30 = vpop.f32.mrb[134].mxu0  ;;  %3268 = vmatprep.mubr.msk.f32.mxu1 %vm1500_vm3, %v4543_v26  ;;  %vm1446_vm3 = vcmp.lt.s32.totalorder %v5681_v39, %v5279_v20  ;;  %vm1515_vm4 = vmand %vm1425_vm14, %vm1475_vm1  ;;  %v1363_v21 = vmax.f32 %v1208_v60, 0.0  ;;  %vm1412_vm14 = vcmp.ge.s32.totalorder %v5681_v39, %v5506_v5 }
 0x1f1   :  { %v958_v54 = vadd.f32 %v5575_v9, %v957_v30  ;;  %v3905_v34 = vpop.f32.mrb[135].mxu0  ;;  %vm1486_vm5 = vmand %vm1396_vm2, %vm1446_vm3 }
 0x1f2   :  { %v5716_v32 = vpack.c.bf16 %v1363_v21, %v1362_v8  ;;  %v4058_v34 = vpop.f32.mrb[43].mxu1 }
 0x1f3   :  { %v1313_v44 = vmax.f32 %v958_v54, 0.0  ;;  %3269 = vmatmul.mubr.msk.f32.gmra.mrb[70].mxu1 %vm1499_vm7, %v4543_v26  ;;  %v1213_v54 = vadd.f32 %v5575_v9, %v1212_v23 }
 0x1f4   :  { %v962_v17 = vpop.f32.mrb[136].mxu0  ;;  %3270 = vmatprep.mubr.msk.f32.mxu1 %vm1508_vm9, %v4543_v26  ;;  %vm1454_vm9 = vcmp.lt.s32.totalorder %v5681_v39, %v5492_v1 }
 0x1f5   :  { %v5690_v46 = vpack.c.bf16 %v1313_v44, %v1312_v42  ;;  %v3908_v43 = vpop.f32.mrb[137].mxu0  ;;  %v963_v50 = vadd.f32 %v5575_v9, %v962_v17  ;;  %v1217_v44 = vpop.f32.mrb[44].mxu1  ;;  %vm1494_vm11 = vmand %vm1404_vm8, %vm1454_vm9 }
 0x1f6   :  { %v1364_v43 = vmax.f32 %v1213_v54, 0.0  ;;  %v1218_v48 = vadd.f32 %v5575_v9, %v1217_v44  ;;  %v4061_v49 = vpop.f32.mrb[45].mxu1 }
 0x1f7   :  { %3271 = vmatmul.mubr.msk.f32.gmra.mrb[72].mxu1 %vm1507_vm13, %v4543_v26  ;;  %v1314_v61 = vmax.f32 %v963_v50, 0.0 }
 0x1f8   :  { %v967_v52 = vpop.f32.mrb[138].mxu0  ;;  %3272 = vmatprep.mubr.msk.f32.mxu1 %vm1516_vm15, %v4543_v26  ;;  %v1365_v50 = vmax.f32 %v1218_v48, 0.0  ;;  %vm1462_vm15 = vcmp.lt.s32.totalorder %v5681_v39, %v5508_v13 }
 0x1f9   :  { %v968_v56 = vadd.f32 %v5575_v9, %v967_v52  ;;  %v3911_v57 = vpop.f32.mrb[139].mxu0  ;;  %v1222_v52 = vpop.f32.mrb[46].mxu1  ;;  %vm1502_vm2 = vmand %vm1412_vm14, %vm1462_vm15 }
 0x1fa   :  { %v5724_v57 = vpack.c.bf16 %v1365_v50, %v1364_v43  ;;  %v1223_v59 = vadd.f32 %v5575_v9, %v1222_v52  ;;  %v4064_v41 = vpop.f32.mrb[47].mxu1 }
 0x1fb   :  { %v1315_v62 = vmax.f32 %v968_v56, 0.0  ;;  %3273 = vmatmul.mubr.msk.f32.gmra.mrb[74].mxu1 %vm1515_vm4, %v4543_v26  ;;  %v1227_v3 = vpop.f32.mrb[48].mxu1 }
 0x1fc   :  { %v972_v2 = vpop.f32.mrb[140].mxu0  ;;  %3274 = vmatprep.mubr.msk.f32.mxu1 %vm1486_vm5, %v4543_v26  ;;  %v1366_v60 = vmax.f32 %v1223_v59, 0.0  ;;  %v1228_v15 = vadd.f32 %v5575_v9, %v1227_v3  ;;  %vm1420_vm5 = vcmp.ge.s32.totalorder %v5681_v39, %v5523_v29 }
 0x1fd   :  { %v5711_v38 = vpack.c.bf16 %v1315_v62, %v1314_v61  ;;  %v3914_v7 = vpop.f32.mrb[141].mxu0  ;;  %v973_v14 = vadd.f32 %v5575_v9, %v972_v2 }
 0x1ff   :  { %v1316_v36 = vmax.f32 %v973_v14, 0.0  ;;  %v4067_v14 = vpop.f32.mrb[49].mxu1 }
 0x200   :  { %v977_v22 = vpop.f32.mrb[142].mxu0 }
 0x201   :  { %v978_v25 = vadd.f32 %v5575_v9, %v977_v22  ;;  %v3917_v30 = vpop.f32.mrb[143].mxu0  ;;  %v1367_v22 = vmax.f32 %v1228_v15, 0.0 }
 0x203   :  { %v1317_v28 = vmax.f32 %v978_v25, 0.0  ;;  %v1232_v25 = vpop.f32.mrb[50].mxu1  ;;  %v5732_v34 = vpack.c.bf16 %v1367_v22, %v1366_v60 }
 0x204   :  { %v982_v42 = vpop.f32.mrb[144].mxu0 }
 0x205   :  { %v5719_v17 = vpack.c.bf16 %v1317_v28, %v1316_v36  ;;  %v3920_v45 = vpop.f32.mrb[145].mxu0  ;;  %v983_v24 = vadd.f32 %v5575_v9, %v982_v42  ;;  %v1233_v36 = vadd.f32 %v5575_v9, %v1232_v25  ;;  %v4070_v28 = vpop.f32.mrb[51].mxu1 }
 0x206   :  { %v1237_v43 = vpop.f32.mrb[52].mxu1 }
 0x207   :  { %v1318_v61 = vmax.f32 %v983_v24, 0.0  ;;  %v1368_v24 = vmax.f32 %v1233_v36, 0.0  ;;  %v1238_v50 = vadd.f32 %v5575_v9, %v1237_v43 }
 0x208   :  { %v987_v47 = vpop.f32.mrb[146].mxu0 }
 0x209   :  { %v988_v53 = vadd.f32 %v5575_v9, %v987_v47  ;;  %v3923_v56 = vpop.f32.mrb[147].mxu0  ;;  %v4073_v47 = vpop.f32.mrb[53].mxu1 }
 0x20b   :  { %v1319_v62 = vmax.f32 %v988_v53, 0.0  ;;  %v1369_v53 = vmax.f32 %v1238_v50, 0.0 }
 0x20c   :  { %v992_v2 = vpop.f32.mrb[148].mxu0 }
 0x20d   :  { %v5727_v7 = vpack.c.bf16 %v1319_v62, %v1318_v61  ;;  %v3926_v8 = vpop.f32.mrb[149].mxu0  ;;  %v993_v21 = vadd.f32 %v5575_v9, %v992_v2  ;;  %v5740_v61 = vpack.c.bf16 %v1369_v53, %v1368_v24 }
 0x20e   :  { %v5742_v8 = vpop.f32.mrb[54].mxu1 }
 0x20f   :  { %v1320_v42 = vmax.f32 %v993_v21, 0.0  ;;  %v4076_v14 = vpop.f32.mrb[55].mxu1 }
 0x210   :  { %v997_v23 = vpop.f32.mrb[150].mxu0 }
 0x211   :  { %v998_v30 = vadd.f32 %v5575_v9, %v997_v23  ;;  %v3929_v54 = vpop.f32.mrb[151].mxu0 }
 0x213   :  { %v1321_v44 = vmax.f32 %v998_v30, 0.0 }
 0x214   :  { %v1002_v45 = vpop.f32.mrb[152].mxu0 }
 0x215   :  { %v5735_v48 = vpack.c.bf16 %v1321_v44, %v1320_v42  ;;  %v3932_v49 = vpop.f32.mrb[153].mxu0  ;;  %v1003_v52 = vadd.f32 %v5575_v9, %v1002_v45 }
 0x217   :  { %v1322_v62 = vmax.f32 %v1003_v52, 0.0 }
 0x218   :  { %v1007_v56 = vpop.f32.mrb[154].mxu0 }
 0x219   :  { %v1008_v59 = vadd.f32 %v5575_v9, %v1007_v56  ;;  %v3935_v41 = vpop.f32.mrb[155].mxu0 }
 0x21b   :  { %v1323_v2 = vmax.f32 %v1008_v59, 0.0 }
 0x21c   :  { %v1012_v3 = vpop.f32.mrb[156].mxu0 }
 0x21d   :  { %v5744_v60 = vpack.c.bf16 %v1323_v2, %v1322_v62  ;;  %v3938_v15 = vpop.f32.mrb[157].mxu0  ;;  %v1013_v21 = vadd.f32 %v5575_v9, %v1012_v3 }
 0x21f   :  { %v1324_v30 = vmax.f32 %v1013_v21, 0.0 }
 0x220   :  { %v1017_v22 = vpop.f32.mrb[158].mxu0 }
 0x221   :  { %v1018_v23 = vadd.f32 %v5575_v9, %v1017_v22  ;;  %v3941_v25 = vpop.f32.mrb[159].mxu0 }
 0x223   :  { %v1325_v54 = vmax.f32 %v1018_v23, 0.0 }
 0x224   :  { %v1022_v36 = vpop.f32.mrb[160].mxu0 }
 0x225   :  { %v5748_v28 = vpack.c.bf16 %v1325_v54, %v1324_v30  ;;  %v3944_v42 = vpop.f32.mrb[161].mxu0  ;;  %v1023_v44 = vadd.f32 %v5575_v9, %v1022_v36 }
 0x227   :  { %v1326_v24 = vmax.f32 %v1023_v44, 0.0 }
 0x228   :  { %v1027_v45 = vpop.f32.mrb[162].mxu0 }
 0x229   :  { %v1028_v43 = vadd.f32 %v5575_v9, %v1027_v45  ;;  %v3947_v49 = vpop.f32.mrb[163].mxu0 }
 0x22b   :  { %v1327_v50 = vmax.f32 %v1028_v43, 0.0 }
 0x22c   :  { %v1032_v47 = vpop.f32.mrb[164].mxu0 }
 0x22d   :  { %v4284_v52 = vpack.c.bf16 %v1327_v50, %v1326_v24  ;;  %v3950_v53 = vpop.f32.mrb[165].mxu0  ;;  %v1033_v56 = vadd.f32 %v5575_v9, %v1032_v47 }
 0x22f   :  { %4285 = vmatprep.subr.bf16.mxu1 %v4284_v52  ;;  %v1328_v2 = vmax.f32 %v1033_v56, 0.0 }
 0x230   :  { %v1037_v59 = vpop.f32.mrb[166].mxu0  ;;  %4287 = vmatpush3.bf16.msra.mxu1 %v5650_v12 }
 0x231   :  { %v1038_v41 = vadd.f32 %v5575_v9, %v1037_v59  ;;  %v3953_v62 = vpop.f32.mrb[167].mxu0 }
 0x233   :  { %v1329_v3 = vmax.f32 %v1038_v41, 0.0 }
 0x234   :  { %v1042_v15 = vpop.f32.mrb[168].mxu0 }
 0x235   :  { %v4288_v14 = vpack.c.bf16 %v1329_v3, %v1328_v2  ;;  %v3956_v21 = vpop.f32.mrb[169].mxu0  ;;  %v1043_v22 = vadd.f32 %v5575_v9, %v1042_v15 }
 0x237   :  { %4289 = vmatprep.subr.bf16.mxu1 %v4288_v14  ;;  %v1330_v54 = vmax.f32 %v1043_v22, 0.0 }
 0x238   :  { %v1047_v23 = vpop.f32.mrb[170].mxu0  ;;  %4291 = vmatpush3.bf16.msra.mxu1 %v5690_v46 }
 0x239   :  { %v1048_v25 = vadd.f32 %v5575_v9, %v1047_v23  ;;  %v3959_v30 = vpop.f32.mrb[171].mxu0 }
 0x23b   :  { %v1331_v36 = vmax.f32 %v1048_v25, 0.0 }
 0x23c   :  { %v1052_v12 = vpop.f32.mrb[172].mxu0 }
 0x23d   :  { %v4292_v42 = vpack.c.bf16 %v1331_v36, %v1330_v54  ;;  %v3962_v44 = vpop.f32.mrb[173].mxu0  ;;  %v1053_v43 = vadd.f32 %v5575_v9, %v1052_v12 }
 0x23e   :  { %v3486_v45 = vpop.f32.mrb[56].mxu1 }
 0x23f   :  { %4293 = vmatprep.subr.bf16.mxu1 %v4292_v42  ;;  %v3487_v49 = vpop.f32.mrb[57].mxu1  ;;  %v1332_v52 = vmax.f32 %v1053_v43, 0.0 }
 0x240   :  { %v1057_v24 = vpop.f32.mrb[174].mxu0  ;;  %4295 = vmatpush3.bf16.msra.mxu1 %v5711_v38  ;;  %v5760_v50 = vadd.f32 %v3487_v49, %v3486_v45 }
 0x241   :  { %v1058_v46 = vadd.f32 %v5575_v9, %v1057_v24  ;;  %v3965_v47 = vpop.f32.mrb[175].mxu0 }
 0x243   :  { %v1333_v53 = vmax.f32 %v1058_v46, 0.0 }
 0x244   :  { %v1062_v56 = vpop.f32.mrb[176].mxu0 }
 0x245   :  { %v4296_v59 = vpack.c.bf16 %v1333_v53, %v1332_v52  ;;  %v3968_v41 = vpop.f32.mrb[177].mxu0  ;;  %v1063_v62 = vadd.f32 %v5575_v9, %v1062_v56 }
 0x247   :  { %4297 = vmatprep.subr.bf16.mxu1 %v4296_v59  ;;  %v1334_v38 = vmax.f32 %v1063_v62, 0.0 }
 0x248   :  { %v1067_v2 = vpop.f32.mrb[178].mxu0  ;;  %4299 = vmatpush3.bf16.msra.mxu1 %v5719_v17 }
 0x249   :  { %v1068_v3 = vadd.f32 %v5575_v9, %v1067_v2  ;;  %v3971_v15 = vpop.f32.mrb[179].mxu0 }
 0x24b   :  { %v1335_v14 = vmax.f32 %v1068_v3, 0.0  ;;  %v5776_v3 = vadd.s32 512, %v5262_v10 }
 0x24c   :  { %v1072_v21 = vpop.f32.mrb[180].mxu0 }
 0x24d   :  { %v4300_v22 = vpack.c.bf16 %v1335_v14, %v1334_v38  ;;  %v3974_v23 = vpop.f32.mrb[181].mxu0  ;;  %v1073_v25 = vadd.f32 %v5575_v9, %v1072_v21  ;;  %vm1395_vm6 = vcmp.ge.s32.totalorder %v5776_v3, %v5277_v18  ;;  %vm1445_vm7 = vcmp.lt.s32.totalorder %v5776_v3, %v5279_v20 }
 0x24e   :  { %vm1485_vm10 = vmand %vm1395_vm6, %vm1445_vm7  ;;  %vm1403_vm12 = vcmp.ge.s32.totalorder %v5776_v3, %v5490_v63  ;;  %vm1453_vm13 = vcmp.lt.s32.totalorder %v5776_v3, %v5492_v1  ;;  %vm1411_vm3 = vcmp.ge.s32.totalorder %v5776_v3, %v5506_v5  ;;  %vm1461_vm4 = vcmp.lt.s32.totalorder %v5776_v3, %v5508_v13 }
 0x24f   :  { %4301 = vmatprep.subr.bf16.mxu1 %v4300_v22  ;;  %v1336_v12 = vmax.f32 %v1073_v25, 0.0  ;;  %vm1493_vm1 = vmand %vm1403_vm12, %vm1453_vm13  ;;  %vm1470_vm6 = vcmp.lt.s32.totalorder %v5681_v39, %v5525_v19  ;;  %vm1419_vm9 = vcmp.ge.s32.totalorder %v5776_v3, %v5523_v29  ;;  %vm1478_vm12 = vcmp.lt.s32.totalorder %v5681_v39, %v5542_v37 }
 0x250   :  { %v1077_v30 = vpop.f32.mrb[182].mxu0  ;;  %4303 = vmatpush3.bf16.msra.mxu1 %v5727_v7  ;;  %vm1501_vm7 = vmand %vm1411_vm3, %vm1461_vm4  ;;  %vm1477_vm3 = vcmp.lt.s32.totalorder %v5776_v3, %v5542_v37 }
 0x251   :  { %v1078_v54 = vadd.f32 %v5575_v9, %v1077_v30  ;;  %v3977_v36 = vpop.f32.mrb[183].mxu0  ;;  %v5812_v30 = vadd.s32 896, %v5262_v10  ;;  %vm1510_vm8 = vmand %vm1420_vm5, %vm1470_vm6  ;;  %vm1561_vm6 = vcmask 850944  }
 0x253   :  { %v1337_v42 = vmax.f32 %v1078_v54, 0.0  ;;  %vm1398_vm13 = vcmp.ge.s32.totalorder %v5812_v30, %v5277_v18  ;;  %vm1448_vm14 = vcmp.lt.s32.totalorder %v5812_v30, %v5279_v20 }
 0x254   :  { %v1082_v17 = vpop.f32.mrb[184].mxu0  ;;  %vm1488_vm4 = vmand %vm1398_vm13, %vm1448_vm14  ;;  %vm1464_vm13 = vcmp.lt.s32.totalorder %v5812_v30, %v5508_v13 }
 0x255   :  { %v4304_v44 = vpack.c.bf16 %v1337_v42, %v1336_v12  ;;  %v3980_v45 = vpop.f32.mrb[185].mxu0  ;;  %v1083_v43 = vadd.f32 %v5575_v9, %v1082_v17 }
 0x257   :  { %4305 = vmatprep.subr.bf16.mxu1 %v4304_v44  ;;  %v1338_v47 = vmax.f32 %v1083_v43, 0.0  ;;  %v1528_v44 = vsel %vm1488_vm4, 0.04, %v4542_v4  ;;  %vm1472_vm4 = vcmp.lt.s32.totalorder %v5812_v30, %v5525_v19 }
 0x258   :  { %v1087_v49 = vpop.f32.mrb[186].mxu0  ;;  %4307 = vmatpush3.bf16.msra.mxu1 %v5735_v48  ;;  %v1108_v48 = vadd.f32 %v5575_v9, %v5569_v55 }
 0x259   :  { %v1088_v24 = vadd.f32 %v5575_v9, %v1087_v49  ;;  %v3983_v46 = vpop.f32.mrb[187].mxu0 }
 0x25a   :  { %v1343_v55 = vmax.f32 %v1108_v48, 0.0  ;;  %v1938_v46 = vld [vmem:[%s6227_s3 + $0x8] sm:$0xff] }
 0x25b   :  { %v1339_v52 = vmax.f32 %v1088_v24, 0.0 }
 0x25c   :  { %v1092_v7 = vpop.f32.mrb[188].mxu0 }
 0x25d   :  { %v4308_v53 = vpack.c.bf16 %v1339_v52, %v1338_v47  ;;  %v3986_v56 = vpop.f32.mrb[189].mxu0  ;;  %v1093_v59 = vadd.f32 %v5575_v9, %v1092_v7  ;;  %v1939_v47 = vld [vmem:[%s6227_s3 + $0x10] sm:$0xff] }
 0x25f   :  { %4309 = vmatprep.subr.bf16.mxu1 %v4308_v53  ;;  %v1340_v15 = vmax.f32 %v1093_v59, 0.0  ;;  %v1940_v53 = vld [vmem:[%s6227_s3 + $0x18] sm:$0xff] }
 0x260   :  { %v1097_v41 = vpop.f32.mrb[190].mxu0  ;;  %4311 = vmatpush3.bf16.msra.mxu1 %v5744_v60  ;;  %v4362_v56 = vpack.c.bf16 %v1940_v53, %v1939_v47 }
 0x261   :  { %v1098_v62 = vadd.f32 %v5575_v9, %v1097_v41  ;;  %v3989_v2 = vpop.f32.mrb[191].mxu0 }
 0x263   :  { %v1341_v38 = vmax.f32 %v1098_v62, 0.0 }
 0x264   :  { %v1102_v14 = vpop.f32.mrb[192].mxu0 }
 0x265   :  { %v4312_v21 = vpack.c.bf16 %v1341_v38, %v1340_v15  ;;  %v1103_v22 = vadd.f32 %v5575_v9, %v1102_v14  ;;  %v3992_v23 = vpop.f32.mrb[193].mxu0 }
 0x267   :  { %v1342_v60 = vmax.f32 %v1103_v22, 0.0  ;;  %4313 = vmatprep.subr.bf16.mxu1 %v4312_v21 }
 0x268   :  { %4315 = vmatpush3.bf16.msra.mxu1 %v5748_v28  ;;  %v3489_v28 = vpop.f32.mrb[58].mxu1 }
 0x269   :  { %v4317_v25 = vpack.c.bf16 %v1343_v55, %v1342_v60  ;;  %4316 = vmatprep.subr.bf16.mxu1 %v4540_v0  ;;  %v3490_v54 = vpop.f32.mrb[59].mxu1 }
 0x26a   :  { %v5816_v36 = vadd.f32 %v3490_v54, %v3489_v28 }
 0x26b   :  { %3275 = vmatmul.mubr.msk.f32.vlgmr.msra.gmra.mrb[76].mxu1 %vm1485_vm10, %v4543_v26  ;;  %vm1469_vm10 = vcmp.lt.s32.totalorder %v5776_v3, %v5525_v19 }
 0x26c   :  { %4318 = vmatpush1.bf16.msra.mxu1 %v4317_v25  ;;  %3276 = vmatprep.mubr.msk.f32.mxu1 %vm1494_vm11, %v4543_v26  ;;  %vm1428_vm11 = vcmp.ge.s32.totalorder %v5681_v39, %v5540_v6  ;;  %vm1509_vm15 = vmand %vm1419_vm9, %vm1469_vm10 }
 0x26d   :  { %4319 = vmatprep.subr.bf16.mxu1 %v4540_v0 }
 0x26f   :  { %3277 = vmatmul.mubr.msk.f32.gmra.mrb[78].mxu1 %vm1493_vm1, %v4543_v26  ;;  %vm1518_vm1 = vmand %vm1428_vm11, %vm1478_vm12  ;;  %vm1414_vm12 = vcmp.ge.s32.totalorder %v5812_v30, %v5506_v5 }
 0x270   :  { %4321 = vmatpush1.bf16.msra.mxu1 %v5582_v31  ;;  %3278 = vmatprep.mubr.msk.f32.mxu1 %vm1502_vm2, %v4543_v26  ;;  %v3492_v31 = vpop.f32.mrb[60].mxu1  ;;  %vm1427_vm2 = vcmp.ge.s32.totalorder %v5776_v3, %v5540_v6 }
 0x271   :  { %4322 = vmatprep.subr.bf16.mxu1 %v4540_v0  ;;  %v3493_v12 = vpop.f32.mrb[61].mxu1  ;;  %vm1517_vm5 = vmand %vm1427_vm2, %vm1477_vm3  ;;  %vm1422_vm3 = vcmp.ge.s32.totalorder %v5812_v30, %v5523_v29 }
 0x272   :  { %v5834_v42 = vadd.f32 %v3493_v12, %v3492_v31  ;;  %v3495_v39 = vpop.f32.mrb[62].mxu1  ;;  %vm1504_vm2 = vmand %vm1414_vm12, %vm1464_vm13  ;;  %v2059_v12 = vld [vmem:[%s6228_s5] sm:$0xff] }
 0x273   :  { %3279 = vmatmul.mubr.msk.f32.gmra.mrb[80].mxu1 %vm1501_vm7, %v4543_v26  ;;  %v3496_v17 = vpop.f32.mrb[63].mxu1  ;;  %vm1406_vm7 = vcmp.ge.s32.totalorder %v5812_v30, %v5490_v63 }
 0x274   :  { %4324 = vmatpush1.bf16.msra.mxu1 %v5589_v51  ;;  %3280 = vmatprep.mubr.msk.f32.mxu1 %vm1510_vm8, %v4543_v26  ;;  %v5844_v51 = vadd.f32 %v3496_v17, %v3495_v39  ;;  %v3498_v45 = vpop.f32.mrb[64].mxu1  ;;  %vm1456_vm8 = vcmp.lt.s32.totalorder %v5812_v30, %v5492_v1 }
 0x275   :  { %4325 = vmatprep.subr.bf16.mxu1 %v4540_v0  ;;  %v3499_v43 = vpop.f32.mrb[65].mxu1  ;;  %vm1496_vm11 = vmand %vm1406_vm7, %vm1456_vm8 }
 0x276   :  { %v5851_v49 = vadd.f32 %v3499_v43, %v3498_v45  ;;  %v2061_v45 = vld [vmem:[%s6228_s5 + $0x10] sm:$0xff]  ;;  %v2062_v43 = vld [vmem:[%s6228_s5 + $0x18] sm:$0xff] }
 0x277   :  { %3281 = vmatmul.mubr.msk.f32.gmra.mrb[82].mxu1 %vm1509_vm15, %v4543_v26 }
 0x278   :  { %4327 = vmatpush1.bf16.msra.mxu1 %v5596_v16  ;;  %3282 = vmatprep.mubr.msk.f32.mxu1 %vm1518_vm1, %v4543_v26  ;;  %v1384_v16 = vadd.s32 768, %v5262_v10  ;;  %v1536_v10 = vsel %vm1496_vm11, 0.04, %v4542_v4  ;;  %vm1480_vm11 = vcmp.lt.s32.totalorder %v5812_v30, %v5542_v37 }
 0x279   :  { %4328 = vmatprep.subr.bf16.mxu1 %v4540_v0 }
 0x27a   :  { %vm1397_vm9 = vcmp.ge.s32.totalorder %v1384_v16, %v5277_v18  ;;  %vm1447_vm10 = vcmp.lt.s32.totalorder %v1384_v16, %v5279_v20  ;;  %vm1405_vm15 = vcmp.ge.s32.totalorder %v1384_v16, %v5490_v63  ;;  %vm1455_vm1 = vcmp.lt.s32.totalorder %v1384_v16, %v5492_v1 }
 0x27b   :  { %3283 = vmatmul.mubr.msk.f32.gmra.mrb[84].mxu1 %vm1517_vm5, %v4543_v26  ;;  %vm1487_vm14 = vmand %vm1397_vm9, %vm1447_vm10  ;;  %v1544_v18 = vsel %vm1504_vm2, 0.04, %v4542_v4  ;;  %vm1413_vm7 = vcmp.ge.s32.totalorder %v1384_v16, %v5506_v5  ;;  %vm1463_vm8 = vcmp.lt.s32.totalorder %v1384_v16, %v5508_v13  ;;  %vm1430_vm10 = vcmp.ge.s32.totalorder %v5812_v30, %v5540_v6 }
 0x27c   :  { %4330 = vmatpush1.bf16.msra.mxu1 %v5603_v11  ;;  %3284 = vmatprep.mubr.msk.f32.mxu1 %vm1561_vm6, %v1528_v44  ;;  %v1243_v11 = vadd.f32 %v5575_v9, %v5742_v8  ;;  %vm1495_vm5 = vmand %vm1405_vm15, %vm1455_vm1  ;;  %vm1421_vm13 = vcmp.ge.s32.totalorder %v1384_v16, %v5523_v29  ;;  %vm1429_vm2 = vcmp.ge.s32.totalorder %v1384_v16, %v5540_v6 }
 0x27d   :  { %4331 = vmatprep.subr.bf16.mxu1 %v4540_v0  ;;  %vm1512_vm9 = vmand %vm1422_vm3, %vm1472_vm4  ;;  %vm1479_vm3 = vcmp.lt.s32.totalorder %v1384_v16, %v5542_v37 }
 0x27e   :  { %vm1503_vm12 = vmand %vm1413_vm7, %vm1463_vm8  ;;  %v1552_v20 = vsel %vm1512_vm9, 0.04, %v4542_v4  ;;  %vm3121_vm7 = vcmask 4096  }
 0x27f   :  { %vm1520_vm15 = vmand %vm1430_vm10, %vm1480_vm11 }
 0x280   :  { %4333 = vmatpush1.bf16.msra.mxu1 %v5610_v27  ;;  %v1370_v27 = vmax.f32 %v1243_v11, 0.0  ;;  %v1560_v63 = vsel %vm1520_vm15, 0.04, %v4542_v4  ;;  %vm1519_vm4 = vmand %vm1429_vm2, %vm1479_vm3 }
 0x281   :  { %4334 = vmatprep.subr.bf16.mxu1 %v4540_v0 }
 0x284   :  { %4336 = vmatpush1.bf16.msra.mxu1 %v5620_v33 }
 0x285   :  { %4337 = vmatprep.subr.bf16.mxu1 %v4540_v0 }
 0x288   :  { %4339 = vmatpush1.bf16.msra.mxu1 %v5643_v40 }
 0x289   :  { %4340 = vmatprep.subr.bf16.mxu1 %v4540_v0 }
 0x28c   :  { %4342 = vmatpush1.bf16.msra.mxu1 %v5673_v35 }
 0x28d   :  { %4343 = vmatprep.subr.bf16.mxu1 %v4540_v0 }
 0x290   :  { %4345 = vmatpush1.bf16.msra.mxu1 %v5706_v58 }
 0x291   :  { %4346 = vmatprep.subr.bf16.mxu1 %v4540_v0 }
 0x294   :  { %4348 = vmatpush1.bf16.msra.mxu1 %v5716_v32 }
 0x295   :  { %4349 = vmatprep.subr.bf16.mxu1 %v4540_v0 }
 0x298   :  { %4351 = vmatpush1.bf16.msra.mxu1 %v5724_v57 }
 0x299   :  { %4352 = vmatprep.subr.bf16.mxu1 %v4540_v0 }
 0x29c   :  { %4354 = vmatpush1.bf16.msra.mxu1 %v5732_v34 }
 0x29d   :  { %4355 = vmatprep.subr.bf16.mxu1 %v4540_v0 }
 0x2a0   :  { %4357 = vmatpush1.bf16.msra.mxu1 %v5740_v61 }
 0x2a1   :  { %1903 = vmatprep.subr.mxu1 %v4542_v4 }
 0x2a4   :  { %1904 = vmatpush1.msra.mxu1 %v1370_v27 }
 0x2a5   :  { %3285 = vmatmul.mubr.msk.f32.vlgmr.msra.gmra.mrb[86].mxu1 %vm1487_vm14, %v4543_v26  ;;  %4358 = vmatprep.subr.bf16.mxu1 %v4540_v0  ;;  %vm1471_vm14 = vcmp.lt.s32.totalorder %v1384_v16, %v5525_v19  ;;  %v4368_v16 = vpack.c.bf16 %v2062_v43, %v2061_v45 }
 0x2a6   :  { %3286 = vmatprep.mubr.msk.f32.mxu1 %vm1561_vm6, %v1536_v10  ;;  %vm1511_vm1 = vmand %vm1421_vm13, %vm1471_vm14 }
 0x2a9   :  { %3287 = vmatmul.mubr.msk.f32.gmra.mrb[88].mxu1 %vm1495_vm5, %v4543_v26  ;;  %vm3007_vm5 = vcmask 785408  }
 0x2aa   :  { %3288 = vmatprep.mubr.msk.f32.mxu1 %vm1561_vm6, %v1544_v18 }
 0x2ad   :  { %3289 = vmatmul.mubr.msk.f32.gmra.mrb[90].mxu1 %vm1503_vm12, %v4543_v26 }
 0x2ae   :  { %3290 = vmatprep.mubr.msk.f32.mxu1 %vm1561_vm6, %v1552_v20 }
 0x2b1   :  { %3291 = vmatmul.mubr.msk.f32.gmra.mrb[92].mxu1 %vm1511_vm1, %v4543_v26 }
 0x2b2   :  { %3292 = vmatprep.mubr.msk.f32.mxu1 %vm1561_vm6, %v1560_v63  ;;  %vm1948_vm6 = vcmask 261120  }
 0x2b5   :  { %3293 = vmatmul.mubr.msk.f32.gmra.mrb[94].mxu1 %vm1519_vm4, %v4543_v26 }
 0x2b6   :  { %4085 = vmatprep.mubr.msk.f32.mxu1 %vm4541_vm0, %v4542_v4 }
 0x2be   :  { %v3533_v1 = vpop.f32.mrb[66].mxu1 }
 0x2bf   :  { %v3534_v5 = vpop.f32.mrb[67].mxu1 }
 0x2c0   :  { %v3535_v13 = vadd.f32 %v3534_v5, %v3533_v1 }
 0x2c2   :  { %v1734_v29 = vadd.f32 %v3535_v13, %v5760_v50  ;;  %v3536_v19 = vpop.f32.mrb[68].mxu1  ;;  %v1937_v50 = vld [vmem:[%s6227_s3] sm:$0xff] }
 0x2c3   :  { %v3537_v9 = vpop.f32.mrb[69].mxu1  ;;  %v4359_v7 = vpack.c.bf16 %v1938_v46, %v1937_v50 }
 0x2c4   :  { %v3538_v6 = vadd.f32 %v3537_v9, %v3536_v19  ;;  %v3294_v9 = vld [vmem:[%s6229_s4] ss:$0 sm:$0xff] }
 0x2c5   :  { %4360 = vmatpush3.bf16.msra.mxu1 %v4359_v7 }
 0x2c6   :  { %v1739_v37 = vadd.f32 %v3538_v6, %v5816_v36  ;;  %v3539_v33 = vpop.f32.mrb[70].mxu1  ;;  %4361 = vmatprep.subr.bf16.mxu1 %v4540_v0  ;;  %v2180_v6 = vld [vmem:[%s6230_s6] sm:$0xff] }
 0x2c7   :  { %v3540_v40 = vpop.f32.mrb[71].mxu1 }
 0x2c8   :  { %v3541_v35 = vadd.f32 %v3540_v40, %v3539_v33 }
 0x2c9   :  { %4363 = vmatpush3.bf16.msra.mxu1 %v4362_v56 }
 0x2ca   :  { %v1744_v58 = vadd.f32 %v3541_v35, %v5834_v42  ;;  %v3542_v32 = vpop.f32.mrb[72].mxu1  ;;  %4364 = vmatprep.subr.bf16.mxu1 %v4540_v0  ;;  %v2060_v42 = vld [vmem:[%s6228_s5 + $0x8] sm:$0xff] }
 0x2cb   :  { %v3543_v26 = vpop.f32.mrb[73].mxu1  ;;  %v4365_v17 = vpack.c.bf16 %v2060_v42, %v2059_v12 }
 0x2cc   :  { %v3544_v57 = vadd.f32 %v3543_v26, %v3542_v32  ;;  %v2182_v26 = vld [vmem:[%s6230_s6 + $0x10] sm:$0xff] }
 0x2ce   :  { %v1749_v34 = vadd.f32 %v3544_v57, %v5844_v51  ;;  %v3545_v61 = vpop.f32.mrb[74].mxu1  ;;  %v2183_v57 = vld [vmem:[%s6230_s6 + $0x18] sm:$0xff] }
 0x2cf   :  { %v3546_v8 = vpop.f32.mrb[75].mxu1 }
 0x2d0   :  { %v3547_v24 = vadd.f32 %v3546_v8, %v3545_v61 }
 0x2d2   :  { %v1754_v52 = vadd.f32 %v3547_v24, %v5851_v49  ;;  %v5986_v24 = vpack.c.bf16 %v2183_v57, %v2182_v26 }
 0x33e   :  { %v3580_v59 = vpop.f32.mrb[76].mxu1 }
 0x33f   :  { %v3581_v41 = vpop.f32.mrb[77].mxu1 }
 0x340   :  { %v3582_v62 = vadd.f32 %v3581_v41, %v3580_v59 }
 0x342   :  { %v3583_v2 = vpop.f32.mrb[78].mxu1  ;;  %v1824_v3 = vadd.f32 %v3582_v62, %v1734_v29 }
 0x343   :  { %v3584_v48 = vpop.f32.mrb[79].mxu1 }
 0x344   :  { %v3585_v15 = vadd.f32 %v3584_v48, %v3583_v2 }
 0x346   :  { %v3586_v38 = vpop.f32.mrb[80].mxu1  ;;  %v1829_v14 = vadd.f32 %v3585_v15, %v1739_v37  ;;  %v2181_v37 = vld [vmem:[%s6230_s6 + $0x8] sm:$0xff]  ;;  %v3300_v15 = vld [vmem:[%s6231_s7] ss:$0 sm:$0xff]  ;;  %s4544_s7 = smov 64  }
 0x347   :  { %v3587_v21 = vpop.f32.mrb[81].mxu1 }
 0x348   :  { %v3588_v22 = vadd.f32 %v3587_v21, %v3586_v38 }
 0x34a   :  { %v3589_v23 = vpop.f32.mrb[82].mxu1  ;;  %v1834_v55 = vadd.f32 %v3588_v22, %v1744_v58  ;;  %v5974_v58 = vpack.c.bf16 %v2181_v37, %v2180_v6 }
 0x34b   :  { %v3590_v60 = vpop.f32.mrb[83].mxu1 }
 0x34c   :  { %v3591_v25 = vadd.f32 %v3590_v60, %v3589_v23 }
 0x34e   :  { %v3592_v28 = vpop.f32.mrb[84].mxu1  ;;  %v1839_v30 = vadd.f32 %v3591_v25, %v1749_v34 }
 0x34f   :  { %v3593_v54 = vpop.f32.mrb[85].mxu1 }
 0x350   :  { %v3594_v36 = vadd.f32 %v3593_v54, %v3592_v28 }
 0x352   :  { %v1844_v31 = vadd.f32 %v3594_v36, %v1754_v52 }
 0x378   :  { %v1913_v39 = vpop.f32.mrb[86].mxu1 }
 0x379   :  { %v1914_v51 = vadd.f32 %v1913_v39, %v1824_v3  ;;  %v1915_v44 = vpop.f32.mrb[87].mxu1 }
 0x37b   :  { %4086 = vmatmul.mubr.msk.f32.vlgmr.msra.gmra.mrb[96].mxu1 %vm1948_vm6, %v1914_v51 }
 0x37c   :  { %v1918_v49 = vpop.f32.mrb[88].mxu1  ;;  %4088 = vmatprep.mubr.msk.f32.mxu1 %vm4541_vm0, %v4542_v4  ;;  %4366 = vmatpush3.bf16.msra.mxu1 %v4365_v17 }
 0x37d   :  { %v1919_v11 = vadd.f32 %v1918_v49, %v1829_v14  ;;  %v1920_v27 = vpop.f32.mrb[89].mxu1  ;;  %4367 = vmatprep.subr.bf16.mxu1 %v4540_v0 }
 0x37f   :  { %4089 = vmatmul.mubr.msk.f32.gmra.mrb[98].mxu1 %vm1948_vm6, %v1919_v11 }
 0x380   :  { %v1923_v10 = vpop.f32.mrb[90].mxu1  ;;  %4091 = vmatprep.mubr.msk.f32.mxu1 %vm4541_vm0, %v4542_v4  ;;  %4369 = vmatpush3.bf16.msra.mxu1 %v4368_v16 }
 0x381   :  { %v1924_v18 = vadd.f32 %v1923_v10, %v1834_v55  ;;  %v1925_v20 = vpop.f32.mrb[91].mxu1  ;;  %4370 = vmatprep.subr.bf16.mxu1 %v4540_v0 }
 0x383   :  { %4092 = vmatmul.mubr.msk.f32.gmra.mrb[100].mxu1 %vm1948_vm6, %v1924_v18 }
 0x384   :  { %v1928_v63 = vpop.f32.mrb[92].mxu1  ;;  %4094 = vmatprep.mubr.msk.f32.mxu1 %vm4541_vm0, %v4542_v4 }
 0x385   :  { %v1929_v1 = vadd.f32 %v1928_v63, %v1839_v30  ;;  %v1930_v5 = vpop.f32.mrb[93].mxu1 }
 0x387   :  { %4095 = vmatmul.mubr.msk.f32.gmra.mrb[102].mxu1 %vm1948_vm6, %v1929_v1 }
 0x388   :  { %v1933_v13 = vpop.f32.mrb[94].mxu1  ;;  %4097 = vmatprep.mubr.msk.f32.mxu1 %vm4541_vm0, %v4542_v4 }
 0x389   :  { %v1934_v29 = vadd.f32 %v1933_v13, %v1844_v31  ;;  %v1935_v19 = vpop.f32.mrb[95].mxu1 }
 0x38b   :  { %4098 = vmatmul.mubr.msk.f32.gmra.mrb[104].mxu1 %vm1948_vm6, %v1934_v29 }
 0x38c   :  { %4108 = vmatprep.mubr.msk.f32.mxu1 %vm4541_vm0, %v4542_v4 }
 0x44e   :  { %v2030_v33 = vpop.f32.mrb[96].mxu1 }
 0x44f   :  { %v2031_v40 = vadd.f32 %v3294_v9, %v2030_v33  ;;  %v4087_v35 = vpop.f32.mrb[97].mxu1 }
 0x451   :  { %v2054_v32 = vmax.f32 %v2031_v40, 0.0 }
 0x452   :  { %v2035_v34 = vpop.f32.mrb[98].mxu1 }
 0x453   :  { %v2036_v61 = vadd.f32 %v3294_v9, %v2035_v34  ;;  %v4090_v8 = vpop.f32.mrb[99].mxu1  ;;  %4109 = vmatmul.mubr.msk.f32.vlgmr.msra.gmra.mrb[106].mxu1 %vm1948_vm6, %v2054_v32 }
 0x454   :  { %4372 = vmatpush3.bf16.msra.mxu1 %v5974_v58  ;;  %4111 = vmatprep.mubr.msk.f32.mxu1 %vm4541_vm0, %v4542_v4 }
 0x455   :  { %v2055_v50 = vmax.f32 %v2036_v61, 0.0  ;;  %4373 = vmatprep.subr.bf16.mxu1 %v4540_v0 }
 0x456   :  { %v2040_v46 = vpop.f32.mrb[100].mxu1 }
 0x457   :  { %v2041_v47 = vadd.f32 %v3294_v9, %v2040_v46  ;;  %v4093_v52 = vpop.f32.mrb[101].mxu1  ;;  %4112 = vmatmul.mubr.msk.f32.gmra.mrb[108].mxu1 %vm1948_vm6, %v2055_v50 }
 0x458   :  { %4114 = vmatprep.mubr.msk.f32.mxu1 %vm4541_vm0, %v4542_v4  ;;  %4375 = vmatpush3.bf16.msra.mxu1 %v5986_v24 }
 0x459   :  { %v2056_v7 = vmax.f32 %v2041_v47, 0.0  ;;  %4376 = vmatprep.subr.bf16.mxu1 %v4540_v0 }
 0x45a   :  { %v2045_v53 = vpop.f32.mrb[102].mxu1 }
 0x45b   :  { %v2046_v56 = vadd.f32 %v3294_v9, %v2045_v53  ;;  %v4096_v59 = vpop.f32.mrb[103].mxu1  ;;  %4115 = vmatmul.mubr.msk.f32.gmra.mrb[110].mxu1 %vm1948_vm6, %v2056_v7 }
 0x45c   :  { %4117 = vmatprep.mubr.msk.f32.mxu1 %vm4541_vm0, %v4542_v4 }
 0x45d   :  { %v2057_v41 = vmax.f32 %v2046_v56, 0.0 }
 0x45e   :  { %v2050_v62 = vpop.f32.mrb[104].mxu1 }
 0x45f   :  { %v2051_v2 = vadd.f32 %v3294_v9, %v2050_v62  ;;  %v4099_v3 = vpop.f32.mrb[105].mxu1  ;;  %4118 = vmatmul.mubr.msk.f32.gmra.mrb[112].mxu1 %vm1948_vm6, %v2057_v41 }
 0x460   :  { %4120 = vmatprep.mubr.msk.f32.mxu1 %vm4541_vm0, %v4542_v4 }
 0x461   :  { %v2058_v48 = vmax.f32 %v2051_v2, 0.0 }
 0x463   :  { %4121 = vmatmul.mubr.msk.f32.gmra.mrb[114].mxu1 %vm1948_vm6, %v2058_v48 }
 0x464   :  { %4131 = vmatprep.mubr.msk.f32.mxu1 %vm4541_vm0, %v4542_v4 }
 0x467   :  { %4132 = vmatmul.mubr.f32.vlgmr.msra.gmra.mrb[116].mxu1 %v4542_v4 }
 0x468   :  { %4378 = vmatpush3.bf16.msra.mxu1 %v5974_v58  ;;  %4142 = vmatprep.mubr.msk.f32.mxu1 %vm4541_vm0, %v4542_v4 }
 0x469   :  { %4379 = vmatprep.subr.bf16.mxu1 %v4540_v0 }
 0x46c   :  { %4381 = vmatpush3.bf16.msra.mxu1 %v5986_v24 }
 0x46d   :  { %4382 = vmatprep.subr.bf16.mxu1 %v4540_v0 }
 0x526   :  { %v2151_v38 = vpop.f32.mrb[106].mxu1 }
 0x527   :  { %v2152_v14 = vadd.f32 %v3300_v15, %v2151_v38  ;;  %v4110_v21 = vpop.f32.mrb[107].mxu1 }
 0x529   :  { %2175 = vst [vmem:[#allocation2] sm:$0xff] %v2152_v14 }
 0x52a   :  { %v2156_v22 = vpop.f32.mrb[108].mxu1 }
 0x52b   :  { %v2157_v23 = vadd.f32 %v3300_v15, %v2156_v22  ;;  %v4113_v55 = vpop.f32.mrb[109].mxu1 }
 0x52d   :  { %2176 = vst [vmem:[#allocation2 + $0x8] sm:$0xff] %v2157_v23 }
 0x52e   :  { %v2161_v60 = vpop.f32.mrb[110].mxu1 }
 0x52f   :  { %v2162_v25 = vadd.f32 %v3300_v15, %v2161_v60  ;;  %v4116_v28 = vpop.f32.mrb[111].mxu1 }
 0x530   :  { %v2184_v39 = vld [vmem:[#allocation2] sm:$0x1f] }
 0x531   :  { %2177 = vst [vmem:[#allocation2 + $0x10] sm:$0xff] %v2162_v25 }
 0x532   :  { %v2166_v30 = vpop.f32.mrb[112].mxu1 }
 0x533   :  { %v2167_v54 = vadd.f32 %v3300_v15, %v2166_v30  ;;  %v4119_v36 = vpop.f32.mrb[113].mxu1 }
 0x534   :  { %v2283_v19 = vld [vmem:[#allocation2 + $0x5] sm:$0x1f]  ;;  %v2384_v53 = vld [vmem:[#allocation2 + $0xa] sm:$0x1f] }
 0x535   :  { %2178 = vst [vmem:[#allocation2 + $0x18] sm:$0xff] %v2167_v54 }
 0x536   :  { %v2171_v31 = vpop.f32.mrb[114].mxu1 }
 0x537   :  { %v2172_v12 = vadd.f32 %v3300_v15, %v2171_v31  ;;  %v4122_v42 = vpop.f32.mrb[115].mxu1 }
 0x538   :  { %v2485_v30 = vld [vmem:[#allocation2 + $0xf] sm:$0x1f] }
 0x539   :  { %2179 = vst [vmem:[#allocation2 + $0x20] sm:$0xff] %v2172_v12 }
 0x53a   :  { %v2254_v17 = vpop.f32.mrb[116].mxu1 }
 0x53b   :  { %v2258_v51 = vadd.f32 %v2254_v17, %v2184_v39  ;;  %v4133_v44 = vpop.f32.mrb[117].mxu1 }
 0x53d   :  { %4475 = vtanh.f32 %v2258_v51  ;;  %v3306_v43 = vmul.f32 -1.442695, %v2258_v51 }
 0x53f   :  { %4477 = vpow2.f32 %v3306_v43 }
 0x547   :  { %v4476_v45 = vpop.eup %4475 }
 0x548   :  { %2268 = vrot.lane.b32.xlu0 %v4476_v45, %s4544_s7 }
 0x549   :  { %v4478_v49 = vpop.eup %4477 }
 0x54a   :  { %v2262_v16 = vadd.f32 1.0, %v4478_v49 }
 0x54c   :  { %4479 = vrcp.f32 %v2262_v16 }
 0x556   :  { %v4480_v11 = vpop.eup %4479 }
 0x557   :  { %v2266_v18 = vmul.f32 0.0, %v4480_v11 }
 0x5ba   :  { %v2269_v27 = vpop.permute.xlu0 %2268 }
 0x5bb   :  { %v2271_v10 = vmul.f32 %v4480_v11, %v2269_v27 }
 0x5bd   :  { %2273 = vrot.lane.b32.xlu0 %v2271_v10, %s4545_s28 }
 0x62f   :  { %v2274_v20 = vpop.permute.xlu0 %2273 }
 0x630   :  { %v2276_v63 = vadd.f32 %v2274_v20, %v2266_v18  ;;  %v2586_v20 = vld [vmem:[#allocation2 + $0x14] sm:$0x1f] }
 0x632   :  { %4481 = vtanh.f32 %v2276_v63 }
 0x63c   :  { %v4482_v1 = vpop.eup %4481 }
 0x63d   :  { %2279 = vrot.lane.b32.xlu1 %v4482_v1, %s4544_s7 }
 0x6af   :  { %v2280_v5 = vpop.permute.xlu1 %2279 }
 0x6b0   :  { %v2282_v13 = vmul.f32 %v4480_v11, %v2280_v5 }
 0x6b2   :  { %2285 = vrot.lane.b32.xlu1 %v2282_v13, %s4545_s28 }
 0x724   :  { %v6017_v29 = vpop.permute.xlu1 %2285 }
 0x725   :  { %4143 = vmatmul.mubr.msk.f32.vlgmr.msra.gmra.mrb[118].mxu1 %vm1948_vm6, %v6017_v29 }
 0x726   :  { %4384 = vmatpush3.bf16.msra.mxu1 %v5974_v58  ;;  %4153 = vmatprep.mubr.msk.f32.mxu1 %vm4541_vm0, %v4542_v4 }
 0x727   :  { %4385 = vmatprep.subr.bf16.mxu1 %v4540_v0 }
 0x72a   :  { %4387 = vmatpush3.bf16.msra.mxu1 %v5986_v24 }
 0x72b   :  { %4388 = vmatprep.subr.bf16.mxu1 %v4540_v0 }
 0x7f8   :  { %v2355_v9 = vpop.f32.mrb[118].mxu1 }
 0x7f9   :  { %v2359_v6 = vadd.f32 %v2355_v9, %v2283_v19  ;;  %v4144_v37 = vpop.f32.mrb[119].mxu1 }
 0x7fb   :  { %4483 = vtanh.f32 %v2359_v6  ;;  %v3308_v40 = vmul.f32 -1.442695, %v2359_v6 }
 0x7fd   :  { %4485 = vpow2.f32 %v3308_v40 }
 0x805   :  { %v4484_v33 = vpop.eup %4483 }
 0x806   :  { %2369 = vrot.lane.b32.xlu0 %v4484_v33, %s4544_s7 }
 0x807   :  { %v4486_v35 = vpop.eup %4485 }
 0x808   :  { %v2363_v32 = vadd.f32 1.0, %v4486_v35 }
 0x80a   :  { %4487 = vrcp.f32 %v2363_v32 }
 0x814   :  { %v4488_v26 = vpop.eup %4487 }
 0x815   :  { %v2367_v61 = vmul.f32 %v4488_v26, %v2276_v63 }
 0x878   :  { %v2370_v57 = vpop.permute.xlu0 %2369 }
 0x879   :  { %v2372_v34 = vmul.f32 %v4488_v26, %v2370_v57 }
 0x87b   :  { %2374 = vrot.lane.b32.xlu1 %v2372_v34, %s4545_s28 }
 0x8ed   :  { %v2375_v8 = vpop.permute.xlu1 %2374 }
 0x8ee   :  { %v2377_v50 = vadd.f32 %v2375_v8, %v2367_v61 }
 0x8f0   :  { %4489 = vtanh.f32 %v2377_v50 }
 0x8fa   :  { %v4490_v46 = vpop.eup %4489 }
 0x8fb   :  { %2380 = vrot.lane.b32.xlu0 %v4490_v46, %s4544_s7 }
 0x96d   :  { %v2381_v47 = vpop.permute.xlu0 %2380 }
 0x96e   :  { %v6030_v52 = vmul.f32 %v4488_v26, %v2381_v47 }
 0x970   :  { %2386 = vrot.lane.b32.xlu1 %v6030_v52, %s4545_s28 }
 0x9e2   :  { %v2387_v7 = vpop.permute.xlu1 %2386 }
 0x9e3   :  { %4154 = vmatmul.mubr.msk.f32.vlgmr.msra.gmra.mrb[120].mxu1 %vm1948_vm6, %v2387_v7 }
 0x9e4   :  { %4390 = vmatpush3.bf16.msra.mxu1 %v5974_v58  ;;  %4164 = vmatprep.mubr.msk.f32.mxu1 %vm4541_vm0, %v4542_v4 }
 0x9e5   :  { %4391 = vmatprep.subr.bf16.mxu1 %v4540_v0 }
 0x9e8   :  { %4393 = vmatpush3.bf16.msra.mxu1 %v5986_v24 }
 0x9e9   :  { %4394 = vmatprep.subr.bf16.mxu1 %v4540_v0 }
 0xab6   :  { %v2456_v56 = vpop.f32.mrb[120].mxu1 }
 0xab7   :  { %v2460_v59 = vadd.f32 %v2456_v56, %v2384_v53  ;;  %v4155_v41 = vpop.f32.mrb[121].mxu1 }
 0xab9   :  { %4491 = vtanh.f32 %v2460_v59  ;;  %v3310_v2 = vmul.f32 -1.442695, %v2460_v59 }
 0xabb   :  { %4493 = vpow2.f32 %v3310_v2 }
 0xac3   :  { %v4492_v62 = vpop.eup %4491 }
 0xac4   :  { %2470 = vrot.lane.b32.xlu0 %v4492_v62, %s4544_s7 }
 0xac5   :  { %v4494_v3 = vpop.eup %4493 }
 0xac6   :  { %v2464_v48 = vadd.f32 1.0, %v4494_v3 }
 0xac8   :  { %4495 = vrcp.f32 %v2464_v48 }
 0xad2   :  { %v4496_v15 = vpop.eup %4495 }
 0xad3   :  { %v2468_v21 = vmul.f32 %v4496_v15, %v2377_v50  ;;  %v2687_v50 = vld [vmem:[#allocation2 + $0x19] sm:$0x1f] }
 0xb36   :  { %v2471_v38 = vpop.permute.xlu0 %2470 }
 0xb37   :  { %v2473_v14 = vmul.f32 %v4496_v15, %v2471_v38 }
 0xb39   :  { %2475 = vrot.lane.b32.xlu1 %v2473_v14, %s4545_s28 }
 0xbab   :  { %v2476_v22 = vpop.permute.xlu1 %2475 }
 0xbac   :  { %v2478_v23 = vadd.f32 %v2476_v22, %v2468_v21 }
 0xbae   :  { %4497 = vtanh.f32 %v2478_v23 }
 0xbb8   :  { %v4498_v55 = vpop.eup %4497 }
 0xbb9   :  { %2481 = vrot.lane.b32.xlu0 %v4498_v55, %s4544_s7  ;;  %v2788_v55 = vld [vmem:[#allocation2 + $0x1e] sm:$0x1f] }
 0xc2b   :  { %v2482_v60 = vpop.permute.xlu0 %2481 }
 0xc2c   :  { %v6044_v25 = vmul.f32 %v4496_v15, %v2482_v60 }
 0xc2e   :  { %2487 = vrot.lane.b32.xlu1 %v6044_v25, %s4545_s28 }
 0xca0   :  { %v2488_v28 = vpop.permute.xlu1 %2487 }
 0xca1   :  { %4165 = vmatmul.mubr.msk.f32.vlgmr.msra.gmra.mrb[122].mxu1 %vm1948_vm6, %v2488_v28 }
 0xca2   :  { %4396 = vmatpush3.bf16.msra.mxu1 %v5974_v58  ;;  %4175 = vmatprep.mubr.msk.f32.mxu1 %vm4541_vm0, %v4542_v4 }
 0xca3   :  { %4397 = vmatprep.subr.bf16.mxu1 %v4540_v0 }
 0xca6   :  { %4399 = vmatpush3.bf16.msra.mxu1 %v5986_v24 }
 0xca7   :  { %4400 = vmatprep.subr.bf16.mxu1 %v4540_v0 }
 0xd74   :  { %v2557_v54 = vpop.f32.mrb[122].mxu1 }
 0xd75   :  { %v2561_v36 = vadd.f32 %v2557_v54, %v2485_v30  ;;  %v4166_v31 = vpop.f32.mrb[123].mxu1 }
 0xd77   :  { %4499 = vtanh.f32 %v2561_v36  ;;  %v3312_v42 = vmul.f32 -1.442695, %v2561_v36 }
 0xd79   :  { %4501 = vpow2.f32 %v3312_v42 }
 0xd81   :  { %v4500_v12 = vpop.eup %4499 }
 0xd82   :  { %2571 = vrot.lane.b32.xlu0 %v4500_v12, %s4544_s7 }
 0xd83   :  { %v4502_v39 = vpop.eup %4501 }
 0xd84   :  { %v2565_v17 = vadd.f32 1.0, %v4502_v39 }
 0xd86   :  { %4503 = vrcp.f32 %v2565_v17 }
 0xd90   :  { %v4504_v51 = vpop.eup %4503 }
 0xd91   :  { %v2569_v43 = vmul.f32 %v4504_v51, %v2478_v23 }
 0xdf4   :  { %v2572_v44 = vpop.permute.xlu0 %2571 }
 0xdf5   :  { %v2574_v45 = vmul.f32 %v4504_v51, %v2572_v44 }
 0xdf7   :  { %2576 = vrot.lane.b32.xlu1 %v2574_v45, %s4545_s28 }
 0xe69   :  { %v2577_v49 = vpop.permute.xlu1 %2576 }
 0xe6a   :  { %v2579_v16 = vadd.f32 %v2577_v49, %v2569_v43  ;;  %v2889_v43 = vld [vmem:[#allocation2 + $0x23] sm:$0x1f] }
 0xe6c   :  { %4505 = vtanh.f32 %v2579_v16 }
 0xe76   :  { %v4506_v11 = vpop.eup %4505 }
 0xe77   :  { %2582 = vrot.lane.b32.xlu0 %v4506_v11, %s4544_s7 }
 0xee9   :  { %v2583_v27 = vpop.permute.xlu0 %2582 }
 0xeea   :  { %v6058_v10 = vmul.f32 %v4504_v51, %v2583_v27 }
 0xeec   :  { %2588 = vrot.lane.b32.xlu1 %v6058_v10, %s4545_s28 }
 0xf5e   :  { %v2589_v18 = vpop.permute.xlu1 %2588 }
 0xf5f   :  { %4176 = vmatmul.mubr.msk.f32.vlgmr.msra.gmra.mrb[124].mxu1 %vm1948_vm6, %v2589_v18 }
 0xf60   :  { %4402 = vmatpush3.bf16.msra.mxu1 %v5974_v58  ;;  %4186 = vmatprep.mubr.msk.f32.mxu1 %vm4541_vm0, %v4542_v4 }
 0xf61   :  { %4403 = vmatprep.subr.bf16.mxu1 %v4540_v0 }
 0xf64   :  { %4405 = vmatpush3.bf16.msra.mxu1 %v5986_v24 }
 0xf65   :  { %4406 = vmatprep.subr.bf16.mxu1 %v4540_v0 }
0x1032   :  { %v2658_v63 = vpop.f32.mrb[124].mxu1 }
0x1033   :  { %v2662_v1 = vadd.f32 %v2658_v63, %v2586_v20  ;;  %v4177_v5 = vpop.f32.mrb[125].mxu1 }
0x1035   :  { %4507 = vtanh.f32 %v2662_v1  ;;  %v3314_v19 = vmul.f32 -1.442695, %v2662_v1 }
0x1037   :  { %4509 = vpow2.f32 %v3314_v19 }
0x103f   :  { %v4508_v13 = vpop.eup %4507 }
0x1040   :  { %2672 = vrot.lane.b32.xlu0 %v4508_v13, %s4544_s7 }
0x1041   :  { %v4510_v9 = vpop.eup %4509 }
0x1042   :  { %v2666_v6 = vadd.f32 1.0, %v4510_v9  ;;  %v3028_v9 = vld [vmem:[%s6232_s8 + $0x80] sm:$0xff] }
0x1044   :  { %4511 = vrcp.f32 %v2666_v6  ;;  %v3029_v6 = vld [vmem:[%s6232_s8 + $0x88] sm:$0xff] }
0x104e   :  { %v4512_v37 = vpop.eup %4511 }
0x104f   :  { %v2670_v35 = vmul.f32 %v4512_v37, %v2579_v16 }
0x10b2   :  { %v2673_v33 = vpop.permute.xlu0 %2672 }
0x10b3   :  { %v2675_v40 = vmul.f32 %v4512_v37, %v2673_v33  ;;  %v4418_v33 = vpack.c.bf16 %v3029_v6, %v3028_v9 }
0x10b5   :  { %2677 = vrot.lane.b32.xlu1 %v2675_v40, %s4545_s28  ;;  %v3013_v40 = vld [vmem:[%s6232_s8 + $0x8] sm:$0xff] }
0x1127   :  { %v2678_v32 = vpop.permute.xlu1 %2677 }
0x1128   :  { %v2680_v26 = vadd.f32 %v2678_v32, %v2670_v35  ;;  %v3031_v35 = vld [vmem:[%s6232_s8 + $0x98] sm:$0xff] }
0x112a   :  { %4513 = vtanh.f32 %v2680_v26 }
0x1134   :  { %v4514_v57 = vpop.eup %4513 }
0x1135   :  { %2683 = vrot.lane.b32.xlu0 %v4514_v57, %s4544_s7  ;;  %v3014_v57 = vld [vmem:[%s6232_s8 + $0x10] sm:$0xff] }
0x11a7   :  { %v2684_v34 = vpop.permute.xlu0 %2683 }
0x11a8   :  { %v2686_v61 = vmul.f32 %v4512_v37, %v2684_v34  ;;  %v3012_v37 = vld [vmem:[%s6232_s8] sm:$0xff]  ;;  %v3015_v34 = vld [vmem:[%s6232_s8 + $0x18] sm:$0xff] }
0x11a9   :  { %v4420_v32 = vpack.c.bf16 %v3013_v40, %v3012_v37 }
0x11aa   :  { %2689 = vrot.lane.b32.xlu1 %v2686_v61, %s4545_s28  ;;  %v3032_v61 = vld [vmem:[%s6232_s8 + $0xa0] sm:$0xff] }
0x121c   :  { %v6073_v8 = vpop.permute.xlu1 %2689 }
0x121d   :  { %4187 = vmatmul.mubr.msk.f32.vlgmr.msra.gmra.mrb[126].mxu1 %vm1948_vm6, %v6073_v8 }
0x121e   :  { %4408 = vmatpush3.bf16.msra.mxu1 %v5974_v58  ;;  %4197 = vmatprep.mubr.msk.f32.mxu1 %vm4541_vm0, %v4542_v4 }
0x121f   :  { %4409 = vmatprep.subr.bf16.mxu1 %v4540_v0 }
0x1222   :  { %4411 = vmatpush3.bf16.msra.mxu1 %v5986_v24 }
0x1223   :  { %4412 = vmatprep.subr.bf16.mxu1 %v4540_v0 }
0x12f0   :  { %v2759_v46 = vpop.f32.mrb[126].mxu1 }
0x12f1   :  { %v2763_v47 = vadd.f32 %v2759_v46, %v2687_v50  ;;  %v4188_v7 = vpop.f32.mrb[127].mxu1  ;;  %v3033_v50 = vld [vmem:[%s6232_s8 + $0xa8] sm:$0xff]  ;;  %v4424_v46 = vpack.c.bf16 %v3015_v34, %v3014_v57 }
0x12f2   :  { %v3016_v7 = vld [vmem:[%s6232_s8 + $0x20] sm:$0xff] }
0x12f3   :  { %4515 = vtanh.f32 %v2763_v47  ;;  %v3316_v56 = vmul.f32 -1.442695, %v2763_v47  ;;  %v4426_v47 = vpack.c.bf16 %v3033_v50, %v3032_v61 }
0x12f5   :  { %4517 = vpow2.f32 %v3316_v56  ;;  %v3034_v56 = vld [vmem:[%s6232_s8 + $0xb0] sm:$0xff] }
0x12fd   :  { %v4516_v53 = vpop.eup %4515 }
0x12fe   :  { %2773 = vrot.lane.b32.xlu0 %v4516_v53, %s4544_s7  ;;  %v3017_v53 = vld [vmem:[%s6232_s8 + $0x28] sm:$0xff] }
0x12ff   :  { %v4518_v59 = vpop.eup %4517 }
0x1300   :  { %v2767_v41 = vadd.f32 1.0, %v4518_v59  ;;  %v3035_v59 = vld [vmem:[%s6232_s8 + $0xb8] sm:$0xff] }
0x1302   :  { %4519 = vrcp.f32 %v2767_v41  ;;  %v4428_v41 = vpack.c.bf16 %v3017_v53, %v3016_v7 }
0x130c   :  { %v4520_v62 = vpop.eup %4519 }
0x130d   :  { %v2771_v48 = vmul.f32 %v4520_v62, %v2680_v26 }
0x1370   :  { %v2774_v2 = vpop.permute.xlu0 %2773 }
0x1371   :  { %v2776_v3 = vmul.f32 %v4520_v62, %v2774_v2  ;;  %v3018_v2 = vld [vmem:[%s6232_s8 + $0x30] sm:$0xff] }
0x1373   :  { %2778 = vrot.lane.b32.xlu1 %v2776_v3, %s4545_s28  ;;  %v3019_v3 = vld [vmem:[%s6232_s8 + $0x38] sm:$0xff] }
0x13e5   :  { %v2779_v15 = vpop.permute.xlu1 %2778 }
0x13e6   :  { %v2781_v38 = vadd.f32 %v2779_v15, %v2771_v48  ;;  %v3036_v48 = vld [vmem:[%s6232_s8 + $0xc0] sm:$0xff]  ;;  %v3037_v15 = vld [vmem:[%s6232_s8 + $0xc8] sm:$0xff] }
0x13e8   :  { %4521 = vtanh.f32 %v2781_v38 }
0x13f2   :  { %v4522_v14 = vpop.eup %4521 }
0x13f3   :  { %2784 = vrot.lane.b32.xlu0 %v4522_v14, %s4544_s7  ;;  %v4434_v14 = vpack.c.bf16 %v3037_v15, %v3036_v48 }
0x1465   :  { %v2785_v21 = vpop.permute.xlu0 %2784 }
0x1466   :  { %v2787_v22 = vmul.f32 %v4520_v62, %v2785_v21  ;;  %v4430_v62 = vpack.c.bf16 %v3035_v59, %v3034_v56  ;;  %v3020_v21 = vld [vmem:[%s6232_s8 + $0x40] sm:$0xff] }
0x1468   :  { %2790 = vrot.lane.b32.xlu1 %v2787_v22, %s4545_s28  ;;  %v4465_v19 = vpack.i.bf16 %v6030_v52, %v2787_v22  ;;  %v3030_v52 = vld [vmem:[%s6232_s8 + $0x90] sm:$0xff]  ;;  %v3021_v22 = vld [vmem:[%s6232_s8 + $0x48] sm:$0xff] }
0x1469   :  { %v4422_v26 = vpack.c.bf16 %v3031_v35, %v3030_v52 }
0x14da   :  { %v2791_v23 = vpop.permute.xlu1 %2790 }
0x14db   :  { %4198 = vmatmul.mubr.msk.f32.vlgmr.msra.gmra.mrb[128].mxu1 %vm1948_vm6, %v2791_v23  ;;  %v3038_v23 = vld [vmem:[%s6232_s8 + $0xd0] sm:$0xff] }
0x14dc   :  { %4414 = vmatpush3.bf16.msra.mxu1 %v5974_v58  ;;  %4208 = vmatprep.mubr.msk.f32.mxu1 %vm4541_vm0, %v4542_v4  ;;  %vm3005_vm0 = vcmask 523264  }
0x14dd   :  { %4415 = vmatprep.subr.bf16.mxu1 %v4540_v0 }
0x14e0   :  { %4417 = vmatpush3.bf16.msra.mxu1 %v5986_v24 }
0x14e1   :  { %4419 = vmatprep.subr.bf16.mxu1 %v4418_v33 }
0x15ae   :  { %v2860_v60 = vpop.f32.mrb[128].mxu1 }
0x15af   :  { %v2864_v28 = vadd.f32 %v2860_v60, %v2788_v55  ;;  %v4199_v30 = vpop.f32.mrb[129].mxu1  ;;  %v3039_v55 = vld [vmem:[%s6232_s8 + $0xd8] sm:$0xff]  ;;  %v4436_v60 = vpack.c.bf16 %v3021_v22, %v3020_v21 }
0x15b0   :  { %v3022_v30 = vld [vmem:[%s6232_s8 + $0x50] sm:$0xff] }
0x15b1   :  { %4523 = vtanh.f32 %v2864_v28  ;;  %v3318_v36 = vmul.f32 -1.442695, %v2864_v28  ;;  %v4438_v28 = vpack.c.bf16 %v3039_v55, %v3038_v23 }
0x15b3   :  { %4525 = vpow2.f32 %v3318_v36 }
0x15bb   :  { %v4524_v54 = vpop.eup %4523 }
0x15bc   :  { %2874 = vrot.lane.b32.xlu0 %v4524_v54, %s4544_s7  ;;  %v3023_v54 = vld [vmem:[%s6232_s8 + $0x58] sm:$0xff] }
0x15bd   :  { %v4526_v31 = vpop.eup %4525  ;;  %v4440_v36 = vpack.c.bf16 %v3023_v54, %v3022_v30 }
0x15be   :  { %v2868_v12 = vadd.f32 1.0, %v4526_v31 }
0x15c0   :  { %4527 = vrcp.f32 %v2868_v12  ;;  %v3040_v12 = vld [vmem:[%s6232_s8 + $0xe0] sm:$0xff] }
0x15ca   :  { %v4528_v58 = vpop.eup %4527 }
0x15cb   :  { %v2872_v0 = vmul.f32 %v4528_v58, %v2781_v38  ;;  %v4432_v38 = vpack.c.bf16 %v3019_v3, %v3018_v2 }
0x162e   :  { %v2875_v42 = vpop.permute.xlu0 %2874 }
0x162f   :  { %v2877_v4 = vmul.f32 %v4528_v58, %v2875_v42 }
0x1631   :  { %2879 = vrot.lane.b32.xlu1 %v2877_v4, %s4545_s28 }
0x16a3   :  { %v2880_v24 = vpop.permute.xlu1 %2879 }
0x16a4   :  { %v6095_v39 = vadd.f32 %v2880_v24, %v2872_v0  ;;  %v3024_v0 = vld [vmem:[%s6232_s8 + $0x60] sm:$0xff]  ;;  %v3025_v24 = vld [vmem:[%s6232_s8 + $0x68] sm:$0xff] }
0x16a6   :  { %4529 = vtanh.f32 %v6095_v39 }
0x16b0   :  { %v4530_v17 = vpop.eup %4529 }
0x16b1   :  { %2885 = vrot.lane.b32.xlu0 %v4530_v17, %s4544_s7 }
0x1723   :  { %v2886_v51 = vpop.permute.xlu0 %2885 }
0x1724   :  { %v6099_v44 = vmul.f32 %v4528_v58, %v2886_v51  ;;  %v3041_v58 = vld [vmem:[%s6232_s8 + $0xe8] sm:$0xff]  ;;  %v3042_v51 = vld [vmem:[%s6232_s8 + $0xf0] sm:$0xff] }
0x1725   :  { %v4442_v4 = vpack.c.bf16 %v3041_v58, %v3040_v12 }
0x1726   :  { %2891 = vrot.lane.b32.xlu1 %v6099_v44, %s4545_s28 }
0x1798   :  { %v2892_v45 = vpop.permute.xlu1 %2891 }
0x1799   :  { %4209 = vmatmul.mubr.msk.f32.vlgmr.msra.gmra.mrb[130].mxu1 %vm1948_vm6, %v2892_v45  ;;  %v3043_v45 = vld [vmem:[%s6232_s8 + $0xf8] sm:$0xff] }
0x179a   :  { %4421 = vmatpush3.bf16.msra.mxu1 %v4420_v32  ;;  %v15_v32 = vstv %s6233_s9 }
0x179b   :  { %4423 = vmatprep.subr.bf16.mxu1 %v4422_v26  ;;  %16 = vst [vmem:[#allocation3] sm:$0x1] %v15_v32 }
0x179e   :  { %4425 = vmatpush3.bf16.msra.mxu1 %v4424_v46 }
0x179f   :  { %4427 = vmatprep.subr.bf16.mxu1 %v4426_v47 }
0x17a2   :  { %4429 = vmatpush3.bf16.msra.mxu1 %v4428_v41  ;;  %v3321_v57 = vld [vmem:[#allocation3] ss:$0 sm:$0xff] }
0x17a3   :  { %4431 = vmatprep.subr.bf16.mxu1 %v4430_v62 }
0x17a6   :  { %4433 = vmatpush3.bf16.msra.mxu1 %v4432_v38 }
0x17a7   :  { %4435 = vmatprep.subr.bf16.mxu1 %v4434_v14 }
0x17aa   :  { %4437 = vmatpush3.bf16.msra.mxu1 %v4436_v60 }
0x17ab   :  { %4439 = vmatprep.subr.bf16.mxu1 %v4438_v28 }
0x17ae   :  { %4441 = vmatpush3.bf16.msra.mxu1 %v4440_v36 }
0x17af   :  { %4443 = vmatprep.subr.bf16.mxu1 %v4442_v4 }
0x186c   :  { %v2961_v49 = vpop.f32.mrb[130].mxu1 }
0x186d   :  { %v2965_v16 = vadd.f32 %v2961_v49, %v2889_v43  ;;  %v4210_v11 = vpop.f32.mrb[131].mxu1  ;;  %v4446_v43 = vpack.c.bf16 %v3043_v45, %v3042_v51  ;;  %v3026_v49 = vld [vmem:[%s6232_s8 + $0x70] sm:$0xff] }
0x186f   :  { %4531 = vtanh.f32 %v2965_v16  ;;  %v3320_v18 = vmul.f32 -1.442695, %v2965_v16  ;;  %v3027_v16 = vld [vmem:[%s6232_s8 + $0x78] sm:$0xff] }
0x1870   :  { %v4448_v11 = vpack.c.bf16 %v3027_v16, %v3026_v49 }
0x1871   :  { %4533 = vpow2.f32 %v3320_v18  ;;  %v4470_v18 = vpack.i.bf16 %v6044_v25, %v6099_v44 }
0x1879   :  { %v4532_v27 = vpop.eup %4531 }
0x187a   :  { %2975 = vrot.lane.b32.xlu0 %v4532_v27, %s4544_s7 }
0x187b   :  { %v4534_v20 = vpop.eup %4533 }
0x187c   :  { %v2969_v63 = vadd.f32 1.0, %v4534_v20 }
0x187e   :  { %4535 = vrcp.f32 %v2969_v63 }
0x1888   :  { %v6105_v1 = vpop.eup %4535 }
0x1889   :  { %v2973_v31 = vmul.f32 %v6105_v1, %v6095_v39  ;;  %v4444_v39 = vpack.c.bf16 %v3025_v24, %v3024_v0 }
0x188b   :  { %4445 = vmatpush3.bf16.msra.mxu1 %v4444_v39 }
0x188c   :  { %4447 = vmatprep.subr.bf16.mxu1 %v4446_v43 }
0x188f   :  { %4449 = vmatpush3.bf16.msra.mxu1 %v4448_v11 }
0x18ec   :  { %v2976_v5 = vpop.permute.xlu0 %2975 }
0x18ed   :  { %v2978_v13 = vmul.f32 %v6105_v1, %v2976_v5 }
0x18ef   :  { %2980 = vrot.lane.b32.xlu1 %v2978_v13, %s4545_s28 }
0x18f3   :  { %4466 = vrot.lane.b32.xlu1 %v4465_v19, %s4544_s7 }
0x1961   :  { %v2981_v42 = vpop.permute.xlu1 %2980 }
0x1962   :  { %v2983_v17 = vadd.f32 %v2981_v42, %v2973_v31 }
0x1964   :  { %4537 = vtanh.f32 %v2983_v17 }
0x1965   :  { %v4467_v20 = vpop.permute.xlu1 %4466 }
0x1966   :  { %v4469_v5 = vunpack.i.h.bf16 %v4467_v20  ;;  %v4468_v13 = vunpack.i.l.bf16 %v4467_v20 }
0x1968   :  { %v3004_v37 = vsel %vm1948_vm6, %v6017_v29, %v4469_v5  ;;  %v3009_v33 = vsel %vm1948_vm6, %v6073_v8, %v4468_v13 }
0x196e   :  { %v4538_v27 = vpop.eup %4537 }
0x196f   :  { %2986 = vrot.lane.b32.xlu0 %v4538_v27, %s4544_s7 }
0x1973   :  { %4471 = vrot.lane.b32.xlu0 %v4470_v18, %s4546_s17 }
0x19e1   :  { %v2987_v63 = vpop.permute.xlu0 %2986 }
0x19e2   :  { %v2989_v40 = vmul.f32 %v6105_v1, %v2987_v63 }
0x19e5   :  { %v4472_v19 = vpop.permute.xlu0 %4471 }
0x19e6   :  { %v4474_v9 = vunpack.i.h.bf16 %v4472_v19  ;;  %v4473_v6 = vunpack.i.l.bf16 %v4472_v19 }
0x19e8   :  { %v3006_v25 = vsel %vm3005_vm0, %v3004_v37, %v4474_v9  ;;  %v3010_v44 = vsel %vm3005_vm0, %v3009_v33, %v4473_v6 }
0x19e9   :  { %v3011_v52 = vsel %vm3007_vm5, %v3010_v44, %v2989_v40  ;;  %v3008_v35 = vsel %vm3007_vm5, %v3006_v25, %v6058_v10 }
0x19ea   :  { %3115 = vmatprep.mubr.f32.mxu1 %v3011_v52 }
0x19eb   :  { %3116 = vmatmul.mubr.f32.vlgmr.msra.gmra.mrb[132].mxu1 %v3008_v35 }
0x1abe   :  { %v3685_v26 = vpop.f32.mrb[132].mxu1 }
0x1abf   :  { %v3686_v29 = vpop.f32.mrb[133].mxu1 }
0x1ac0   :  { %v3687_v34 = vadd.f32 %v3686_v29, %v3685_v26 }
0x1ac2   :  { %v3118_v8 = vadd.f32 %v3687_v34, %v3321_v57 }
0x1ac4   :  { %3122 = vst.msk [vmem:[%s6234_s10] sm:$0x1f] %vm3121_vm7, %v3118_v8 }

</bundles_post_ra>
